<compile_context>
chip_gen: v7x
topology: tpu7x:2x2x1
jax: 0.10.0
libtpu: 0.0.40
codegen_flags: <defaults>
</compile_context>

<pallas_src>
import jax
import jax.numpy as jnp
from jax import lax
from jax.experimental import pallas as pl
from jax.experimental.pallas import tpu as pltpu


def _round_up(x, m):
    return (x + m - 1) // m * m


def _tile_vmem_bytes(b_tile, L, e_pad, h_pad):
    """Rough per-grid-step VMEM footprint (bytes), used to size tiles & the limit."""
    nb = 2 * b_tile
    h4 = 4 * h_pad
    x_blk = 2 * L * nb * e_pad * 2                 # double-buffered bf16 input block
    zx = L * nb * h4 * 4                           # f32 hoisted-projection scratch
    w = 2 * ((e_pad + h_pad) * h4 * 2 + h4 * 4)    # weights + bias (double-buffered)
    out = 2 * b_tile * 4
    live = nb * h4 * 4 * 3                         # headroom for live gate/state values
    return x_blk + zx + w + out + live


def malstm_kernel(x_ref, w_ih_ref, w_hh_ref, b_ref, out_ref, zx_ref):
    """One batch tile of the fused MaLSTM forward.

    x_ref   : (L, 2*BT, E)   bf16, time-major; rows [0,BT)=branch1, [BT,2BT)=branch2
    w_ih_ref: (E, 4H)        bf16, gate order [i, f, o, g]; g columns pre-scaled by 2
    w_hh_ref: (H, 4H)        bf16, same layout / scaling
    b_ref   : (1, 4H)        f32,  b_ih + b_hh, same layout / scaling
    out_ref : (BT, 1)        f32,  exp(-||h1 - h2||_1) per pair
    zx_ref  : (L*2*BT, 4H)   f32 scratch, hoisted input projection
    """
    L, NB, E = x_ref.shape
    H4 = w_ih_ref.shape[1]
    H = H4 // 4
    BT = NB // 2

    w_ih = w_ih_ref[...]
    w_hh = w_hh_ref[...]
    b = b_ref[...]                                         # (1, 4H) f32

    # ---- Hoisted input projection: one MXU GEMM covers every timestep of both
    # branches (independent of h, so it is off the recurrence's latency path).
    x_flat = x_ref[...].reshape(L * NB, E)                 # bf16
    zx_ref[...] = jnp.dot(x_flat, w_ih, preferred_element_type=jnp.float32) + b

    def lstm_step(off, h, c):
        zx_t = zx_ref[pl.ds(off, BT), :]                   # (BT, 4H) f32
        z = zx_t + jnp.dot(h.astype(w_hh.dtype), w_hh,
                           preferred_element_type=jnp.float32)
        # Single full-width sigmoid. The g-gate inputs were pre-scaled by 2 at
        # weight-prep time, so tanh(z_g) == 2*sigmoid(2*z_g) - 1 costs one VPU
        # fma instead of a second full-width transcendental + select.
        s = jax.nn.sigmoid(z)
        i_g = s[:, 0 * H:1 * H]
        f_g = s[:, 1 * H:2 * H]
        o_g = s[:, 2 * H:3 * H]
        g_g = 2.0 * s[:, 3 * H:4 * H] - 1.0
        c = f_g * c + i_g * g_g
        h = o_g * jnp.tanh(c)
        return h, c

    zeros = jnp.zeros((BT, H), jnp.float32)
    h1, c1, h2, c2 = zeros, zeros, zeros, zeros

    if L <= 16:
        # Small static L: fully unroll. The two branch chains are independent
        # dataflow, so the scheduler hides one branch's MXU latency under the
        # other's EUP/VPU gate math (the old fused 2*BT matmul serialized them).
        for t in range(L):
            h1, c1 = lstm_step(t * NB, h1, c1)
            h2, c2 = lstm_step(t * NB + BT, h2, c2)
    else:
        # Long sequences: bounded unroll keeps code size sane while preserving
        # scheduling visibility; multiple_of keeps the VMEM slices aligned.
        def body(t, carry):
            h1, c1, h2, c2 = carry
            base = pl.multiple_of(t * NB, NB)
            h1, c1 = lstm_step(base, h1, c1)
            h2, c2 = lstm_step(pl.multiple_of(base + BT, BT), h2, c2)
            return h1, c1, h2, c2
        h1, c1, h2, c2 = lax.fori_loop(0, L, body, (h1, c1, h2, c2), unroll=4)

    # exp(-L1). The lane-axis reduction yields one scalar per sublane row, so
    # write the natural (BT, 1) column (avoids a sublane->lane relayout).
    d = jnp.sum(jnp.abs(h1 - h2), axis=1, keepdims=True)   # (BT, 1)
    out_ref[...] = jnp.exp(-d)


def malstm_forward(x1_ids, x2_ids, params, *, b_tile=None):
    """x1_ids, x2_ids: int32 (B, L) token ids. Returns (B,) similarity in [0, 1]."""
    emb_k = params["emb_k"]            # (V, E_pad)        bf16, row 0 = padding
    w_ih_k = params["w_ih_k"]          # (E_pad, 4*H_pad)  bf16, gates [i,f,o,g], g x2
    w_hh_k = params["w_hh_k"]          # (H_pad, 4*H_pad)  bf16
    b_k = params["b_k"]                # (1, 4*H_pad)      f32

    B, L = x1_ids.shape
    E_pad = emb_k.shape[1]
    H_pad = w_hh_k.shape[0]

    # ---- Batch tiling: aim for >= 2 grid steps (so ("parallel",) can shard
    # across both v7x TensorCores), cap per-branch rows at 256, and shrink the
    # tile until the per-step VMEM footprint fits ~40 MiB (safe inside v7x's
    # 64 MiB; v5e/v6e have 128 MiB so a larger explicit b_tile can be passed).
    if b_tile is None:
        b8 = _round_up(B, 8)
        target_tiles = 2 if b8 >= 16 else 1
        b_tile = min(256, _round_up((b8 + target_tiles - 1) // target_tiles, 8))
        while b_tile > 8 and _tile_vmem_bytes(b_tile, L, E_pad, H_pad) > (40 << 20):
            b_tile = _round_up(b_tile // 2, 8)
    b_tile = _round_up(b_tile, 8)
    b_pad = _round_up(B, b_tile)
    n_tiles = b_pad // b_tile

    footprint = _tile_vmem_bytes(b_tile, L, E_pad, H_pad)
    vmem_limit = int(max(32 << 20, min(100 << 20, footprint + (16 << 20))))

    # ---- Id layout + embedding gather. Rows are ordered
    # [tile0-branch1, tile0-branch2, tile1-branch1, ...] so each grid step sees
    # its matched pairs locally. Pad token 0 -> zero embedding row.
    pad = ((0, b_pad - B), (0, 0))
    ids1 = jnp.pad(x1_ids, pad)
    ids2 = jnp.pad(x2_ids, pad)
    ids1_t = ids1.reshape(n_tiles, b_tile, L)
    ids2_t = ids2.reshape(n_tiles, b_tile, L)
    ids_all = jnp.concatenate([ids1_t, ids2_t], axis=1).reshape(2 * b_pad, L)

    # Time-major bf16 gather: gathering with transposed ids writes the
    # (L, 2*b_pad, E_pad) layout directly (no HBM transpose of the big tensor).
    x_tm = jnp.take(emb_k, ids_all.T, axis=0)
    # TODO(synk): fuse this gather into the kernel (ids via scalar prefetch +
    # manual DMA from an HBM-resident table) to remove a full HBM round trip.
    # TODO(synk): training-mode dropout(p=0.1) not applied (eval/inference semantics).

    out = pl.pallas_call(
        malstm_kernel,
        out_shape=jax.ShapeDtypeStruct((b_pad, 1), jnp.float32),
        grid=(n_tiles,),
        in_specs=[
            pl.BlockSpec((L, 2 * b_tile, E_pad), lambda i: (0, i, 0)),
            pl.BlockSpec((E_pad, 4 * H_pad), lambda i: (0, 0)),
            pl.BlockSpec((H_pad, 4 * H_pad), lambda i: (0, 0)),
            pl.BlockSpec((1, 4 * H_pad), lambda i: (0, 0)),
        ],
        out_specs=pl.BlockSpec((b_tile, 1), lambda i: (i, 0)),
        scratch_shapes=[pltpu.VMEM((L * 2 * b_tile, 4 * H_pad), jnp.float32)],
        compiler_params=pltpu.CompilerParams(
            dimension_semantics=("parallel",),
            vmem_limit_bytes=vmem_limit,
        ),
    )(x_tm, w_ih_k, w_hh_k, b_k)

    return out[:B, 0]


def init_params(key, vocab_size, embedding_dim, hidden_dim):
    """PyTorch-equivalent parameters plus kernel-layout copies:
    gate order [i,f,o,g], g-gate pre-scaled by 2 (sigmoid-only gating),
    E/H zero-padded to lane multiples of 128, transposed, bf16 matmul operands."""
    k_emb, k_wih, k_whh, k_bih, k_bhh = jax.random.split(key, 5)
    H, E = hidden_dim, embedding_dim
    emb = jax.random.normal(k_emb, (vocab_size, E), jnp.float32) * 0.1
    emb = emb.at[0].set(0.0)           # padding_idx=0

    bound = 1.0 / float(H) ** 0.5
    w_ih = jax.random.uniform(k_wih, (4 * H, E), jnp.float32, -bound, bound)
    w_hh = jax.random.uniform(k_whh, (4 * H, H), jnp.float32, -bound, bound)
    b_ih = jax.random.uniform(k_bih, (4 * H,), jnp.float32, -bound, bound)
    b_hh = jax.random.uniform(k_bhh, (4 * H,), jnp.float32, -bound, bound)

    # PyTorch gate order is [i, f, g, o]; kernel order is [i, f, o, g].
    perm = jnp.concatenate([jnp.arange(0, 2 * H),
                            jnp.arange(3 * H, 4 * H),
                            jnp.arange(2 * H, 3 * H)])
    # Pre-scale the g gate by 2 so the kernel uses a single full-width sigmoid:
    # tanh(z_g) == 2 * sigmoid(2 * z_g) - 1. (Scaling by 2 is exact in bf16.)
    g_scale = jnp.concatenate([jnp.ones((3 * H,)), jnp.full((H,), 2.0)])
    w_ih_p = w_ih[perm] * g_scale[:, None]        # (4H, E)
    w_hh_p = w_hh[perm] * g_scale[:, None]        # (4H, H)
    b_p = (b_ih + b_hh)[perm] * g_scale           # (4H,)

    # Zero-pad E and H to lane multiples (128) so MXU K-dims and gate slices are
    # lane-dense. Padded gate columns have zero weight + zero bias, so padded
    # h/c lanes stay exactly 0 and never affect the L1 distance.
    E_pad = _round_up(E, 128)
    H_pad = _round_up(H, 128)
    w_ih_k = jnp.zeros((E_pad, 4 * H_pad), jnp.float32)
    w_hh_k = jnp.zeros((H_pad, 4 * H_pad), jnp.float32)
    b_k = jnp.zeros((1, 4 * H_pad), jnp.float32)
    for g in range(4):
        col = slice(g * H_pad, g * H_pad + H)
        w_ih_k = w_ih_k.at[:E, col].set(w_ih_p[g * H:(g + 1) * H, :].T)
        w_hh_k = w_hh_k.at[:H, col].set(w_hh_p[g * H:(g + 1) * H, :].T)
        b_k = b_k.at[0, col].set(b_p[g * H:(g + 1) * H])
    emb_k = jnp.zeros((vocab_size, E_pad), jnp.float32).at[:, :E].set(emb)

    return {
        # PyTorch-layout params (used by the pure-JAX reference)
        "embedding": emb, "w_ih": w_ih, "w_hh": w_hh, "b_ih": b_ih, "b_hh": b_hh,
        # kernel-layout params
        "emb_k": emb_k.astype(jnp.bfloat16),
        "w_ih_k": w_ih_k.astype(jnp.bfloat16),
        "w_hh_k": w_hh_k.astype(jnp.bfloat16),
        "b_k": b_k,
    }


def malstm_reference(x1_ids, x2_ids, params):
    """Pure-JAX reference in the PyTorch layout/gate order, mirroring the kernel's
    numerics (bf16 matmul operands, f32 accumulation and gate/cell math)."""
    emb = params["embedding"]
    w_ih = params["w_ih"].astype(jnp.bfloat16)     # (4H, E), gates [i, f, g, o]
    w_hh = params["w_hh"].astype(jnp.bfloat16)     # (4H, H)
    b = params["b_ih"] + params["b_hh"]            # (4H,) f32
    H = w_hh.shape[1]

    def run(ids):
        x = jnp.take(emb, ids, axis=0).astype(jnp.bfloat16)   # (B, L, E)
        Bb, L, _ = x.shape
        h = jnp.zeros((Bb, H), jnp.float32)
        c = jnp.zeros((Bb, H), jnp.float32)
        for t in range(L):
            z = (jnp.dot(x[:, t], w_ih.T, preferred_element_type=jnp.float32)
                 + jnp.dot(h.astype(jnp.bfloat16), w_hh.T,
                           preferred_element_type=jnp.float32) + b)
            i = jax.nn.sigmoid(z[:, 0 * H:1 * H])
            f = jax.nn.sigmoid(z[:, 1 * H:2 * H])
            g = jnp.tanh(z[:, 2 * H:3 * H])
            o = jax.nn.sigmoid(z[:, 3 * H:4 * H])
            c = f * c + i * g
            h = o * jnp.tanh(c)
        return h

    h1, h2 = run(x1_ids), run(x2_ids)
    return jnp.exp(-jnp.sum(jnp.abs(h1 - h2), axis=1))


if __name__ == "__main__":
    # Small shapes consistent with the module.
    B, L = 2, 8
    VOCAB, EMB, HID = 50, 32, 32

    key = jax.random.PRNGKey(0)
    k_params, k_x1, k_x2 = jax.random.split(key, 3)

    params = init_params(k_params, VOCAB, EMB, HID)
    x1_ids = jax.random.randint(k_x1, (B, L), 0, VOCAB, dtype=jnp.int32)
    x2_ids = jax.random.randint(k_x2, (B, L), 0, VOCAB, dtype=jnp.int32)

    sim = jax.jit(malstm_forward)(x1_ids, x2_ids, params)
    sim = jax.block_until_ready(sim)

    assert sim.shape == (B,)
    assert bool(jnp.all(jnp.isfinite(sim)))
    assert bool(jnp.all((sim >= 0.0) & (sim <= 1.0)))

    sim_ref = malstm_reference(x1_ids, x2_ids, params)
    assert bool(jnp.allclose(sim, sim_ref, atol=1e-2, rtol=1e-2)), (sim, sim_ref)

    print("KERNEL_OK")
</pallas_src>

<mosaic_0001>
module attributes {stable_mosaic.version = 11 : i64} {
  func.func @malstm_kernel(%arg0: i32, %arg1: memref<8x16x128xbf16, #tpu.memory_space<vmem>>, %arg2: memref<128x512xbf16, #tpu.memory_space<vmem>>, %arg3: memref<128x512xbf16, #tpu.memory_space<vmem>>, %arg4: memref<1x512xf32, #tpu.memory_space<vmem>>, %arg5: memref<8x1xf32, #tpu.memory_space<vmem>>, %arg6: memref<128x512xf32, #tpu.memory_space<vmem>>) attributes {dimension_semantics = [#tpu.dimension_semantics<parallel>], iteration_bounds = array<i64: 1>, scalar_prefetch = 0 : i64, scratch_operands = 1 : i64, tpu.core_type = #tpu.core_type<tc>, window_params = [{transform_indices = @transform_0, window_bounds = array<i64: 8, 16, 128>}, {pipeline_mode = #tpu.pipeline_mode<synchronous>, transform_indices = @transform_1, window_bounds = array<i64: 128, 512>}, {pipeline_mode = #tpu.pipeline_mode<synchronous>, transform_indices = @transform_2, window_bounds = array<i64: 128, 512>}, {pipeline_mode = #tpu.pipeline_mode<synchronous>, transform_indices = @transform_3, window_bounds = array<i64: 1, 512>}, {transform_indices = @transform_4, window_bounds = array<i64: 8, 1>}]} {
    %c0 = arith.constant 0 : index
    %c0_0 = arith.constant 0 : index
    %0 = vector.load %arg2[%c0, %c0_0] : memref<128x512xbf16, #tpu.memory_space<vmem>>, vector<128x512xbf16>
    %c0_1 = arith.constant 0 : index
    %c0_2 = arith.constant 0 : index
    %1 = vector.load %arg3[%c0_1, %c0_2] : memref<128x512xbf16, #tpu.memory_space<vmem>>, vector<128x512xbf16>
    %c0_3 = arith.constant 0 : index
    %c0_4 = arith.constant 0 : index
    %2 = vector.load %arg4[%c0_3, %c0_4] : memref<1x512xf32, #tpu.memory_space<vmem>>, vector<1x512xf32>
    %c0_5 = arith.constant 0 : index
    %c0_6 = arith.constant 0 : index
    %c0_7 = arith.constant 0 : index
    %3 = vector.load %arg1[%c0_5, %c0_6, %c0_7] : memref<8x16x128xbf16, #tpu.memory_space<vmem>>, vector<8x16x128xbf16>
    %4 = vector.shape_cast %3 : vector<8x16x128xbf16> to vector<128x128xbf16>
    %cst = arith.constant dense<0.000000e+00> : vector<128x512xf32>
    %5 = tpu.matmul %4, %0, %cst {dimension_numbers = #tpu.dot_dimension_numbers<[1], [0], [0], [1], [0, 0, 1, 1], [], []>} : vector<128x128xbf16>, vector<128x512xbf16>, vector<128x512xf32> -> vector<128x512xf32>
    %6 = vector.broadcast %2 : vector<1x512xf32> to vector<128x512xf32>
    %7 = arith.addf %5, %6 : vector<128x512xf32>
    %c0_8 = arith.constant 0 : index
    %c0_9 = arith.constant 0 : index
    %8 = vector.load %arg6[%c0_8, %c0_9] : memref<128x512xf32, #tpu.memory_space<vmem>>, vector<128x512xf32>
    tpu.vector_store %arg6[%c0_8, %c0_9], %7 {strides = array<i32>} : memref<128x512xf32, #tpu.memory_space<vmem>>, vector<128x512xf32>,
    %cst_10 = arith.constant 0.000000e+00 : f32
    %9 = vector.broadcast %cst_10 : f32 to vector<8x128xf32>
    %c0_11 = arith.constant 0 : index
    %c0_12 = arith.constant 0 : index
    %10 = vector.load %arg6[%c0_11, %c0_12] : memref<128x512xf32, #tpu.memory_space<vmem>>, vector<8x512xf32>
    %11 = arith.truncf %9 : vector<8x128xf32> to vector<8x128xbf16>
    %cst_13 = arith.constant dense<0.000000e+00> : vector<8x512xf32>
    %12 = tpu.matmul %11, %1, %cst_13 {dimension_numbers = #tpu.dot_dimension_numbers<[1], [0], [0], [1], [0, 0, 1, 1], [], []>} : vector<8x128xbf16>, vector<128x512xbf16>, vector<8x512xf32> -> vector<8x512xf32>
    %13 = arith.addf %10, %12 : vector<8x512xf32>
    %14 = arith.negf %13 : vector<8x512xf32>
    %15 = math.exp %14 : vector<8x512xf32>
    %cst_14 = arith.constant 1.000000e+00 : f32
    %16 = vector.broadcast %cst_14 : f32 to vector<8x512xf32>
    %17 = arith.addf %16, %15 : vector<8x512xf32>
    %18 = arith.divf %16, %17 : vector<8x512xf32>
    %19 = vector.extract_strided_slice %18 {offsets = [0, 0], sizes = [8, 128], strides = [1, 1]} : vector<8x512xf32> to vector<8x128xf32>
    %20 = vector.extract_strided_slice %18 {offsets = [0, 128], sizes = [8, 128], strides = [1, 1]} : vector<8x512xf32> to vector<8x128xf32>
    %21 = vector.extract_strided_slice %18 {offsets = [0, 256], sizes = [8, 128], strides = [1, 1]} : vector<8x512xf32> to vector<8x128xf32>
    %22 = vector.extract_strided_slice %18 {offsets = [0, 384], sizes = [8, 128], strides = [1, 1]} : vector<8x512xf32> to vector<8x128xf32>
    %cst_15 = arith.constant 2.000000e+00 : f32
    %23 = vector.broadcast %cst_15 : f32 to vector<8x128xf32>
    %24 = arith.mulf %23, %22 : vector<8x128xf32>
    %cst_16 = arith.constant 1.000000e+00 : f32
    %25 = vector.broadcast %cst_16 : f32 to vector<8x128xf32>
    %26 = arith.subf %24, %25 : vector<8x128xf32>
    %27 = arith.mulf %20, %9 : vector<8x128xf32>
    %28 = arith.mulf %19, %26 : vector<8x128xf32>
    %29 = arith.addf %27, %28 : vector<8x128xf32>
    %30 = math.tanh %29 : vector<8x128xf32>
    %31 = arith.mulf %21, %30 : vector<8x128xf32>
    %c8 = arith.constant 8 : index
    %c0_17 = arith.constant 0 : index
    %32 = vector.load %arg6[%c8, %c0_17] : memref<128x512xf32, #tpu.memory_space<vmem>>, vector<8x512xf32>
    %33 = arith.truncf %9 : vector<8x128xf32> to vector<8x128xbf16>
    %cst_18 = arith.constant dense<0.000000e+00> : vector<8x512xf32>
    %34 = tpu.matmul %33, %1, %cst_18 {dimension_numbers = #tpu.dot_dimension_numbers<[1], [0], [0], [1], [0, 0, 1, 1], [], []>} : vector<8x128xbf16>, vector<128x512xbf16>, vector<8x512xf32> -> vector<8x512xf32>
    %35 = arith.addf %32, %34 : vector<8x512xf32>
    %36 = arith.negf %35 : vector<8x512xf32>
    %37 = math.exp %36 : vector<8x512xf32>
    %cst_19 = arith.constant 1.000000e+00 : f32
    %38 = vector.broadcast %cst_19 : f32 to vector<8x512xf32>
    %39 = arith.addf %38, %37 : vector<8x512xf32>
    %40 = arith.divf %38, %39 : vector<8x512xf32>
    %41 = vector.extract_strided_slice %40 {offsets = [0, 0], sizes = [8, 128], strides = [1, 1]} : vector<8x512xf32> to vector<8x128xf32>
    %42 = vector.extract_strided_slice %40 {offsets = [0, 128], sizes = [8, 128], strides = [1, 1]} : vector<8x512xf32> to vector<8x128xf32>
    %43 = vector.extract_strided_slice %40 {offsets = [0, 256], sizes = [8, 128], strides = [1, 1]} : vector<8x512xf32> to vector<8x128xf32>
    %44 = vector.extract_strided_slice %40 {offsets = [0, 384], sizes = [8, 128], strides = [1, 1]} : vector<8x512xf32> to vector<8x128xf32>
    %cst_20 = arith.constant 2.000000e+00 : f32
    %45 = vector.broadcast %cst_20 : f32 to vector<8x128xf32>
    %46 = arith.mulf %45, %44 : vector<8x128xf32>
    %cst_21 = arith.constant 1.000000e+00 : f32
    %47 = vector.broadcast %cst_21 : f32 to vector<8x128xf32>
    %48 = arith.subf %46, %47 : vector<8x128xf32>
    %49 = arith.mulf %42, %9 : vector<8x128xf32>
    %50 = arith.mulf %41, %48 : vector<8x128xf32>
    %51 = arith.addf %49, %50 : vector<8x128xf32>
    %52 = math.tanh %51 : vector<8x128xf32>
    %53 = arith.mulf %43, %52 : vector<8x128xf32>
    %c16 = arith.constant 16 : index
    %c0_22 = arith.constant 0 : index
    %54 = vector.load %arg6[%c16, %c0_22] : memref<128x512xf32, #tpu.memory_space<vmem>>, vector<8x512xf32>
    %55 = arith.truncf %31 : vector<8x128xf32> to vector<8x128xbf16>
    %cst_23 = arith.constant dense<0.000000e+00> : vector<8x512xf32>
    %56 = tpu.matmul %55, %1, %cst_23 {dimension_numbers = #tpu.dot_dimension_numbers<[1], [0], [0], [1], [0, 0, 1, 1], [], []>} : vector<8x128xbf16>, vector<128x512xbf16>, vector<8x512xf32> -> vector<8x512xf32>
    %57 = arith.addf %54, %56 : vector<8x512xf32>
    %58 = arith.negf %57 : vector<8x512xf32>
    %59 = math.exp %58 : vector<8x512xf32>
    %cst_24 = arith.constant 1.000000e+00 : f32
    %60 = vector.broadcast %cst_24 : f32 to vector<8x512xf32>
    %61 = arith.addf %60, %59 : vector<8x512xf32>
    %62 = arith.divf %60, %61 : vector<8x512xf32>
    %63 = vector.extract_strided_slice %62 {offsets = [0, 0], sizes = [8, 128], strides = [1, 1]} : vector<8x512xf32> to vector<8x128xf32>
    %64 = vector.extract_strided_slice %62 {offsets = [0, 128], sizes = [8, 128], strides = [1, 1]} : vector<8x512xf32> to vector<8x128xf32>
    %65 = vector.extract_strided_slice %62 {offsets = [0, 256], sizes = [8, 128], strides = [1, 1]} : vector<8x512xf32> to vector<8x128xf32>
    %66 = vector.extract_strided_slice %62 {offsets = [0, 384], sizes = [8, 128], strides = [1, 1]} : vector<8x512xf32> to vector<8x128xf32>
    %cst_25 = arith.constant 2.000000e+00 : f32
    %67 = vector.broadcast %cst_25 : f32 to vector<8x128xf32>
    %68 = arith.mulf %67, %66 : vector<8x128xf32>
    %cst_26 = arith.constant 1.000000e+00 : f32
    %69 = vector.broadcast %cst_26 : f32 to vector<8x128xf32>
    %70 = arith.subf %68, %69 : vector<8x128xf32>
    %71 = arith.mulf %64, %29 : vector<8x128xf32>
    %72 = arith.mulf %63, %70 : vector<8x128xf32>
    %73 = arith.addf %71, %72 : vector<8x128xf32>
    %74 = math.tanh %73 : vector<8x128xf32>
    %75 = arith.mulf %65, %74 : vector<8x128xf32>
    %c24 = arith.constant 24 : index
    %c0_27 = arith.constant 0 : index
    %76 = vector.load %arg6[%c24, %c0_27] : memref<128x512xf32, #tpu.memory_space<vmem>>, vector<8x512xf32>
    %77 = arith.truncf %53 : vector<8x128xf32> to vector<8x128xbf16>
    %cst_28 = arith.constant dense<0.000000e+00> : vector<8x512xf32>
    %78 = tpu.matmul %77, %1, %cst_28 {dimension_numbers = #tpu.dot_dimension_numbers<[1], [0], [0], [1], [0, 0, 1, 1], [], []>} : vector<8x128xbf16>, vector<128x512xbf16>, vector<8x512xf32> -> vector<8x512xf32>
    %79 = arith.addf %76, %78 : vector<8x512xf32>
    %80 = arith.negf %79 : vector<8x512xf32>
    %81 = math.exp %80 : vector<8x512xf32>
    %cst_29 = arith.constant 1.000000e+00 : f32
    %82 = vector.broadcast %cst_29 : f32 to vector<8x512xf32>
    %83 = arith.addf %82, %81 : vector<8x512xf32>
    %84 = arith.divf %82, %83 : vector<8x512xf32>
    %85 = vector.extract_strided_slice %84 {offsets = [0, 0], sizes = [8, 128], strides = [1, 1]} : vector<8x512xf32> to vector<8x128xf32>
    %86 = vector.extract_strided_slice %84 {offsets = [0, 128], sizes = [8, 128], strides = [1, 1]} : vector<8x512xf32> to vector<8x128xf32>
    %87 = vector.extract_strided_slice %84 {offsets = [0, 256], sizes = [8, 128], strides = [1, 1]} : vector<8x512xf32> to vector<8x128xf32>
    %88 = vector.extract_strided_slice %84 {offsets = [0, 384], sizes = [8, 128], strides = [1, 1]} : vector<8x512xf32> to vector<8x128xf32>
    %cst_30 = arith.constant 2.000000e+00 : f32
    %89 = vector.broadcast %cst_30 : f32 to vector<8x128xf32>
    %90 = arith.mulf %89, %88 : vector<8x128xf32>
    %cst_31 = arith.constant 1.000000e+00 : f32
    %91 = vector.broadcast %cst_31 : f32 to vector<8x128xf32>
    %92 = arith.subf %90, %91 : vector<8x128xf32>
    %93 = arith.mulf %86, %51 : vector<8x128xf32>
    %94 = arith.mulf %85, %92 : vector<8x128xf32>
    %95 = arith.addf %93, %94 : vector<8x128xf32>
    %96 = math.tanh %95 : vector<8x128xf32>
    %97 = arith.mulf %87, %96 : vector<8x128xf32>
    %c32 = arith.constant 32 : index
    %c0_32 = arith.constant 0 : index
    %98 = vector.load %arg6[%c32, %c0_32] : memref<128x512xf32, #tpu.memory_space<vmem>>, vector<8x512xf32>
    %99 = arith.truncf %75 : vector<8x128xf32> to vector<8x128xbf16>
    %cst_33 = arith.constant dense<0.000000e+00> : vector<8x512xf32>
    %100 = tpu.matmul %99, %1, %cst_33 {dimension_numbers = #tpu.dot_dimension_numbers<[1], [0], [0], [1], [0, 0, 1, 1], [], []>} : vector<8x128xbf16>, vector<128x512xbf16>, vector<8x512xf32> -> vector<8x512xf32>
    %101 = arith.addf %98, %100 : vector<8x512xf32>
    %102 = arith.negf %101 : vector<8x512xf32>
    %103 = math.exp %102 : vector<8x512xf32>
    %cst_34 = arith.constant 1.000000e+00 : f32
    %104 = vector.broadcast %cst_34 : f32 to vector<8x512xf32>
    %105 = arith.addf %104, %103 : vector<8x512xf32>
    %106 = arith.divf %104, %105 : vector<8x512xf32>
    %107 = vector.extract_strided_slice %106 {offsets = [0, 0], sizes = [8, 128], strides = [1, 1]} : vector<8x512xf32> to vector<8x128xf32>
    %108 = vector.extract_strided_slice %106 {offsets = [0, 128], sizes = [8, 128], strides = [1, 1]} : vector<8x512xf32> to vector<8x128xf32>
    %109 = vector.extract_strided_slice %106 {offsets = [0, 256], sizes = [8, 128], strides = [1, 1]} : vector<8x512xf32> to vector<8x128xf32>
    %110 = vector.extract_strided_slice %106 {offsets = [0, 384], sizes = [8, 128], strides = [1, 1]} : vector<8x512xf32> to vector<8x128xf32>
    %cst_35 = arith.constant 2.000000e+00 : f32
    %111 = vector.broadcast %cst_35 : f32 to vector<8x128xf32>
    %112 = arith.mulf %111, %110 : vector<8x128xf32>
    %cst_36 = arith.constant 1.000000e+00 : f32
    %113 = vector.broadcast %cst_36 : f32 to vector<8x128xf32>
    %114 = arith.subf %112, %113 : vector<8x128xf32>
    %115 = arith.mulf %108, %73 : vector<8x128xf32>
    %116 = arith.mulf %107, %114 : vector<8x128xf32>
    %117 = arith.addf %115, %116 : vector<8x128xf32>
    %118 = math.tanh %117 : vector<8x128xf32>
    %119 = arith.mulf %109, %118 : vector<8x128xf32>
    %c40 = arith.constant 40 : index
    %c0_37 = arith.constant 0 : index
    %120 = vector.load %arg6[%c40, %c0_37] : memref<128x512xf32, #tpu.memory_space<vmem>>, vector<8x512xf32>
    %121 = arith.truncf %97 : vector<8x128xf32> to vector<8x128xbf16>
    %cst_38 = arith.constant dense<0.000000e+00> : vector<8x512xf32>
    %122 = tpu.matmul %121, %1, %cst_38 {dimension_numbers = #tpu.dot_dimension_numbers<[1], [0], [0], [1], [0, 0, 1, 1], [], []>} : vector<8x128xbf16>, vector<128x512xbf16>, vector<8x512xf32> -> vector<8x512xf32>
    %123 = arith.addf %120, %122 : vector<8x512xf32>
    %124 = arith.negf %123 : vector<8x512xf32>
    %125 = math.exp %124 : vector<8x512xf32>
    %cst_39 = arith.constant 1.000000e+00 : f32
    %126 = vector.broadcast %cst_39 : f32 to vector<8x512xf32>
    %127 = arith.addf %126, %125 : vector<8x512xf32>
    %128 = arith.divf %126, %127 : vector<8x512xf32>
    %129 = vector.extract_strided_slice %128 {offsets = [0, 0], sizes = [8, 128], strides = [1, 1]} : vector<8x512xf32> to vector<8x128xf32>
    %130 = vector.extract_strided_slice %128 {offsets = [0, 128], sizes = [8, 128], strides = [1, 1]} : vector<8x512xf32> to vector<8x128xf32>
    %131 = vector.extract_strided_slice %128 {offsets = [0, 256], sizes = [8, 128], strides = [1, 1]} : vector<8x512xf32> to vector<8x128xf32>
    %132 = vector.extract_strided_slice %128 {offsets = [0, 384], sizes = [8, 128], strides = [1, 1]} : vector<8x512xf32> to vector<8x128xf32>
    %cst_40 = arith.constant 2.000000e+00 : f32
    %133 = vector.broadcast %cst_40 : f32 to vector<8x128xf32>
    %134 = arith.mulf %133, %132 : vector<8x128xf32>
    %cst_41 = arith.constant 1.000000e+00 : f32
    %135 = vector.broadcast %cst_41 : f32 to vector<8x128xf32>
    %136 = arith.subf %134, %135 : vector<8x128xf32>
    %137 = arith.mulf %130, %95 : vector<8x128xf32>
    %138 = arith.mulf %129, %136 : vector<8x128xf32>
    %139 = arith.addf %137, %138 : vector<8x128xf32>
    %140 = math.tanh %139 : vector<8x128xf32>
    %141 = arith.mulf %131, %140 : vector<8x128xf32>
    %c48 = arith.constant 48 : index
    %c0_42 = arith.constant 0 : index
    %142 = vector.load %arg6[%c48, %c0_42] : memref<128x512xf32, #tpu.memory_space<vmem>>, vector<8x512xf32>
    %143 = arith.truncf %119 : vector<8x128xf32> to vector<8x128xbf16>
    %cst_43 = arith.constant dense<0.000000e+00> : vector<8x512xf32>
    %144 = tpu.matmul %143, %1, %cst_43 {dimension_numbers = #tpu.dot_dimension_numbers<[1], [0], [0], [1], [0, 0, 1, 1], [], []>} : vector<8x128xbf16>, vector<128x512xbf16>, vector<8x512xf32> -> vector<8x512xf32>
    %145 = arith.addf %142, %144 : vector<8x512xf32>
    %146 = arith.negf %145 : vector<8x512xf32>
    %147 = math.exp %146 : vector<8x512xf32>
    %cst_44 = arith.constant 1.000000e+00 : f32
    %148 = vector.broadcast %cst_44 : f32 to vector<8x512xf32>
    %149 = arith.addf %148, %147 : vector<8x512xf32>
    %150 = arith.divf %148, %149 : vector<8x512xf32>
    %151 = vector.extract_strided_slice %150 {offsets = [0, 0], sizes = [8, 128], strides = [1, 1]} : vector<8x512xf32> to vector<8x128xf32>
    %152 = vector.extract_strided_slice %150 {offsets = [0, 128], sizes = [8, 128], strides = [1, 1]} : vector<8x512xf32> to vector<8x128xf32>
    %153 = vector.extract_strided_slice %150 {offsets = [0, 256], sizes = [8, 128], strides = [1, 1]} : vector<8x512xf32> to vector<8x128xf32>
    %154 = vector.extract_strided_slice %150 {offsets = [0, 384], sizes = [8, 128], strides = [1, 1]} : vector<8x512xf32> to vector<8x128xf32>
    %cst_45 = arith.constant 2.000000e+00 : f32
    %155 = vector.broadcast %cst_45 : f32 to vector<8x128xf32>
    %156 = arith.mulf %155, %154 : vector<8x128xf32>
    %cst_46 = arith.constant 1.000000e+00 : f32
    %157 = vector.broadcast %cst_46 : f32 to vector<8x128xf32>
    %158 = arith.subf %156, %157 : vector<8x128xf32>
    %159 = arith.mulf %152, %117 : vector<8x128xf32>
    %160 = arith.mulf %151, %158 : vector<8x128xf32>
    %161 = arith.addf %159, %160 : vector<8x128xf32>
    %162 = math.tanh %161 : vector<8x128xf32>
    %163 = arith.mulf %153, %162 : vector<8x128xf32>
    %c56 = arith.constant 56 : index
    %c0_47 = arith.constant 0 : index
    %164 = vector.load %arg6[%c56, %c0_47] : memref<128x512xf32, #tpu.memory_space<vmem>>, vector<8x512xf32>
    %165 = arith.truncf %141 : vector<8x128xf32> to vector<8x128xbf16>
    %cst_48 = arith.constant dense<0.000000e+00> : vector<8x512xf32>
    %166 = tpu.matmul %165, %1, %cst_48 {dimension_numbers = #tpu.dot_dimension_numbers<[1], [0], [0], [1], [0, 0, 1, 1], [], []>} : vector<8x128xbf16>, vector<128x512xbf16>, vector<8x512xf32> -> vector<8x512xf32>
    %167 = arith.addf %164, %166 : vector<8x512xf32>
    %168 = arith.negf %167 : vector<8x512xf32>
    %169 = math.exp %168 : vector<8x512xf32>
    %cst_49 = arith.constant 1.000000e+00 : f32
    %170 = vector.broadcast %cst_49 : f32 to vector<8x512xf32>
    %171 = arith.addf %170, %169 : vector<8x512xf32>
    %172 = arith.divf %170, %171 : vector<8x512xf32>
    %173 = vector.extract_strided_slice %172 {offsets = [0, 0], sizes = [8, 128], strides = [1, 1]} : vector<8x512xf32> to vector<8x128xf32>
    %174 = vector.extract_strided_slice %172 {offsets = [0, 128], sizes = [8, 128], strides = [1, 1]} : vector<8x512xf32> to vector<8x128xf32>
    %175 = vector.extract_strided_slice %172 {offsets = [0, 256], sizes = [8, 128], strides = [1, 1]} : vector<8x512xf32> to vector<8x128xf32>
    %176 = vector.extract_strided_slice %172 {offsets = [0, 384], sizes = [8, 128], strides = [1, 1]} : vector<8x512xf32> to vector<8x128xf32>
    %cst_50 = arith.constant 2.000000e+00 : f32
    %177 = vector.broadcast %cst_50 : f32 to vector<8x128xf32>
    %178 = arith.mulf %177, %176 : vector<8x128xf32>
    %cst_51 = arith.constant 1.000000e+00 : f32
    %179 = vector.broadcast %cst_51 : f32 to vector<8x128xf32>
    %180 = arith.subf %178, %179 : vector<8x128xf32>
    %181 = arith.mulf %174, %139 : vector<8x128xf32>
    %182 = arith.mulf %173, %180 : vector<8x128xf32>
    %183 = arith.addf %181, %182 : vector<8x128xf32>
    %184 = math.tanh %183 : vector<8x128xf32>
    %185 = arith.mulf %175, %184 : vector<8x128xf32>
    %c64 = arith.constant 64 : index
    %c0_52 = arith.constant 0 : index
    %186 = vector.load %arg6[%c64, %c0_52] : memref<128x512xf32, #tpu.memory_space<vmem>>, vector<8x512xf32>
    %187 = arith.truncf %163 : vector<8x128xf32> to vector<8x128xbf16>
    %cst_53 = arith.constant dense<0.000000e+00> : vector<8x512xf32>
    %188 = tpu.matmul %187, %1, %cst_53 {dimension_numbers = #tpu.dot_dimension_numbers<[1], [0], [0], [1], [0, 0, 1, 1], [], []>} : vector<8x128xbf16>, vector<128x512xbf16>, vector<8x512xf32> -> vector<8x512xf32>
    %189 = arith.addf %186, %188 : vector<8x512xf32>
    %190 = arith.negf %189 : vector<8x512xf32>
    %191 = math.exp %190 : vector<8x512xf32>
    %cst_54 = arith.constant 1.000000e+00 : f32
    %192 = vector.broadcast %cst_54 : f32 to vector<8x512xf32>
    %193 = arith.addf %192, %191 : vector<8x512xf32>
    %194 = arith.divf %192, %193 : vector<8x512xf32>
    %195 = vector.extract_strided_slice %194 {offsets = [0, 0], sizes = [8, 128], strides = [1, 1]} : vector<8x512xf32> to vector<8x128xf32>
    %196 = vector.extract_strided_slice %194 {offsets = [0, 128], sizes = [8, 128], strides = [1, 1]} : vector<8x512xf32> to vector<8x128xf32>
    %197 = vector.extract_strided_slice %194 {offsets = [0, 256], sizes = [8, 128], strides = [1, 1]} : vector<8x512xf32> to vector<8x128xf32>
    %198 = vector.extract_strided_slice %194 {offsets = [0, 384], sizes = [8, 128], strides = [1, 1]} : vector<8x512xf32> to vector<8x128xf32>
    %cst_55 = arith.constant 2.000000e+00 : f32
    %199 = vector.broadcast %cst_55 : f32 to vector<8x128xf32>
    %200 = arith.mulf %199, %198 : vector<8x128xf32>
    %cst_56 = arith.constant 1.000000e+00 : f32
    %201 = vector.broadcast %cst_56 : f32 to vector<8x128xf32>
    %202 = arith.subf %200, %201 : vector<8x128xf32>
    %203 = arith.mulf %196, %161 : vector<8x128xf32>
    %204 = arith.mulf %195, %202 : vector<8x128xf32>
    %205 = arith.addf %203, %204 : vector<8x128xf32>
    %206 = math.tanh %205 : vector<8x128xf32>
    %207 = arith.mulf %197, %206 : vector<8x128xf32>
    %c72 = arith.constant 72 : index
    %c0_57 = arith.constant 0 : index
    %208 = vector.load %arg6[%c72, %c0_57] : memref<128x512xf32, #tpu.memory_space<vmem>>, vector<8x512xf32>
    %209 = arith.truncf %185 : vector<8x128xf32> to vector<8x128xbf16>
    %cst_58 = arith.constant dense<0.000000e+00> : vector<8x512xf32>
    %210 = tpu.matmul %209, %1, %cst_58 {dimension_numbers = #tpu.dot_dimension_numbers<[1], [0], [0], [1], [0, 0, 1, 1], [], []>} : vector<8x128xbf16>, vector<128x512xbf16>, vector<8x512xf32> -> vector<8x512xf32>
    %211 = arith.addf %208, %210 : vector<8x512xf32>
    %212 = arith.negf %211 : vector<8x512xf32>
    %213 = math.exp %212 : vector<8x512xf32>
    %cst_59 = arith.constant 1.000000e+00 : f32
    %214 = vector.broadcast %cst_59 : f32 to vector<8x512xf32>
    %215 = arith.addf %214, %213 : vector<8x512xf32>
    %216 = arith.divf %214, %215 : vector<8x512xf32>
    %217 = vector.extract_strided_slice %216 {offsets = [0, 0], sizes = [8, 128], strides = [1, 1]} : vector<8x512xf32> to vector<8x128xf32>
    %218 = vector.extract_strided_slice %216 {offsets = [0, 128], sizes = [8, 128], strides = [1, 1]} : vector<8x512xf32> to vector<8x128xf32>
    %219 = vector.extract_strided_slice %216 {offsets = [0, 256], sizes = [8, 128], strides = [1, 1]} : vector<8x512xf32> to vector<8x128xf32>
    %220 = vector.extract_strided_slice %216 {offsets = [0, 384], sizes = [8, 128], strides = [1, 1]} : vector<8x512xf32> to vector<8x128xf32>
    %cst_60 = arith.constant 2.000000e+00 : f32
    %221 = vector.broadcast %cst_60 : f32 to vector<8x128xf32>
    %222 = arith.mulf %221, %220 : vector<8x128xf32>
    %cst_61 = arith.constant 1.000000e+00 : f32
    %223 = vector.broadcast %cst_61 : f32 to vector<8x128xf32>
    %224 = arith.subf %222, %223 : vector<8x128xf32>
    %225 = arith.mulf %218, %183 : vector<8x128xf32>
    %226 = arith.mulf %217, %224 : vector<8x128xf32>
    %227 = arith.addf %225, %226 : vector<8x128xf32>
    %228 = math.tanh %227 : vector<8x128xf32>
    %229 = arith.mulf %219, %228 : vector<8x128xf32>
    %c80 = arith.constant 80 : index
    %c0_62 = arith.constant 0 : index
    %230 = vector.load %arg6[%c80, %c0_62] : memref<128x512xf32, #tpu.memory_space<vmem>>, vector<8x512xf32>
    %231 = arith.truncf %207 : vector<8x128xf32> to vector<8x128xbf16>
    %cst_63 = arith.constant dense<0.000000e+00> : vector<8x512xf32>
    %232 = tpu.matmul %231, %1, %cst_63 {dimension_numbers = #tpu.dot_dimension_numbers<[1], [0], [0], [1], [0, 0, 1, 1], [], []>} : vector<8x128xbf16>, vector<128x512xbf16>, vector<8x512xf32> -> vector<8x512xf32>
    %233 = arith.addf %230, %232 : vector<8x512xf32>
    %234 = arith.negf %233 : vector<8x512xf32>
    %235 = math.exp %234 : vector<8x512xf32>
    %cst_64 = arith.constant 1.000000e+00 : f32
    %236 = vector.broadcast %cst_64 : f32 to vector<8x512xf32>
    %237 = arith.addf %236, %235 : vector<8x512xf32>
    %238 = arith.divf %236, %237 : vector<8x512xf32>
    %239 = vector.extract_strided_slice %238 {offsets = [0, 0], sizes = [8, 128], strides = [1, 1]} : vector<8x512xf32> to vector<8x128xf32>
    %240 = vector.extract_strided_slice %238 {offsets = [0, 128], sizes = [8, 128], strides = [1, 1]} : vector<8x512xf32> to vector<8x128xf32>
    %241 = vector.extract_strided_slice %238 {offsets = [0, 256], sizes = [8, 128], strides = [1, 1]} : vector<8x512xf32> to vector<8x128xf32>
    %242 = vector.extract_strided_slice %238 {offsets = [0, 384], sizes = [8, 128], strides = [1, 1]} : vector<8x512xf32> to vector<8x128xf32>
    %cst_65 = arith.constant 2.000000e+00 : f32
    %243 = vector.broadcast %cst_65 : f32 to vector<8x128xf32>
    %244 = arith.mulf %243, %242 : vector<8x128xf32>
    %cst_66 = arith.constant 1.000000e+00 : f32
    %245 = vector.broadcast %cst_66 : f32 to vector<8x128xf32>
    %246 = arith.subf %244, %245 : vector<8x128xf32>
    %247 = arith.mulf %240, %205 : vector<8x128xf32>
    %248 = arith.mulf %239, %246 : vector<8x128xf32>
    %249 = arith.addf %247, %248 : vector<8x128xf32>
    %250 = math.tanh %249 : vector<8x128xf32>
    %251 = arith.mulf %241, %250 : vector<8x128xf32>
    %c88 = arith.constant 88 : index
    %c0_67 = arith.constant 0 : index
    %252 = vector.load %arg6[%c88, %c0_67] : memref<128x512xf32, #tpu.memory_space<vmem>>, vector<8x512xf32>
    %253 = arith.truncf %229 : vector<8x128xf32> to vector<8x128xbf16>
    %cst_68 = arith.constant dense<0.000000e+00> : vector<8x512xf32>
    %254 = tpu.matmul %253, %1, %cst_68 {dimension_numbers = #tpu.dot_dimension_numbers<[1], [0], [0], [1], [0, 0, 1, 1], [], []>} : vector<8x128xbf16>, vector<128x512xbf16>, vector<8x512xf32> -> vector<8x512xf32>
    %255 = arith.addf %252, %254 : vector<8x512xf32>
    %256 = arith.negf %255 : vector<8x512xf32>
    %257 = math.exp %256 : vector<8x512xf32>
    %cst_69 = arith.constant 1.000000e+00 : f32
    %258 = vector.broadcast %cst_69 : f32 to vector<8x512xf32>
    %259 = arith.addf %258, %257 : vector<8x512xf32>
    %260 = arith.divf %258, %259 : vector<8x512xf32>
    %261 = vector.extract_strided_slice %260 {offsets = [0, 0], sizes = [8, 128], strides = [1, 1]} : vector<8x512xf32> to vector<8x128xf32>
    %262 = vector.extract_strided_slice %260 {offsets = [0, 128], sizes = [8, 128], strides = [1, 1]} : vector<8x512xf32> to vector<8x128xf32>
    %263 = vector.extract_strided_slice %260 {offsets = [0, 256], sizes = [8, 128], strides = [1, 1]} : vector<8x512xf32> to vector<8x128xf32>
    %264 = vector.extract_strided_slice %260 {offsets = [0, 384], sizes = [8, 128], strides = [1, 1]} : vector<8x512xf32> to vector<8x128xf32>
    %cst_70 = arith.constant 2.000000e+00 : f32
    %265 = vector.broadcast %cst_70 : f32 to vector<8x128xf32>
    %266 = arith.mulf %265, %264 : vector<8x128xf32>
    %cst_71 = arith.constant 1.000000e+00 : f32
    %267 = vector.broadcast %cst_71 : f32 to vector<8x128xf32>
    %268 = arith.subf %266, %267 : vector<8x128xf32>
    %269 = arith.mulf %262, %227 : vector<8x128xf32>
    %270 = arith.mulf %261, %268 : vector<8x128xf32>
    %271 = arith.addf %269, %270 : vector<8x128xf32>
    %272 = math.tanh %271 : vector<8x128xf32>
    %273 = arith.mulf %263, %272 : vector<8x128xf32>
    %c96 = arith.constant 96 : index
    %c0_72 = arith.constant 0 : index
    %274 = vector.load %arg6[%c96, %c0_72] : memref<128x512xf32, #tpu.memory_space<vmem>>, vector<8x512xf32>
    %275 = arith.truncf %251 : vector<8x128xf32> to vector<8x128xbf16>
    %cst_73 = arith.constant dense<0.000000e+00> : vector<8x512xf32>
    %276 = tpu.matmul %275, %1, %cst_73 {dimension_numbers = #tpu.dot_dimension_numbers<[1], [0], [0], [1], [0, 0, 1, 1], [], []>} : vector<8x128xbf16>, vector<128x512xbf16>, vector<8x512xf32> -> vector<8x512xf32>
    %277 = arith.addf %274, %276 : vector<8x512xf32>
    %278 = arith.negf %277 : vector<8x512xf32>
    %279 = math.exp %278 : vector<8x512xf32>
    %cst_74 = arith.constant 1.000000e+00 : f32
    %280 = vector.broadcast %cst_74 : f32 to vector<8x512xf32>
    %281 = arith.addf %280, %279 : vector<8x512xf32>
    %282 = arith.divf %280, %281 : vector<8x512xf32>
    %283 = vector.extract_strided_slice %282 {offsets = [0, 0], sizes = [8, 128], strides = [1, 1]} : vector<8x512xf32> to vector<8x128xf32>
    %284 = vector.extract_strided_slice %282 {offsets = [0, 128], sizes = [8, 128], strides = [1, 1]} : vector<8x512xf32> to vector<8x128xf32>
    %285 = vector.extract_strided_slice %282 {offsets = [0, 256], sizes = [8, 128], strides = [1, 1]} : vector<8x512xf32> to vector<8x128xf32>
    %286 = vector.extract_strided_slice %282 {offsets = [0, 384], sizes = [8, 128], strides = [1, 1]} : vector<8x512xf32> to vector<8x128xf32>
    %cst_75 = arith.constant 2.000000e+00 : f32
    %287 = vector.broadcast %cst_75 : f32 to vector<8x128xf32>
    %288 = arith.mulf %287, %286 : vector<8x128xf32>
    %cst_76 = arith.constant 1.000000e+00 : f32
    %289 = vector.broadcast %cst_76 : f32 to vector<8x128xf32>
    %290 = arith.subf %288, %289 : vector<8x128xf32>
    %291 = arith.mulf %284, %249 : vector<8x128xf32>
    %292 = arith.mulf %283, %290 : vector<8x128xf32>
    %293 = arith.addf %291, %292 : vector<8x128xf32>
    %294 = math.tanh %293 : vector<8x128xf32>
    %295 = arith.mulf %285, %294 : vector<8x128xf32>
    %c104 = arith.constant 104 : index
    %c0_77 = arith.constant 0 : index
    %296 = vector.load %arg6[%c104, %c0_77] : memref<128x512xf32, #tpu.memory_space<vmem>>, vector<8x512xf32>
    %297 = arith.truncf %273 : vector<8x128xf32> to vector<8x128xbf16>
    %cst_78 = arith.constant dense<0.000000e+00> : vector<8x512xf32>
    %298 = tpu.matmul %297, %1, %cst_78 {dimension_numbers = #tpu.dot_dimension_numbers<[1], [0], [0], [1], [0, 0, 1, 1], [], []>} : vector<8x128xbf16>, vector<128x512xbf16>, vector<8x512xf32> -> vector<8x512xf32>
    %299 = arith.addf %296, %298 : vector<8x512xf32>
    %300 = arith.negf %299 : vector<8x512xf32>
    %301 = math.exp %300 : vector<8x512xf32>
    %cst_79 = arith.constant 1.000000e+00 : f32
    %302 = vector.broadcast %cst_79 : f32 to vector<8x512xf32>
    %303 = arith.addf %302, %301 : vector<8x512xf32>
    %304 = arith.divf %302, %303 : vector<8x512xf32>
    %305 = vector.extract_strided_slice %304 {offsets = [0, 0], sizes = [8, 128], strides = [1, 1]} : vector<8x512xf32> to vector<8x128xf32>
    %306 = vector.extract_strided_slice %304 {offsets = [0, 128], sizes = [8, 128], strides = [1, 1]} : vector<8x512xf32> to vector<8x128xf32>
    %307 = vector.extract_strided_slice %304 {offsets = [0, 256], sizes = [8, 128], strides = [1, 1]} : vector<8x512xf32> to vector<8x128xf32>
    %308 = vector.extract_strided_slice %304 {offsets = [0, 384], sizes = [8, 128], strides = [1, 1]} : vector<8x512xf32> to vector<8x128xf32>
    %cst_80 = arith.constant 2.000000e+00 : f32
    %309 = vector.broadcast %cst_80 : f32 to vector<8x128xf32>
    %310 = arith.mulf %309, %308 : vector<8x128xf32>
    %cst_81 = arith.constant 1.000000e+00 : f32
    %311 = vector.broadcast %cst_81 : f32 to vector<8x128xf32>
    %312 = arith.subf %310, %311 : vector<8x128xf32>
    %313 = arith.mulf %306, %271 : vector<8x128xf32>
    %314 = arith.mulf %305, %312 : vector<8x128xf32>
    %315 = arith.addf %313, %314 : vector<8x128xf32>
    %316 = math.tanh %315 : vector<8x128xf32>
    %317 = arith.mulf %307, %316 : vector<8x128xf32>
    %c112 = arith.constant 112 : index
    %c0_82 = arith.constant 0 : index
    %318 = vector.load %arg6[%c112, %c0_82] : memref<128x512xf32, #tpu.memory_space<vmem>>, vector<8x512xf32>
    %319 = arith.truncf %295 : vector<8x128xf32> to vector<8x128xbf16>
    %cst_83 = arith.constant dense<0.000000e+00> : vector<8x512xf32>
    %320 = tpu.matmul %319, %1, %cst_83 {dimension_numbers = #tpu.dot_dimension_numbers<[1], [0], [0], [1], [0, 0, 1, 1], [], []>} : vector<8x128xbf16>, vector<128x512xbf16>, vector<8x512xf32> -> vector<8x512xf32>
    %321 = arith.addf %318, %320 : vector<8x512xf32>
    %322 = arith.negf %321 : vector<8x512xf32>
    %323 = math.exp %322 : vector<8x512xf32>
    %cst_84 = arith.constant 1.000000e+00 : f32
    %324 = vector.broadcast %cst_84 : f32 to vector<8x512xf32>
    %325 = arith.addf %324, %323 : vector<8x512xf32>
    %326 = arith.divf %324, %325 : vector<8x512xf32>
    %327 = vector.extract_strided_slice %326 {offsets = [0, 0], sizes = [8, 128], strides = [1, 1]} : vector<8x512xf32> to vector<8x128xf32>
    %328 = vector.extract_strided_slice %326 {offsets = [0, 128], sizes = [8, 128], strides = [1, 1]} : vector<8x512xf32> to vector<8x128xf32>
    %329 = vector.extract_strided_slice %326 {offsets = [0, 256], sizes = [8, 128], strides = [1, 1]} : vector<8x512xf32> to vector<8x128xf32>
    %330 = vector.extract_strided_slice %326 {offsets = [0, 384], sizes = [8, 128], strides = [1, 1]} : vector<8x512xf32> to vector<8x128xf32>
    %cst_85 = arith.constant 2.000000e+00 : f32
    %331 = vector.broadcast %cst_85 : f32 to vector<8x128xf32>
    %332 = arith.mulf %331, %330 : vector<8x128xf32>
    %cst_86 = arith.constant 1.000000e+00 : f32
    %333 = vector.broadcast %cst_86 : f32 to vector<8x128xf32>
    %334 = arith.subf %332, %333 : vector<8x128xf32>
    %335 = arith.mulf %328, %293 : vector<8x128xf32>
    %336 = arith.mulf %327, %334 : vector<8x128xf32>
    %337 = arith.addf %335, %336 : vector<8x128xf32>
    %338 = math.tanh %337 : vector<8x128xf32>
    %339 = arith.mulf %329, %338 : vector<8x128xf32>
    %c120 = arith.constant 120 : index
    %c0_87 = arith.constant 0 : index
    %340 = vector.load %arg6[%c120, %c0_87] : memref<128x512xf32, #tpu.memory_space<vmem>>, vector<8x512xf32>
    %341 = arith.truncf %317 : vector<8x128xf32> to vector<8x128xbf16>
    %cst_88 = arith.constant dense<0.000000e+00> : vector<8x512xf32>
    %342 = tpu.matmul %341, %1, %cst_88 {dimension_numbers = #tpu.dot_dimension_numbers<[1], [0], [0], [1], [0, 0, 1, 1], [], []>} : vector<8x128xbf16>, vector<128x512xbf16>, vector<8x512xf32> -> vector<8x512xf32>
    %343 = arith.addf %340, %342 : vector<8x512xf32>
    %344 = arith.negf %343 : vector<8x512xf32>
    %345 = math.exp %344 : vector<8x512xf32>
    %cst_89 = arith.constant 1.000000e+00 : f32
    %346 = vector.broadcast %cst_89 : f32 to vector<8x512xf32>
    %347 = arith.addf %346, %345 : vector<8x512xf32>
    %348 = arith.divf %346, %347 : vector<8x512xf32>
    %349 = vector.extract_strided_slice %348 {offsets = [0, 0], sizes = [8, 128], strides = [1, 1]} : vector<8x512xf32> to vector<8x128xf32>
    %350 = vector.extract_strided_slice %348 {offsets = [0, 128], sizes = [8, 128], strides = [1, 1]} : vector<8x512xf32> to vector<8x128xf32>
    %351 = vector.extract_strided_slice %348 {offsets = [0, 256], sizes = [8, 128], strides = [1, 1]} : vector<8x512xf32> to vector<8x128xf32>
    %352 = vector.extract_strided_slice %348 {offsets = [0, 384], sizes = [8, 128], strides = [1, 1]} : vector<8x512xf32> to vector<8x128xf32>
    %cst_90 = arith.constant 2.000000e+00 : f32
    %353 = vector.broadcast %cst_90 : f32 to vector<8x128xf32>
    %354 = arith.mulf %353, %352 : vector<8x128xf32>
    %cst_91 = arith.constant 1.000000e+00 : f32
    %355 = vector.broadcast %cst_91 : f32 to vector<8x128xf32>
    %356 = arith.subf %354, %355 : vector<8x128xf32>
    %357 = arith.mulf %350, %315 : vector<8x128xf32>
    %358 = arith.mulf %349, %356 : vector<8x128xf32>
    %359 = arith.addf %357, %358 : vector<8x128xf32>
    %360 = math.tanh %359 : vector<8x128xf32>
    %361 = arith.mulf %351, %360 : vector<8x128xf32>
    %362 = arith.subf %339, %361 : vector<8x128xf32>
    %363 = math.absf %362 : vector<8x128xf32>
    %cst_92 = arith.constant dense<0.000000e+00> : vector<8xf32>
    %364 = vector.multi_reduction <add>, %363, %cst_92 [1] : vector<8x128xf32> to vector<8xf32>
    %365 = vector.shape_cast %364 : vector<8xf32> to vector<8x1xf32>
    %cst_93 = arith.constant 0.000000e+00 : f32
    %366 = vector.broadcast %cst_93 : f32 to vector<8x1xf32>
    %367 = arith.subf %366, %365 : vector<8x1xf32>
    %368 = math.exp %367 : vector<8x1xf32>
    %c0_94 = arith.constant 0 : index
    %c0_95 = arith.constant 0 : index
    %369 = vector.load %arg5[%c0_94, %c0_95] : memref<8x1xf32, #tpu.memory_space<vmem>>, vector<8x1xf32>
    tpu.vector_store %arg5[%c0_94, %c0_95], %368 {strides = array<i32>} : memref<8x1xf32, #tpu.memory_space<vmem>>, vector<8x1xf32>,
    return
  }
  func.func @transform_0(%arg0: i32) -> (i32, i32, i32) {
    %c0_i32 = arith.constant 0 : i32
    %c0_i32_0 = arith.constant 0 : i32
    %c0_i32_1 = arith.constant 0 : i32
    return %c0_i32, %arg0, %c0_i32_0 : i32, i32, i32
  }
  func.func @transform_1(%arg0: i32) -> (i32, i32) {
    %c0_i32 = arith.constant 0 : i32
    %c0_i32_0 = arith.constant 0 : i32
    %c0_i32_1 = arith.constant 0 : i32
    return %c0_i32, %c0_i32_0 : i32, i32
  }
  func.func @transform_2(%arg0: i32) -> (i32, i32) {
    %c0_i32 = arith.constant 0 : i32
    %c0_i32_0 = arith.constant 0 : i32
    %c0_i32_1 = arith.constant 0 : i32
    return %c0_i32, %c0_i32_0 : i32, i32
  }
  func.func @transform_3(%arg0: i32) -> (i32, i32) {
    %c0_i32 = arith.constant 0 : i32
    %c0_i32_0 = arith.constant 0 : i32
    %c0_i32_1 = arith.constant 0 : i32
    return %c0_i32, %c0_i32_0 : i32, i32
  }
  func.func @transform_4(%arg0: i32) -> (i32, i32) {
    %c0_i32 = arith.constant 0 : i32
    %c0_i32_0 = arith.constant 0 : i32
    return %arg0, %c0_i32 : i32, i32
  }
}

</mosaic_0001>

<bundles_post_ra>
// kernel: malstm_forward.1
= control target key start
LH: loop header
LB: loop body
LE: loop exit
PB: predicated region body
PF: predicated region fallthrough
CT: control target
= control target key end

     0   :  { %v4758_v1 = vmov 0   ;;  %vm2653_vm0 = vcmask 7168   ;;  %s4753_s1 = inlined_call_operand.vmem [shape: bf16[128,512], index: 1, kind: input, shape index: {}]   ;;  %s4754_s0 = inlined_call_operand.vmem [shape: bf16[8,16,128], index: 0, kind: input, shape index: {}]   ;;  %s4755_s2 = inlined_call_operand.vmem [shape: bf16[128,512], index: 2, kind: input, shape index: {}]   ;;  %s4756_s3 = inlined_call_operand.vmem [shape: f32[1,512], index: 3, kind: input, shape index: {}]   ;;  %s4757_s4 = inlined_call_operand.vmem [shape: f32[8,1], index: 4, kind: output, shape index: {}]  }
   0x1   :  { %v2812_v0 = vld [vmem:[%s4753_s1 + $0x4] ss:$16 sps:$4 sm:$0xff]   ;;  %360 = vmatprep.mubr.bf16.mxu0 %v4758_v1  ;;  %473 = vmatprep.mubr.bf16.mxu1 %v4758_v1  ;;  %v2814_v2 = vld [vmem:[%s4753_s1 + $0xc] ss:$16 sps:$4 sm:$0xff]   ;;  %v2816_v3 = vld [vmem:[%s4753_s1] ss:$16 sps:$4 sm:$0xff]  }
   0x2   :  { %328 = vmatprep.subr.bf16.mxu0 %v2812_v0  ;;  %v2817_v4 = vld [vmem:[%s4753_s1 + $0x8] ss:$16 sps:$4 sm:$0xff]   ;;  %441 = vmatprep.subr.bf16.mxu1 %v2814_v2  ;;  %v2818_v5 = vld [vmem:[%s4753_s1 + $0x24] ss:$16 sps:$4 sm:$0xff]   ;;  %v2820_v6 = vld [vmem:[%s4753_s1 + $0x2c] ss:$16 sps:$4 sm:$0xff]  }
   0x3   :  { %329 = vmatpush1.bf16.msra.mxu0 %v2816_v3  ;;  %442 = vmatpush1.bf16.msra.mxu1 %v2817_v4  ;;  %v2822_v7 = vld [vmem:[%s4753_s1 + $0x20] ss:$16 sps:$4 sm:$0xff]   ;;  %v2823_v8 = vld [vmem:[%s4753_s1 + $0x28] ss:$16 sps:$4 sm:$0xff]   ;;  %v2824_v9 = vld [vmem:[%s4753_s1 + $0x44] ss:$16 sps:$4 sm:$0xff]  }
   0x4   :  { %330 = vmatprep.subr.bf16.mxu0 %v2818_v5  ;;  %443 = vmatprep.subr.bf16.mxu1 %v2820_v6  ;;  %v2826_v10 = vld [vmem:[%s4753_s1 + $0x4c] ss:$16 sps:$4 sm:$0xff]   ;;  %v2828_v11 = vld [vmem:[%s4753_s1 + $0x40] ss:$16 sps:$4 sm:$0xff]   ;;  %v2829_v12 = vld [vmem:[%s4753_s1 + $0x48] ss:$16 sps:$4 sm:$0xff]  }
   0x5   :  { %v2830_v13 = vld [vmem:[%s4753_s1 + $0x64] ss:$16 sps:$4 sm:$0xff]   ;;  %v2832_v14 = vld [vmem:[%s4753_s1 + $0x6c] ss:$16 sps:$4 sm:$0xff]   ;;  %v2834_v15 = vld [vmem:[%s4753_s1 + $0x60] ss:$16 sps:$4 sm:$0xff]  }
   0x6   :  { %v2835_v16 = vld [vmem:[%s4753_s1 + $0x68] ss:$16 sps:$4 sm:$0xff]   ;;  %v2836_v17 = vld [vmem:[%s4753_s1 + $0x84] ss:$16 sps:$4 sm:$0xff]   ;;  %v2838_v18 = vld [vmem:[%s4753_s1 + $0x8c] ss:$16 sps:$4 sm:$0xff]  }
   0x7   :  { %331 = vmatpush1.bf16.msra.mxu0 %v2822_v7  ;;  %444 = vmatpush1.bf16.msra.mxu1 %v2823_v8  ;;  %v2840_v19 = vld [vmem:[%s4753_s1 + $0x80] ss:$16 sps:$4 sm:$0xff]   ;;  %v2841_v20 = vld [vmem:[%s4753_s1 + $0x88] ss:$16 sps:$4 sm:$0xff]   ;;  %v2842_v21 = vld [vmem:[%s4753_s1 + $0xa4] ss:$16 sps:$4 sm:$0xff]  }
   0x8   :  { %332 = vmatprep.subr.bf16.mxu0 %v2824_v9  ;;  %445 = vmatprep.subr.bf16.mxu1 %v2826_v10  ;;  %v2844_v22 = vld [vmem:[%s4753_s1 + $0xac] ss:$16 sps:$4 sm:$0xff]   ;;  %v2846_v23 = vld [vmem:[%s4753_s1 + $0xa0] ss:$16 sps:$4 sm:$0xff]   ;;  %v2847_v24 = vld [vmem:[%s4753_s1 + $0xa8] ss:$16 sps:$4 sm:$0xff]   ;;  %v100_v10 = vlaneseq }
   0x9   :  { %v2848_v25 = vld [vmem:[%s4753_s1 + $0xc4] ss:$16 sps:$4 sm:$0xff]   ;;  %v2850_v26 = vld [vmem:[%s4753_s1 + $0xcc] ss:$16 sps:$4 sm:$0xff]   ;;  %v2852_v27 = vld [vmem:[%s4753_s1 + $0xc0] ss:$16 sps:$4 sm:$0xff]  }
   0xa   :  { %v2853_v28 = vld [vmem:[%s4753_s1 + $0xc8] ss:$16 sps:$4 sm:$0xff]   ;;  %v2854_v29 = vld [vmem:[%s4753_s1 + $0xe4] ss:$16 sps:$4 sm:$0xff]   ;;  %v2856_v30 = vld [vmem:[%s4753_s1 + $0xec] ss:$16 sps:$4 sm:$0xff]  }
   0xb   :  { %333 = vmatpush1.bf16.msra.mxu0 %v2828_v11  ;;  %446 = vmatpush1.bf16.msra.mxu1 %v2829_v12  ;;  %v2858_v31 = vld [vmem:[%s4753_s1 + $0xe0] ss:$16 sps:$4 sm:$0xff]   ;;  %v2859_v32 = vld [vmem:[%s4753_s1 + $0xe8] ss:$16 sps:$4 sm:$0xff]   ;;  %v3397_v33 = vld [vmem:[%s4755_s2 + $0xc] ss:$16 sps:$4 sm:$0xff]  }
   0xc   :  { %334 = vmatprep.subr.bf16.mxu0 %v2830_v13  ;;  %447 = vmatprep.subr.bf16.mxu1 %v2832_v14  ;;  %v3402_v34 = vld [vmem:[%s4755_s2 + $0x4] ss:$16 sps:$4 sm:$0xff]   ;;  %v3410_v36 = vld [vmem:[%s4755_s2 + $0x8] ss:$16 sps:$4 sm:$0xff]   ;;  %v3415_v37 = vld [vmem:[%s4755_s2] ss:$16 sps:$4 sm:$0xff]  }
   0xd   :  { %v2860_v35 = vld [vmem:[%s4754_s0] sm:$0xff]   ;;  %v3422_v38 = vld [vmem:[%s4755_s2 + $0x2c] ss:$16 sps:$4 sm:$0xff]   ;;  %v3432_v40 = vld [vmem:[%s4755_s2 + $0x28] ss:$16 sps:$4 sm:$0xff]   ;;  %v101_v11 = vshrl.u32 %v100_v10, 7 }
   0xe   :  { %v3427_v39 = vld [vmem:[%s4755_s2 + $0x24] ss:$16 sps:$4 sm:$0xff]   ;;  %v3437_v41 = vld [vmem:[%s4755_s2 + $0x20] ss:$16 sps:$4 sm:$0xff]   ;;  %v3444_v42 = vld [vmem:[%s4755_s2 + $0x4c] ss:$16 sps:$4 sm:$0xff]  }
   0xf   :  { %335 = vmatpush1.bf16.msra.mxu0 %v2834_v15  ;;  %448 = vmatpush1.bf16.msra.mxu1 %v2835_v16  ;;  %v3451_v43 = vld [vmem:[%s4755_s2 + $0x44] ss:$16 sps:$4 sm:$0xff]   ;;  %v2867_v44 = vld [vmem:[%s4754_s0 + $0x8] sm:$0xff]   ;;  %v3470_v46 = vld [vmem:[%s4755_s2 + $0x40] ss:$16 sps:$4 sm:$0xff]  }
  0x10   :  { %336 = vmatprep.subr.bf16.mxu0 %v2836_v17  ;;  %449 = vmatprep.subr.bf16.mxu1 %v2838_v18  ;;  %v3463_v45 = vld [vmem:[%s4755_s2 + $0x48] ss:$16 sps:$4 sm:$0xff]   ;;  %v3475_v47 = vld [vmem:[%s4755_s2 + $0x6c] ss:$16 sps:$4 sm:$0xff]   ;;  %v3480_v48 = vld [vmem:[%s4755_s2 + $0x64] ss:$16 sps:$4 sm:$0xff]  }
  0x11   :  { %v3489_v49 = vld [vmem:[%s4755_s2 + $0x68] ss:$16 sps:$4 sm:$0xff]   ;;  %v3494_v50 = vld [vmem:[%s4755_s2 + $0x60] ss:$16 sps:$4 sm:$0xff]   ;;  %v3501_v51 = vld [vmem:[%s4755_s2 + $0x8c] ss:$16 sps:$4 sm:$0xff]  }
  0x12   :  { %v3506_v52 = vld [vmem:[%s4755_s2 + $0x84] ss:$16 sps:$4 sm:$0xff]   ;;  %v3514_v54 = vld [vmem:[%s4755_s2 + $0x88] ss:$16 sps:$4 sm:$0xff]   ;;  %v3521_v55 = vld [vmem:[%s4755_s2 + $0x80] ss:$16 sps:$4 sm:$0xff]  }
  0x13   :  { %337 = vmatpush1.bf16.msra.mxu0 %v2840_v19  ;;  %450 = vmatpush1.bf16.msra.mxu1 %v2841_v20  ;;  %v2874_v53 = vld [vmem:[%s4754_s0 + $0x10] sm:$0xff]   ;;  %v3528_v56 = vld [vmem:[%s4755_s2 + $0xac] ss:$16 sps:$4 sm:$0xff]   ;;  %v3542_v58 = vld [vmem:[%s4755_s2 + $0xa8] ss:$16 sps:$4 sm:$0xff]   ;;  %v110_v18 = vsub.s32 2, %v101_v11 }
  0x14   :  { %338 = vmatprep.subr.bf16.mxu0 %v2842_v21  ;;  %451 = vmatprep.subr.bf16.mxu1 %v2844_v22  ;;  %v3533_v57 = vld [vmem:[%s4755_s2 + $0xa4] ss:$16 sps:$4 sm:$0xff]   ;;  %v3547_v59 = vld [vmem:[%s4755_s2 + $0xa0] ss:$16 sps:$4 sm:$0xff]   ;;  %v3554_v60 = vld [vmem:[%s4755_s2 + $0xcc] ss:$16 sps:$4 sm:$0xff]  }
  0x15   :  { %v3559_v61 = vld [vmem:[%s4755_s2 + $0xc4] ss:$16 sps:$4 sm:$0xff]   ;;  %v2881_v62 = vld [vmem:[%s4754_s0 + $0x18] sm:$0xff]   ;;  %v3574_v0 = vld [vmem:[%s4755_s2 + $0xc0] ss:$16 sps:$4 sm:$0xff]   ;;  %v102_v19 = vsub.s32 0, %v101_v11 }
  0x16   :  { %v3569_v63 = vld [vmem:[%s4755_s2 + $0xc8] ss:$16 sps:$4 sm:$0xff]   ;;  %v3581_v2 = vld [vmem:[%s4755_s2 + $0xec] ss:$16 sps:$4 sm:$0xff]   ;;  %v3586_v3 = vld [vmem:[%s4755_s2 + $0xe4] ss:$16 sps:$4 sm:$0xff]  }
  0x17   :  { %339 = vmatpush1.bf16.msra.mxu0 %v2846_v23  ;;  %452 = vmatpush1.bf16.msra.mxu1 %v2847_v24  ;;  %v3595_v4 = vld [vmem:[%s4755_s2 + $0xe8] ss:$16 sps:$4 sm:$0xff]   ;;  %v3600_v5 = vld [vmem:[%s4755_s2 + $0xe0] ss:$16 sps:$4 sm:$0xff]   ;;  %v114_v23 = vsub.s32 3, %v101_v11  ;;  %v106_v24 = vsub.s32 1, %v101_v11 }
  0x18   :  { %340 = vmatprep.subr.bf16.mxu0 %v2848_v25  ;;  %453 = vmatprep.subr.bf16.mxu1 %v2850_v26  ;;  %v2888_v6 = vld [vmem:[%s4754_s0 + $0x20] sm:$0xff]   ;;  %v2895_v7 = vld [vmem:[%s4754_s0 + $0x28] sm:$0xff]   ;;  %v2902_v8 = vld [vmem:[%s4754_s0 + $0x30] sm:$0xff]  }
  0x19   :  { %v2909_v9 = vld [vmem:[%s4754_s0 + $0x38] sm:$0xff]   ;;  %v82_v22 = vld [vmem:[%s4756_s3] sm:$0xf] }
  0x1a   :  { %v3683_v25 = vrot.slane %v82_v22, %v110_v18  ;;  %v3685_v26 = vrot.slane %v82_v22, %v102_v19 }
  0x1b   :  { %341 = vmatpush1.bf16.msra.mxu0 %v2852_v27  ;;  %454 = vmatpush1.bf16.msra.mxu1 %v2853_v28  ;;  %v3687_v27 = vrot.slane %v82_v22, %v114_v23  ;;  %v3689_v28 = vrot.slane %v82_v22, %v106_v24 }
  0x1c   :  { %342 = vmatprep.subr.bf16.mxu0 %v2854_v29  ;;  %455 = vmatprep.subr.bf16.mxu1 %v2856_v30 }
  0x1f   :  { %343 = vmatpush1.bf16.msra.mxu0 %v2858_v31  ;;  %456 = vmatpush1.bf16.msra.mxu1 %v2859_v32 }
  0x20   :  { %823 = vmatprep.subr.bf16.mxu1 %v3397_v33  ;;  %782 = vmatprep.subr.bf16.mxu0 %v3402_v34 }
  0x22   :  { %361 = vmatmul.mubr.bf16.vlgmr.msra.gmra.mrb[0].mxu0 %v2860_v35  ;;  %474 = vmatmul.mubr.bf16.vlgmr.msra.gmra.mrb[0].mxu1 %v2860_v35 }
  0x23   :  { %824 = vmatpush1.bf16.msra.mxu1 %v3410_v36  ;;  %783 = vmatpush1.bf16.msra.mxu0 %v3415_v37 }
  0x24   :  { %370 = vmatprep.mubr.bf16.mxu0 %v4758_v1  ;;  %483 = vmatprep.mubr.bf16.mxu1 %v4758_v1 }
  0x25   :  { %825 = vmatprep.subr.bf16.mxu1 %v3422_v38  ;;  %784 = vmatprep.subr.bf16.mxu0 %v3427_v39 }
  0x27   :  { %826 = vmatpush1.bf16.msra.mxu1 %v3432_v40  ;;  %785 = vmatpush1.bf16.msra.mxu0 %v3437_v41 }
  0x28   :  { %827 = vmatprep.subr.bf16.mxu1 %v3444_v42  ;;  %786 = vmatprep.subr.bf16.mxu0 %v3451_v43 }
  0x2a   :  { %371 = vmatmul.mubr.bf16.gmra.mrb[4].mxu0 %v2867_v44  ;;  %484 = vmatmul.mubr.bf16.gmra.mrb[4].mxu1 %v2867_v44 }
  0x2b   :  { %380 = vmatprep.mubr.bf16.mxu0 %v4758_v1  ;;  %493 = vmatprep.mubr.bf16.mxu1 %v4758_v1 }
  0x2c   :  { %828 = vmatpush1.bf16.msra.mxu1 %v3463_v45  ;;  %787 = vmatpush1.bf16.msra.mxu0 %v3470_v46 }
  0x2d   :  { %829 = vmatprep.subr.bf16.mxu1 %v3475_v47  ;;  %788 = vmatprep.subr.bf16.mxu0 %v3480_v48 }
  0x30   :  { %830 = vmatpush1.bf16.msra.mxu1 %v3489_v49  ;;  %789 = vmatpush1.bf16.msra.mxu0 %v3494_v50 }
  0x31   :  { %831 = vmatprep.subr.bf16.mxu1 %v3501_v51  ;;  %790 = vmatprep.subr.bf16.mxu0 %v3506_v52 }
  0x32   :  { %381 = vmatmul.mubr.bf16.gmra.mrb[8].mxu0 %v2874_v53  ;;  %494 = vmatmul.mubr.bf16.gmra.mrb[8].mxu1 %v2874_v53 }
  0x33   :  { %390 = vmatprep.mubr.bf16.mxu0 %v4758_v1  ;;  %503 = vmatprep.mubr.bf16.mxu1 %v4758_v1 }
  0x34   :  { %832 = vmatpush1.bf16.msra.mxu1 %v3514_v54  ;;  %791 = vmatpush1.bf16.msra.mxu0 %v3521_v55 }
  0x35   :  { %833 = vmatprep.subr.bf16.mxu1 %v3528_v56  ;;  %792 = vmatprep.subr.bf16.mxu0 %v3533_v57 }
  0x38   :  { %834 = vmatpush1.bf16.msra.mxu1 %v3542_v58  ;;  %793 = vmatpush1.bf16.msra.mxu0 %v3547_v59 }
  0x39   :  { %835 = vmatprep.subr.bf16.mxu1 %v3554_v60  ;;  %794 = vmatprep.subr.bf16.mxu0 %v3559_v61 }
  0x3a   :  { %391 = vmatmul.mubr.bf16.gmra.mrb[12].mxu0 %v2881_v62  ;;  %504 = vmatmul.mubr.bf16.gmra.mrb[12].mxu1 %v2881_v62 }
  0x3b   :  { %400 = vmatprep.mubr.bf16.mxu0 %v4758_v1  ;;  %513 = vmatprep.mubr.bf16.mxu1 %v4758_v1 }
  0x3c   :  { %836 = vmatpush1.bf16.msra.mxu1 %v3569_v63  ;;  %795 = vmatpush1.bf16.msra.mxu0 %v3574_v0 }
  0x3d   :  { %837 = vmatprep.subr.bf16.mxu1 %v3581_v2  ;;  %796 = vmatprep.subr.bf16.mxu0 %v3586_v3 }
  0x40   :  { %838 = vmatpush1.bf16.msra.mxu1 %v3595_v4  ;;  %797 = vmatpush1.bf16.msra.mxu0 %v3600_v5 }
  0x41   :  { %943 = vmatprep.subr.bf16.mxu0 %v3402_v34  ;;  %984 = vmatprep.subr.bf16.mxu1 %v3397_v33 }
  0x42   :  { %401 = vmatmul.mubr.bf16.gmra.mrb[16].mxu0 %v2888_v6  ;;  %514 = vmatmul.mubr.bf16.gmra.mrb[16].mxu1 %v2888_v6 }
  0x43   :  { %410 = vmatprep.mubr.bf16.mxu0 %v4758_v1  ;;  %523 = vmatprep.mubr.bf16.mxu1 %v4758_v1 }
  0x4a   :  { %411 = vmatmul.mubr.bf16.gmra.mrb[20].mxu0 %v2895_v7  ;;  %524 = vmatmul.mubr.bf16.gmra.mrb[20].mxu1 %v2895_v7 }
  0x4b   :  { %420 = vmatprep.mubr.bf16.mxu0 %v4758_v1  ;;  %533 = vmatprep.mubr.bf16.mxu1 %v4758_v1 }
  0x52   :  { %421 = vmatmul.mubr.bf16.gmra.mrb[24].mxu0 %v2902_v8  ;;  %534 = vmatmul.mubr.bf16.gmra.mrb[24].mxu1 %v2902_v8 }
  0x53   :  { %430 = vmatprep.mubr.bf16.mxu0 %v4758_v1  ;;  %543 = vmatprep.mubr.bf16.mxu1 %v4758_v1 }
  0x5a   :  { %431 = vmatmul.mubr.bf16.gmra.mrb[28].mxu0 %v2909_v9  ;;  %544 = vmatmul.mubr.bf16.gmra.mrb[28].mxu1 %v2909_v9 }
  0x5b   :  { %814 = vmatprep.mubr.bf16.mxu0 %v4758_v1  ;;  %855 = vmatprep.mubr.bf16.mxu1 %v4758_v1 }
  0x62   :  { %815 = vmatmul.mubr.bf16.vlgmr.msra.gmra.mrb[32].mxu0 %v4758_v1  ;;  %856 = vmatmul.mubr.bf16.vlgmr.msra.gmra.mrb[32].mxu1 %v4758_v1 }
  0x63   :  { %944 = vmatpush1.bf16.msra.mxu0 %v3415_v37  ;;  %985 = vmatpush1.bf16.msra.mxu1 %v3410_v36 }
  0x64   :  { %945 = vmatprep.subr.bf16.mxu0 %v3427_v39  ;;  %986 = vmatprep.subr.bf16.mxu1 %v3422_v38 }
  0x65   :  { %975 = vmatprep.mubr.bf16.mxu0 %v4758_v1  ;;  %1016 = vmatprep.mubr.bf16.mxu1 %v4758_v1 }
  0x67   :  { %946 = vmatpush1.bf16.msra.mxu0 %v3437_v41  ;;  %987 = vmatpush1.bf16.msra.mxu1 %v3432_v40 }
  0x68   :  { %947 = vmatprep.subr.bf16.mxu0 %v3451_v43  ;;  %988 = vmatprep.subr.bf16.mxu1 %v3444_v42 }
  0x6b   :  { %948 = vmatpush1.bf16.msra.mxu0 %v3470_v46  ;;  %989 = vmatpush1.bf16.msra.mxu1 %v3463_v45 }
  0x6c   :  { %949 = vmatprep.subr.bf16.mxu0 %v3480_v48  ;;  %990 = vmatprep.subr.bf16.mxu1 %v3475_v47 }
  0x6f   :  { %950 = vmatpush1.bf16.msra.mxu0 %v3494_v50  ;;  %991 = vmatpush1.bf16.msra.mxu1 %v3489_v49 }
  0x70   :  { %951 = vmatprep.subr.bf16.mxu0 %v3506_v52  ;;  %992 = vmatprep.subr.bf16.mxu1 %v3501_v51 }
  0x73   :  { %952 = vmatpush1.bf16.msra.mxu0 %v3521_v55  ;;  %993 = vmatpush1.bf16.msra.mxu1 %v3514_v54 }
  0x74   :  { %953 = vmatprep.subr.bf16.mxu0 %v3533_v57  ;;  %994 = vmatprep.subr.bf16.mxu1 %v3528_v56 }
  0x77   :  { %954 = vmatpush1.bf16.msra.mxu0 %v3547_v59  ;;  %995 = vmatpush1.bf16.msra.mxu1 %v3542_v58 }
  0x78   :  { %955 = vmatprep.subr.bf16.mxu0 %v3559_v61  ;;  %996 = vmatprep.subr.bf16.mxu1 %v3554_v60 }
  0x7b   :  { %956 = vmatpush1.bf16.msra.mxu0 %v3574_v0  ;;  %997 = vmatpush1.bf16.msra.mxu1 %v3569_v63 }
  0x7c   :  { %957 = vmatprep.subr.bf16.mxu0 %v3586_v3  ;;  %998 = vmatprep.subr.bf16.mxu1 %v3581_v2 }
  0x7f   :  { %958 = vmatpush1.bf16.msra.mxu0 %v3600_v5  ;;  %999 = vmatpush1.bf16.msra.mxu1 %v3595_v4 }
  0x80   :  { %1065 = vmatprep.subr.bf16.mxu0 %v3402_v34  ;;  %1106 = vmatprep.subr.bf16.mxu1 %v3397_v33 }
  0xf5   :  { %v3664_v12 = vpop.f32.mrb[0].mxu1  ;;  %v3666_v13 = vpop.f32.mrb[0].mxu0 }
  0xf6   :  { %v3668_v14 = vpop.f32.mrb[1].mxu1  ;;  %v3670_v15 = vpop.f32.mrb[1].mxu0 }
  0xf7   :  { %v3672_v16 = vpop.f32.mrb[2].mxu1  ;;  %v3674_v17 = vpop.f32.mrb[2].mxu0 }
  0xf8   :  { %v3676_v20 = vpop.f32.mrb[3].mxu1  ;;  %v3678_v21 = vpop.f32.mrb[3].mxu0 }
  0xfd   :  { %v485_v29 = vpop.f32.mrb[4].mxu1  ;;  %v372_v30 = vpop.f32.mrb[4].mxu0 }
  0xfe   :  { %v3692_v31 = vadd.f32 %v485_v29, %v3683_v25  ;;  %v487_v32 = vpop.f32.mrb[5].mxu1  ;;  %v3695_v35 = vadd.f32 %v372_v30, %v3685_v26  ;;  %v374_v44 = vpop.f32.mrb[5].mxu0 }
  0xff   :  { %v3698_v53 = vadd.f32 %v487_v32, %v3687_v27  ;;  %v489_v62 = vpop.f32.mrb[6].mxu1  ;;  %v3701_v6 = vadd.f32 %v374_v44, %v3689_v28  ;;  %v376_v7 = vpop.f32.mrb[6].mxu0 }
 0x100   :  { %v3704_v8 = vadd.f32 %v489_v62, %v3683_v25  ;;  %v491_v9 = vpop.f32.mrb[7].mxu1  ;;  %v3707_v10 = vadd.f32 %v376_v7, %v3685_v26  ;;  %v378_v11 = vpop.f32.mrb[7].mxu0 }
 0x101   :  { %v3710_v18 = vadd.f32 %v491_v9, %v3687_v27  ;;  %v3713_v19 = vadd.f32 %v378_v11, %v3689_v28 }
 0x102   :  { %4760 = vst [vmem:[#allocation3_spill] sm:$0xff] %v3704_v8  ;;  %4761 = vst [vmem:[#allocation4_spill] sm:$0xff] %v3707_v10 }
 0x103   :  { %4762 = vst [vmem:[#allocation5_spill] sm:$0xff] %v3710_v18  ;;  %4763 = vst [vmem:[#allocation6_spill] sm:$0xff] %v3713_v19 }
 0x105   :  { %v495_v22 = vpop.f32.mrb[8].mxu1  ;;  %v382_v23 = vpop.f32.mrb[8].mxu0 }
 0x106   :  { %v3716_v24 = vadd.f32 %v495_v22, %v3683_v25  ;;  %v497_v29 = vpop.f32.mrb[9].mxu1  ;;  %v3719_v30 = vadd.f32 %v382_v23, %v3685_v26  ;;  %v384_v32 = vpop.f32.mrb[9].mxu0 }
 0x107   :  { %v3722_v44 = vadd.f32 %v497_v29, %v3687_v27  ;;  %v499_v62 = vpop.f32.mrb[10].mxu1  ;;  %v3725_v7 = vadd.f32 %v384_v32, %v3689_v28  ;;  %v386_v9 = vpop.f32.mrb[10].mxu0 }
 0x108   :  { %4764 = vst [vmem:[#allocation7_spill] sm:$0xff] %v3716_v24  ;;  %4765 = vst [vmem:[#allocation8_spill] sm:$0xff] %v3719_v30  ;;  %v3728_v11 = vadd.f32 %v499_v62, %v3683_v25  ;;  %v501_v1 = vpop.f32.mrb[11].mxu1  ;;  %v3731_v22 = vadd.f32 %v386_v9, %v3685_v26  ;;  %v388_v24 = vpop.f32.mrb[11].mxu0 }
 0x109   :  { %4766 = vst [vmem:[#allocation9_spill] sm:$0xff] %v3722_v44  ;;  %4767 = vst [vmem:[#allocation10_spill] sm:$0xff] %v3725_v7  ;;  %v3734_v23 = vadd.f32 %v501_v1, %v3687_v27  ;;  %v3737_v30 = vadd.f32 %v388_v24, %v3689_v28 }
 0x10a   :  { %4768 = vst [vmem:[#allocation11_spill] sm:$0xff] %v3728_v11  ;;  %4769 = vst [vmem:[#allocation12_spill] sm:$0xff] %v3731_v22 }
 0x10b   :  { %4770 = vst [vmem:[#allocation13_spill] sm:$0xff] %v3734_v23  ;;  %4771 = vst [vmem:[#allocation14_spill] sm:$0xff] %v3737_v30 }
 0x10d   :  { %v505_v29 = vpop.f32.mrb[12].mxu1  ;;  %v392_v44 = vpop.f32.mrb[12].mxu0 }
 0x10e   :  { %v3740_v32 = vadd.f32 %v505_v29, %v3683_v25  ;;  %v507_v7 = vpop.f32.mrb[13].mxu1  ;;  %v3743_v62 = vadd.f32 %v392_v44, %v3685_v26  ;;  %v394_v11 = vpop.f32.mrb[13].mxu0 }
 0x10f   :  { %v3746_v9 = vadd.f32 %v507_v7, %v3687_v27  ;;  %v509_v22 = vpop.f32.mrb[14].mxu1  ;;  %v3749_v1 = vadd.f32 %v394_v11, %v3689_v28  ;;  %v396_v23 = vpop.f32.mrb[14].mxu0 }
 0x110   :  { %4772 = vst [vmem:[#allocation15_spill] sm:$0xff] %v3740_v32  ;;  %4773 = vst [vmem:[#allocation16_spill] sm:$0xff] %v3743_v62  ;;  %v3752_v24 = vadd.f32 %v509_v22, %v3683_v25  ;;  %v511_v30 = vpop.f32.mrb[15].mxu1  ;;  %v3755_v29 = vadd.f32 %v396_v23, %v3685_v26  ;;  %v398_v32 = vpop.f32.mrb[15].mxu0 }
 0x111   :  { %4774 = vst [vmem:[#allocation17_spill] sm:$0xff] %v3746_v9  ;;  %4775 = vst [vmem:[#allocation18_spill] sm:$0xff] %v3749_v1  ;;  %v3758_v44 = vadd.f32 %v511_v30, %v3687_v27  ;;  %v3761_v62 = vadd.f32 %v398_v32, %v3689_v28 }
 0x112   :  { %4776 = vst [vmem:[#allocation19_spill] sm:$0xff] %v3752_v24  ;;  %4777 = vst [vmem:[#allocation20_spill] sm:$0xff] %v3755_v29 }
 0x113   :  { %4778 = vst [vmem:[#allocation21_spill] sm:$0xff] %v3758_v44  ;;  %4779 = vst [vmem:[#allocation22_spill] sm:$0xff] %v3761_v62 }
 0x115   :  { %v515_v7 = vpop.f32.mrb[16].mxu1  ;;  %v402_v9 = vpop.f32.mrb[16].mxu0 }
 0x116   :  { %v3764_v11 = vadd.f32 %v515_v7, %v3683_v25  ;;  %v517_v1 = vpop.f32.mrb[17].mxu1  ;;  %v3767_v22 = vadd.f32 %v402_v9, %v3685_v26  ;;  %v404_v24 = vpop.f32.mrb[17].mxu0 }
 0x117   :  { %v3770_v23 = vadd.f32 %v517_v1, %v3687_v27  ;;  %v519_v29 = vpop.f32.mrb[18].mxu1  ;;  %v3773_v30 = vadd.f32 %v404_v24, %v3689_v28  ;;  %v406_v44 = vpop.f32.mrb[18].mxu0 }
 0x118   :  { %4780 = vst [vmem:[#allocation23_spill] sm:$0xff] %v3764_v11  ;;  %4781 = vst [vmem:[#allocation24_spill] sm:$0xff] %v3767_v22  ;;  %v3776_v32 = vadd.f32 %v519_v29, %v3683_v25  ;;  %v521_v62 = vpop.f32.mrb[19].mxu1  ;;  %v3779_v7 = vadd.f32 %v406_v44, %v3685_v26  ;;  %v408_v11 = vpop.f32.mrb[19].mxu0 }
 0x119   :  { %4782 = vst [vmem:[#allocation25_spill] sm:$0xff] %v3770_v23  ;;  %4783 = vst [vmem:[#allocation26_spill] sm:$0xff] %v3773_v30  ;;  %v3782_v9 = vadd.f32 %v521_v62, %v3687_v27  ;;  %v3785_v22 = vadd.f32 %v408_v11, %v3689_v28 }
 0x11a   :  { %4784 = vst [vmem:[#allocation27_spill] sm:$0xff] %v3776_v32  ;;  %4785 = vst [vmem:[#allocation28_spill] sm:$0xff] %v3779_v7 }
 0x11b   :  { %4786 = vst [vmem:[#allocation29_spill] sm:$0xff] %v3782_v9  ;;  %4787 = vst [vmem:[#allocation30_spill] sm:$0xff] %v3785_v22 }
 0x11d   :  { %v525_v1 = vpop.f32.mrb[20].mxu1  ;;  %v412_v23 = vpop.f32.mrb[20].mxu0 }
 0x11e   :  { %v3788_v24 = vadd.f32 %v525_v1, %v3683_v25  ;;  %v527_v30 = vpop.f32.mrb[21].mxu1  ;;  %v3791_v29 = vadd.f32 %v412_v23, %v3685_v26  ;;  %v414_v32 = vpop.f32.mrb[21].mxu0 }
 0x11f   :  { %v3794_v44 = vadd.f32 %v527_v30, %v3687_v27  ;;  %v529_v7 = vpop.f32.mrb[22].mxu1  ;;  %v3797_v62 = vadd.f32 %v414_v32, %v3689_v28  ;;  %v416_v9 = vpop.f32.mrb[22].mxu0 }
 0x120   :  { %4788 = vst [vmem:[#allocation31_spill] sm:$0xff] %v3788_v24  ;;  %4789 = vst [vmem:[#allocation32_spill] sm:$0xff] %v3791_v29  ;;  %v3800_v11 = vadd.f32 %v529_v7, %v3683_v25  ;;  %v531_v22 = vpop.f32.mrb[23].mxu1  ;;  %v3803_v1 = vadd.f32 %v416_v9, %v3685_v26  ;;  %v418_v24 = vpop.f32.mrb[23].mxu0 }
 0x121   :  { %4790 = vst [vmem:[#allocation33_spill] sm:$0xff] %v3794_v44  ;;  %4791 = vst [vmem:[#allocation34_spill] sm:$0xff] %v3797_v62  ;;  %v3806_v23 = vadd.f32 %v531_v22, %v3687_v27  ;;  %v3809_v29 = vadd.f32 %v418_v24, %v3689_v28 }
 0x122   :  { %4792 = vst [vmem:[#allocation35_spill] sm:$0xff] %v3800_v11  ;;  %4793 = vst [vmem:[#allocation36_spill] sm:$0xff] %v3803_v1 }
 0x123   :  { %4794 = vst [vmem:[#allocation37_spill] sm:$0xff] %v3806_v23  ;;  %4795 = vst [vmem:[#allocation38_spill] sm:$0xff] %v3809_v29 }
 0x125   :  { %v535_v30 = vpop.f32.mrb[24].mxu1  ;;  %v422_v44 = vpop.f32.mrb[24].mxu0 }
 0x126   :  { %v3812_v32 = vadd.f32 %v535_v30, %v3683_v25  ;;  %v537_v62 = vpop.f32.mrb[25].mxu1  ;;  %v3815_v7 = vadd.f32 %v422_v44, %v3685_v26  ;;  %v424_v11 = vpop.f32.mrb[25].mxu0 }
 0x127   :  { %v3818_v9 = vadd.f32 %v537_v62, %v3687_v27  ;;  %v539_v1 = vpop.f32.mrb[26].mxu1  ;;  %v3821_v22 = vadd.f32 %v424_v11, %v3689_v28  ;;  %v426_v23 = vpop.f32.mrb[26].mxu0 }
 0x128   :  { %4796 = vst [vmem:[#allocation39_spill] sm:$0xff] %v3812_v32  ;;  %4797 = vst [vmem:[#allocation40_spill] sm:$0xff] %v3815_v7  ;;  %v3824_v24 = vadd.f32 %v539_v1, %v3683_v25  ;;  %v541_v29 = vpop.f32.mrb[27].mxu1  ;;  %v3827_v30 = vadd.f32 %v426_v23, %v3685_v26  ;;  %v428_v32 = vpop.f32.mrb[27].mxu0 }
 0x129   :  { %4798 = vst [vmem:[#allocation41_spill] sm:$0xff] %v3818_v9  ;;  %4799 = vst [vmem:[#allocation42_spill] sm:$0xff] %v3821_v22  ;;  %v3830_v44 = vadd.f32 %v541_v29, %v3687_v27  ;;  %v3833_v7 = vadd.f32 %v428_v32, %v3689_v28 }
 0x12a   :  { %4800 = vst [vmem:[#allocation43_spill] sm:$0xff] %v3824_v24  ;;  %4801 = vst [vmem:[#allocation44_spill] sm:$0xff] %v3827_v30 }
 0x12b   :  { %4802 = vst [vmem:[#allocation45_spill] sm:$0xff] %v3830_v44  ;;  %4803 = vst [vmem:[#allocation46_spill] sm:$0xff] %v3833_v7 }
 0x12d   :  { %v545_v62 = vpop.f32.mrb[28].mxu1  ;;  %v432_v9 = vpop.f32.mrb[28].mxu0 }
 0x12e   :  { %v3836_v11 = vadd.f32 %v545_v62, %v3683_v25  ;;  %v547_v22 = vpop.f32.mrb[29].mxu1  ;;  %v3839_v1 = vadd.f32 %v432_v9, %v3685_v26  ;;  %v434_v24 = vpop.f32.mrb[29].mxu0 }
 0x12f   :  { %v3842_v23 = vadd.f32 %v547_v22, %v3687_v27  ;;  %v549_v30 = vpop.f32.mrb[30].mxu1  ;;  %v3845_v29 = vadd.f32 %v434_v24, %v3689_v28  ;;  %v436_v44 = vpop.f32.mrb[30].mxu0  ;;  %v476_v22 = vadd.f32 %v3664_v12, %v3683_v25  ;;  %v363_v24 = vadd.f32 %v3666_v13, %v3685_v26 }
 0x130   :  { %4804 = vst [vmem:[#allocation47_spill] sm:$0xff] %v3836_v11  ;;  %4805 = vst [vmem:[#allocation48_spill] sm:$0xff] %v3839_v1  ;;  %v3848_v32 = vadd.f32 %v549_v30, %v3683_v25  ;;  %v551_v7 = vpop.f32.mrb[31].mxu1  ;;  %v3851_v62 = vadd.f32 %v436_v44, %v3685_v26  ;;  %v438_v11 = vpop.f32.mrb[31].mxu0  ;;  %v480_v30 = vadd.f32 %v3672_v16, %v3683_v25 }
 0x131   :  { %4806 = vst [vmem:[#allocation49_spill] sm:$0xff] %v3842_v23  ;;  %4807 = vst [vmem:[#allocation50_spill] sm:$0xff] %v3845_v29  ;;  %v3854_v9 = vadd.f32 %v551_v7, %v3687_v27  ;;  %v3857_v1 = vadd.f32 %v438_v11, %v3689_v28  ;;  %v367_v44 = vadd.f32 %v3674_v17, %v3685_v26 }
 0x132   :  { %4808 = vst [vmem:[#allocation51_spill] sm:$0xff] %v3848_v32  ;;  %4809 = vst [vmem:[#allocation52_spill] sm:$0xff] %v3851_v62  ;;  %v478_v32 = vadd.f32 %v3668_v14, %v3687_v27  ;;  %v365_v7 = vadd.f32 %v3670_v15, %v3689_v28  ;;  %v482_v11 = vadd.f32 %v3676_v20, %v3687_v27 }
 0x133   :  { %4810 = vst [vmem:[#allocation53_spill] sm:$0xff] %v3854_v9  ;;  %4811 = vst [vmem:[#allocation54_spill] sm:$0xff] %v3857_v1  ;;  %v369_v12 = vadd.f32 %v3678_v21, %v3689_v28 }
 0x135   :  { %v816_v9 = vpop.f32.mrb[32].mxu0  ;;  %v857_v13 = vpop.f32.mrb[32].mxu1 }
 0x136   :  { %v864_v1 = vadd.f32 %v816_v9, %v363_v24  ;;  %v903_v62 = vadd.f32 %v816_v9, %v367_v44  ;;  %v866_v16 = vadd.f32 %v857_v13, %v476_v22  ;;  %v3875_v25 = vadd.f32 %v857_v13, %v480_v30  ;;  %v818_v17 = vpop.f32.mrb[33].mxu0  ;;  %v859_v26 = vpop.f32.mrb[33].mxu1 }
 0x137   :  { %v865_v23 = vadd.f32 %v818_v17, %v365_v7  ;;  %v904_v14 = vadd.f32 %v818_v17, %v369_v12  ;;  %v867_v29 = vadd.f32 %v859_v26, %v478_v32  ;;  %v906_v18 = vadd.f32 %v859_v26, %v482_v11  ;;  %v861_v15 = vpop.f32.mrb[34].mxu1  ;;  %v820_v19 = vpop.f32.mrb[34].mxu0 }
 0x138   :  { %v2731_v8 = vmul.f32 -1.442695, %v864_v1  ;;  %v2736_v20 = vmul.f32 -1.442695, %v903_v62  ;;  %v862_v10 = vpop.f32.mrb[35].mxu1  ;;  %v821_v21 = vpop.f32.mrb[35].mxu0 }
 0x139   :  { %v2732_v27 = vmul.f32 -1.442695, %v865_v23  ;;  %v2737_v28 = vmul.f32 -1.442695, %v904_v14  ;;  %v2734_v24 = vmul.f32 -1.442695, %v867_v29 }
 0x13a   :  { %2916 = vpow2.f32 %v2731_v8  ;;  %v2739_v9 = vmul.f32 -1.442695, %v906_v18  ;;  %v2733_v44 = vmul.f32 -1.442695, %v866_v16 }
 0x13b   :  { %2918 = vpow2.f32 %v2736_v20 }
 0x13c   :  { %2920 = vpow2.f32 %v2732_v27 }
 0x13d   :  { %2922 = vpow2.f32 %v2737_v28 }
 0x13e   :  { %2924 = vpow2.f32 %v2734_v24 }
 0x13f   :  { %2926 = vpow2.f32 %v2739_v9 }
 0x140   :  { %2928 = vpow2.f32 %v2733_v44 }
 0x144   :  { %v2917_v22 = vpop.eup %2916 }
 0x145   :  { %v2919_v30 = vpop.eup %2918  ;;  %v880_v8 = vadd.f32 1.0, %v2917_v22 }
 0x146   :  { %v2921_v32 = vpop.eup %2920  ;;  %v919_v29 = vadd.f32 1.0, %v2919_v30 }
 0x147   :  { %v2923_v7 = vpop.eup %2922  ;;  %v881_v62 = vadd.f32 1.0, %v2921_v32 }
 0x148   :  { %v2925_v19 = vpop.eup %2924  ;;  %v920_v10 = vadd.f32 1.0, %v2923_v7 }
 0x149   :  { %v2927_v1 = vpop.eup %2926  ;;  %v883_v23 = vadd.f32 1.0, %v2925_v19  ;;  %v2738_v19 = vmul.f32 -1.442695, %v3875_v25 }
 0x14a   :  { %v922_v11 = vadd.f32 1.0, %v2927_v1  ;;  %v2929_v18 = vpop.eup %2928 }
 0x14b   :  { %2930 = vrcp.f32 %v883_v23  ;;  %v882_v27 = vadd.f32 1.0, %v2929_v18 }
 0x14c   :  { %2932 = vrcp.f32 %v922_v11 }
 0x14d   :  { %2934 = vrcp.f32 %v881_v62 }
 0x14e   :  { %2936 = vrcp.f32 %v920_v10  ;;  %v4812_v10 = vmov 0  }
 0x14f   :  { %2938 = vrcp.f32 %v880_v8 }
 0x150   :  { %2940 = vrcp.f32 %v919_v29 }
 0x151   :  { %2942 = vrcp.f32 %v882_v27 }
 0x155   :  { %v2931_v12 = vpop.eup %2930 }
 0x156   :  { %v2933_v13 = vpop.eup %2932  ;;  %v892_v16 = vmul.f32 2.0, %v2931_v12 }
 0x157   :  { %v2935_v17 = vpop.eup %2934  ;;  %v931_v26 = vmul.f32 2.0, %v2933_v13 }
 0x158   :  { %v2937_v14 = vpop.eup %2936  ;;  %v2735_v15 = vadd.f32 -1.0, %v892_v16  ;;  %v894_v24 = vmul.f32 0.0, %v2935_v17 }
 0x159   :  { %v2939_v20 = vpop.eup %2938  ;;  %v2740_v21 = vadd.f32 -1.0, %v931_v26  ;;  %v933_v22 = vmul.f32 0.0, %v2937_v14 }
 0x15a   :  { %v2941_v28 = vpop.eup %2940  ;;  %v895_v9 = vmul.f32 %v2939_v20, %v2735_v15 }
 0x15b   :  { %v934_v30 = vmul.f32 %v2941_v28, %v2740_v21  ;;  %v2943_v7 = vpop.eup %2942 }
 0x15c   :  { %v3877_v32 = vadd.f32 %v895_v9, %v894_v24 }
 0x15d   :  { %v3879_v44 = vadd.f32 %v934_v30, %v933_v22  ;;  %v4813_v22 = vld [vmem:[#allocation4_spill] sm:$0xff] }
 0x15e   :  { %2944 = vtanh.f32 %v3877_v32 }
 0x15f   :  { %2946 = vpow2.f32 %v2738_v19 }
 0x160   :  { %2948 = vtanh.f32 %v3879_v44 }
 0x168   :  { %v2945_v1 = vpop.eup %2944 }
 0x169   :  { %v898_v62 = vmul.f32 %v2945_v1, %v2943_v7  ;;  %v2947_v25 = vpop.eup %2946  ;;  %v4814_v7 = vld [vmem:[#allocation3_spill] sm:$0xff] }
 0x16a   :  { %v921_v11 = vadd.f32 1.0, %v2947_v25  ;;  %v2949_v8 = vpop.eup %2948  ;;  %v4815_v25 = vld [vmem:[#allocation6_spill] sm:$0xff] }
 0x16b   :  { %v942_v23 = vpack.c.bf16 %v898_v62, %v898_v62 }
 0x16c   :  { %2950 = vrcp.f32 %v921_v11 }
 0x16d   :  { %976 = vmatmul.mubr.bf16.vlgmr.msra.gmra.mrb[36].mxu0 %v942_v23  ;;  %1017 = vmatmul.mubr.bf16.vlgmr.msra.gmra.mrb[36].mxu1 %v942_v23 }
 0x16e   :  { %1066 = vmatpush1.bf16.msra.mxu0 %v3415_v37  ;;  %1107 = vmatpush1.bf16.msra.mxu1 %v3410_v36 }
 0x16f   :  { %1067 = vmatprep.subr.bf16.mxu0 %v3427_v39  ;;  %1108 = vmatprep.subr.bf16.mxu1 %v3422_v38 }
 0x170   :  { %1097 = vmatprep.mubr.bf16.mxu0 %v4812_v10  ;;  %1138 = vmatprep.mubr.bf16.mxu1 %v4812_v10 }
 0x172   :  { %1068 = vmatpush1.bf16.msra.mxu0 %v3437_v41  ;;  %1109 = vmatpush1.bf16.msra.mxu1 %v3432_v40 }
 0x173   :  { %1069 = vmatprep.subr.bf16.mxu0 %v3451_v43  ;;  %1110 = vmatprep.subr.bf16.mxu1 %v3444_v42 }
 0x176   :  { %1070 = vmatpush1.bf16.msra.mxu0 %v3470_v46  ;;  %1111 = vmatpush1.bf16.msra.mxu1 %v3463_v45  ;;  %v2951_v29 = vpop.eup %2950 }
 0x177   :  { %1071 = vmatprep.subr.bf16.mxu0 %v3480_v48  ;;  %1112 = vmatprep.subr.bf16.mxu1 %v3475_v47  ;;  %v937_v18 = vmul.f32 %v2951_v29, %v2949_v8  ;;  %v4816_v8 = vld [vmem:[#allocation5_spill] sm:$0xff] }
 0x179   :  { %v1064_v12 = vpack.c.bf16 %v937_v18, %v937_v18 }
 0x17a   :  { %1072 = vmatpush1.bf16.msra.mxu0 %v3494_v50  ;;  %1113 = vmatpush1.bf16.msra.mxu1 %v3489_v49 }
 0x17b   :  { %1073 = vmatprep.subr.bf16.mxu0 %v3506_v52  ;;  %1114 = vmatprep.subr.bf16.mxu1 %v3501_v51 }
 0x17e   :  { %1074 = vmatpush1.bf16.msra.mxu0 %v3521_v55  ;;  %1115 = vmatpush1.bf16.msra.mxu1 %v3514_v54 }
 0x17f   :  { %1075 = vmatprep.subr.bf16.mxu0 %v3533_v57  ;;  %1116 = vmatprep.subr.bf16.mxu1 %v3528_v56 }
 0x182   :  { %1076 = vmatpush1.bf16.msra.mxu0 %v3547_v59  ;;  %1117 = vmatpush1.bf16.msra.mxu1 %v3542_v58 }
 0x183   :  { %1077 = vmatprep.subr.bf16.mxu0 %v3559_v61  ;;  %1118 = vmatprep.subr.bf16.mxu1 %v3554_v60 }
 0x186   :  { %1078 = vmatpush1.bf16.msra.mxu0 %v3574_v0  ;;  %1119 = vmatpush1.bf16.msra.mxu1 %v3569_v63 }
 0x187   :  { %1079 = vmatprep.subr.bf16.mxu0 %v3586_v3  ;;  %1120 = vmatprep.subr.bf16.mxu1 %v3581_v2 }
 0x18a   :  { %1080 = vmatpush1.bf16.msra.mxu0 %v3600_v5  ;;  %1121 = vmatpush1.bf16.msra.mxu1 %v3595_v4 }
 0x18b   :  { %1187 = vmatprep.subr.bf16.mxu0 %v3402_v34  ;;  %1228 = vmatprep.subr.bf16.mxu1 %v3397_v33 }
 0x18d   :  { %1098 = vmatmul.mubr.bf16.vlgmr.msra.gmra.mrb[40].mxu0 %v1064_v12  ;;  %1139 = vmatmul.mubr.bf16.vlgmr.msra.gmra.mrb[40].mxu1 %v1064_v12 }
 0x18e   :  { %1188 = vmatpush1.bf16.msra.mxu0 %v3415_v37  ;;  %1229 = vmatpush1.bf16.msra.mxu1 %v3410_v36 }
 0x18f   :  { %1189 = vmatprep.subr.bf16.mxu0 %v3427_v39  ;;  %1230 = vmatprep.subr.bf16.mxu1 %v3422_v38 }
 0x190   :  { %1219 = vmatprep.mubr.bf16.mxu0 %v4812_v10  ;;  %1260 = vmatprep.mubr.bf16.mxu1 %v4812_v10 }
 0x192   :  { %1190 = vmatpush1.bf16.msra.mxu0 %v3437_v41  ;;  %1231 = vmatpush1.bf16.msra.mxu1 %v3432_v40 }
 0x193   :  { %1191 = vmatprep.subr.bf16.mxu0 %v3451_v43  ;;  %1232 = vmatprep.subr.bf16.mxu1 %v3444_v42 }
 0x196   :  { %1192 = vmatpush1.bf16.msra.mxu0 %v3470_v46  ;;  %1233 = vmatpush1.bf16.msra.mxu1 %v3463_v45 }
 0x197   :  { %1193 = vmatprep.subr.bf16.mxu0 %v3480_v48  ;;  %1234 = vmatprep.subr.bf16.mxu1 %v3475_v47 }
 0x19a   :  { %1194 = vmatpush1.bf16.msra.mxu0 %v3494_v50  ;;  %1235 = vmatpush1.bf16.msra.mxu1 %v3489_v49 }
 0x19b   :  { %1195 = vmatprep.subr.bf16.mxu0 %v3506_v52  ;;  %1236 = vmatprep.subr.bf16.mxu1 %v3501_v51 }
 0x19e   :  { %1196 = vmatpush1.bf16.msra.mxu0 %v3521_v55  ;;  %1237 = vmatpush1.bf16.msra.mxu1 %v3514_v54 }
 0x19f   :  { %1197 = vmatprep.subr.bf16.mxu0 %v3533_v57  ;;  %1238 = vmatprep.subr.bf16.mxu1 %v3528_v56 }
 0x1a2   :  { %1198 = vmatpush1.bf16.msra.mxu0 %v3547_v59  ;;  %1239 = vmatpush1.bf16.msra.mxu1 %v3542_v58 }
 0x1a3   :  { %1199 = vmatprep.subr.bf16.mxu0 %v3559_v61  ;;  %1240 = vmatprep.subr.bf16.mxu1 %v3554_v60 }
 0x1a6   :  { %1200 = vmatpush1.bf16.msra.mxu0 %v3574_v0  ;;  %1241 = vmatpush1.bf16.msra.mxu1 %v3569_v63 }
 0x1a7   :  { %1201 = vmatprep.subr.bf16.mxu0 %v3586_v3  ;;  %1242 = vmatprep.subr.bf16.mxu1 %v3581_v2 }
 0x1aa   :  { %1202 = vmatpush1.bf16.msra.mxu0 %v3600_v5  ;;  %1243 = vmatpush1.bf16.msra.mxu1 %v3595_v4 }
 0x1ab   :  { %1309 = vmatprep.subr.bf16.mxu0 %v3402_v34  ;;  %1350 = vmatprep.subr.bf16.mxu1 %v3397_v33 }
 0x240   :  { %v977_v36 = vpop.f32.mrb[36].mxu0  ;;  %v1018_v37 = vpop.f32.mrb[36].mxu1 }
 0x241   :  { %v1025_v38 = vadd.f32 %v977_v36, %v3695_v35  ;;  %v1027_v39 = vadd.f32 %v1018_v37, %v3692_v31  ;;  %v979_v40 = vpop.f32.mrb[37].mxu0  ;;  %v1020_v41 = vpop.f32.mrb[37].mxu1 }
 0x242   :  { %v1026_v42 = vadd.f32 %v979_v40, %v3701_v6  ;;  %v1028_v43 = vadd.f32 %v1020_v41, %v3698_v53  ;;  %v981_v45 = vpop.f32.mrb[38].mxu0  ;;  %v1022_v47 = vpop.f32.mrb[38].mxu1 }
 0x243   :  { %v2741_v48 = vmul.f32 -1.442695, %v1025_v38  ;;  %v982_v13 = vpop.f32.mrb[39].mxu0  ;;  %v1023_v16 = vpop.f32.mrb[39].mxu1  ;;  %v2743_v35 = vmul.f32 -1.442695, %v1027_v39 }
 0x244   :  { %v2742_v34 = vmul.f32 -1.442695, %v1026_v42  ;;  %v2744_v17 = vmul.f32 -1.442695, %v1028_v43 }
 0x245   :  { %2952 = vpow2.f32 %v2741_v48 }
 0x246   :  { %2954 = vpow2.f32 %v2742_v34 }
 0x247   :  { %2956 = vpow2.f32 %v2744_v17 }
 0x248   :  { %2958 = vpow2.f32 %v2743_v35 }
 0x24f   :  { %v2953_v33 = vpop.eup %2952 }
 0x250   :  { %v2955_v26 = vpop.eup %2954  ;;  %v1041_v6 = vadd.f32 1.0, %v2953_v33 }
 0x251   :  { %v2957_v31 = vpop.eup %2956  ;;  %v1042_v14 = vadd.f32 1.0, %v2955_v26 }
 0x252   :  { %v1044_v15 = vadd.f32 1.0, %v2957_v31  ;;  %v2959_v53 = vpop.eup %2958 }
 0x253   :  { %v1043_v9 = vadd.f32 1.0, %v2959_v53  ;;  %v3985_v53 = vld [vmem:[%s4755_s2 + $0x2c] ss:$16 sps:$4 sm:$0xff]  }
 0x254   :  { %2960 = vrcp.f32 %v1044_v15  ;;  %v3973_v15 = vld [vmem:[%s4755_s2 + $0x8] ss:$16 sps:$4 sm:$0xff]  }
 0x255   :  { %2962 = vrcp.f32 %v1042_v14  ;;  %v3967_v14 = vld [vmem:[%s4755_s2] ss:$16 sps:$4 sm:$0xff]  }
 0x256   :  { %2964 = vrcp.f32 %v1041_v6  ;;  %v3979_v6 = vld [vmem:[%s4755_s2 + $0x24] ss:$16 sps:$4 sm:$0xff]  }
 0x257   :  { %2966 = vrcp.f32 %v1043_v9  ;;  %v4018_v9 = vld [vmem:[%s4755_s2 + $0x48] ss:$16 sps:$4 sm:$0xff]  }
 0x25e   :  { %v2961_v20 = vpop.eup %2960 }
 0x25f   :  { %v1053_v27 = vmul.f32 2.0, %v2961_v20  ;;  %v2963_v24 = vpop.eup %2962  ;;  %v3993_v20 = vld [vmem:[%s4755_s2 + $0x20] ss:$16 sps:$4 sm:$0xff]  }
 0x260   :  { %v1099_v21 = vpop.f32.mrb[40].mxu0  ;;  %v1140_v28 = vpop.f32.mrb[40].mxu1  ;;  %v1055_v40 = vmul.f32 %v2963_v24, %v3877_v32 }
 0x261   :  { %v1147_v30 = vadd.f32 %v1099_v21, %v4813_v22  ;;  %v1149_v19 = vadd.f32 %v1140_v28, %v4814_v7  ;;  %v1101_v1 = vpop.f32.mrb[41].mxu0  ;;  %v1142_v62 = vpop.f32.mrb[41].mxu1  ;;  %v2745_v23 = vadd.f32 -1.0, %v1053_v27  ;;  %v3999_v27 = vld [vmem:[%s4755_s2 + $0x28] ss:$16 sps:$4 sm:$0xff]  }
 0x262   :  { %v1148_v11 = vadd.f32 %v1101_v1, %v4815_v25  ;;  %v1150_v29 = vadd.f32 %v1142_v62, %v4816_v8  ;;  %v1103_v18 = vpop.f32.mrb[42].mxu0  ;;  %v1144_v12 = vpop.f32.mrb[42].mxu1  ;;  %v4005_v21 = vld [vmem:[%s4755_s2 + $0x44] ss:$16 sps:$4 sm:$0xff]   ;;  %v4011_v28 = vld [vmem:[%s4755_s2 + $0x4c] ss:$16 sps:$4 sm:$0xff]  }
 0x263   :  { %v2965_v36 = vpop.eup %2964  ;;  %v2746_v37 = vmul.f32 -1.442695, %v1147_v30  ;;  %v1104_v38 = vpop.f32.mrb[43].mxu0  ;;  %v2748_v17 = vmul.f32 -1.442695, %v1149_v19 }
 0x264   :  { %v1145_v39 = vpop.f32.mrb[43].mxu1  ;;  %v1056_v41 = vmul.f32 %v2965_v36, %v2745_v23  ;;  %v2747_v42 = vmul.f32 -1.442695, %v1148_v11  ;;  %v2749_v43 = vmul.f32 -1.442695, %v1150_v29  ;;  %v2967_v47 = vpop.eup %2966 }
 0x265   :  { %2968 = vpow2.f32 %v2746_v37  ;;  %v4024_v7 = vld [vmem:[%s4755_s2 + $0x64] ss:$16 sps:$4 sm:$0xff]   ;;  %v4161_v29 = vld [vmem:[%s4755_s2 + $0xc0] ss:$16 sps:$4 sm:$0xff]   ;;  %v4167_v18 = vld [vmem:[%s4755_s2 + $0xc8] ss:$16 sps:$4 sm:$0xff]  }
 0x266   :  { %v3961_v45 = vadd.f32 %v1056_v41, %v1055_v40  ;;  %2970 = vpow2.f32 %v2747_v42  ;;  %v4173_v12 = vld [vmem:[%s4755_s2 + $0xe4] ss:$16 sps:$4 sm:$0xff]   ;;  %v4179_v36 = vld [vmem:[%s4755_s2 + $0xec] ss:$16 sps:$4 sm:$0xff]   ;;  %v4185_v37 = vld [vmem:[%s4755_s2 + $0xe0] ss:$16 sps:$4 sm:$0xff]  }
 0x267   :  { %v4191_v38 = vld [vmem:[%s4755_s2 + $0xe8] ss:$16 sps:$4 sm:$0xff]  }
 0x268   :  { %2972 = vtanh.f32 %v3961_v45  ;;  %v4817_v41 = vld [vmem:[#allocation8_spill] sm:$0xff] }
 0x269   :  { %2974 = vpow2.f32 %v2749_v43  ;;  %v4818_v43 = vld [vmem:[#allocation7_spill] sm:$0xff] }
 0x26f   :  { %v2969_v48 = vpop.eup %2968 }
 0x270   :  { %v2971_v13 = vpop.eup %2970  ;;  %v1163_v31 = vadd.f32 1.0, %v2969_v48 }
 0x271   :  { %v1164_v35 = vadd.f32 1.0, %v2971_v13 }
 0x272   :  { %v2973_v16 = vpop.eup %2972 }
 0x273   :  { %v2975_v34 = vpop.eup %2974  ;;  %v1059_v33 = vmul.f32 %v2973_v16, %v2967_v47  ;;  %v4819_v16 = vld [vmem:[#allocation10_spill] sm:$0xff] }
 0x274   :  { %v1166_v32 = vadd.f32 1.0, %v2975_v34 }
 0x275   :  { %v1186_v26 = vpack.c.bf16 %v1059_v33, %v1059_v33 }
 0x276   :  { %2976 = vrcp.f32 %v1166_v32 }
 0x277   :  { %2978 = vpow2.f32 %v2748_v17  ;;  %1220 = vmatmul.mubr.bf16.vlgmr.msra.gmra.mrb[44].mxu0 %v1186_v26  ;;  %1261 = vmatmul.mubr.bf16.vlgmr.msra.gmra.mrb[44].mxu1 %v1186_v26  ;;  %v4820_v17 = vld [vmem:[#allocation9_spill] sm:$0xff] }
 0x278   :  { %2980 = vrcp.f32 %v1164_v35  ;;  %1310 = vmatpush1.bf16.msra.mxu0 %v3967_v14  ;;  %1351 = vmatpush1.bf16.msra.mxu1 %v3973_v15 }
 0x279   :  { %1311 = vmatprep.subr.bf16.mxu0 %v3979_v6  ;;  %1352 = vmatprep.subr.bf16.mxu1 %v3985_v53  ;;  %2982 = vrcp.f32 %v1163_v31 }
 0x27a   :  { %1341 = vmatprep.mubr.bf16.mxu0 %v4812_v10  ;;  %1382 = vmatprep.mubr.bf16.mxu1 %v4812_v10 }
 0x27c   :  { %1312 = vmatpush1.bf16.msra.mxu0 %v3993_v20  ;;  %1353 = vmatpush1.bf16.msra.mxu1 %v3999_v27 }
 0x27d   :  { %1313 = vmatprep.subr.bf16.mxu0 %v4005_v21  ;;  %1354 = vmatprep.subr.bf16.mxu1 %v4011_v28 }
 0x280   :  { %v2977_v24 = vpop.eup %2976  ;;  %1314 = vmatpush1.bf16.msra.mxu0 %v3470_v46  ;;  %1355 = vmatpush1.bf16.msra.mxu1 %v4018_v9  ;;  %v4030_v46 = vld [vmem:[%s4755_s2 + $0x6c] ss:$16 sps:$4 sm:$0xff]  }
 0x281   :  { %v2979_v22 = vpop.eup %2978  ;;  %v1175_v30 = vmul.f32 2.0, %v2977_v24  ;;  %1315 = vmatprep.subr.bf16.mxu0 %v4024_v7  ;;  %1356 = vmatprep.subr.bf16.mxu1 %v4030_v46 }
 0x282   :  { %v2981_v19 = vpop.eup %2980  ;;  %v1165_v23 = vadd.f32 1.0, %v2979_v22 }
 0x283   :  { %v2750_v1 = vadd.f32 -1.0, %v1175_v30  ;;  %v2983_v62 = vpop.eup %2982  ;;  %v1177_v25 = vmul.f32 %v2981_v19, %v3879_v44  ;;  %v4155_v44 = vld [vmem:[%s4755_s2 + $0xcc] ss:$16 sps:$4 sm:$0xff]  }
 0x284   :  { %1316 = vmatpush1.bf16.msra.mxu0 %v3494_v50  ;;  %1357 = vmatpush1.bf16.msra.mxu1 %v3489_v49  ;;  %2984 = vrcp.f32 %v1165_v23 }
 0x285   :  { %v1178_v11 = vmul.f32 %v2983_v62, %v2750_v1  ;;  %1317 = vmatprep.subr.bf16.mxu0 %v3506_v52  ;;  %1358 = vmatprep.subr.bf16.mxu1 %v3501_v51  ;;  %v4058_v52 = vld [vmem:[%s4755_s2 + $0x4] ss:$16 sps:$4 sm:$0xff]  }
 0x287   :  { %v4038_v8 = vadd.f32 %v1178_v11, %v1177_v25 }
 0x288   :  { %1318 = vmatpush1.bf16.msra.mxu0 %v3521_v55  ;;  %1359 = vmatpush1.bf16.msra.mxu1 %v3514_v54  ;;  %v4064_v54 = vld [vmem:[%s4755_s2 + $0xc] ss:$16 sps:$4 sm:$0xff]  }
 0x289   :  { %2986 = vtanh.f32 %v4038_v8  ;;  %1319 = vmatprep.subr.bf16.mxu0 %v3533_v57  ;;  %1360 = vmatprep.subr.bf16.mxu1 %v3528_v56  ;;  %v4080_v56 = vld [vmem:[%s4755_s2 + $0x40] ss:$16 sps:$4 sm:$0xff]  }
 0x28a   :  { %v4089_v57 = vld [vmem:[%s4755_s2 + $0x60] ss:$16 sps:$4 sm:$0xff]  }
 0x28c   :  { %1320 = vmatpush1.bf16.msra.mxu0 %v3547_v59  ;;  %1361 = vmatpush1.bf16.msra.mxu1 %v3542_v58  ;;  %v4095_v58 = vld [vmem:[%s4755_s2 + $0x68] ss:$16 sps:$4 sm:$0xff]   ;;  %v4101_v59 = vld [vmem:[%s4755_s2 + $0x84] ss:$16 sps:$4 sm:$0xff]  }
 0x28d   :  { %1321 = vmatprep.subr.bf16.mxu0 %v3559_v61  ;;  %1362 = vmatprep.subr.bf16.mxu1 %v3554_v60  ;;  %v4107_v60 = vld [vmem:[%s4755_s2 + $0x8c] ss:$16 sps:$4 sm:$0xff]   ;;  %v4113_v61 = vld [vmem:[%s4755_s2 + $0x80] ss:$16 sps:$4 sm:$0xff]  }
 0x28e   :  { %v2985_v49 = vpop.eup %2984 }
 0x290   :  { %1322 = vmatpush1.bf16.msra.mxu0 %v3574_v0  ;;  %1363 = vmatpush1.bf16.msra.mxu1 %v3569_v63  ;;  %v4119_v63 = vld [vmem:[%s4755_s2 + $0x88] ss:$16 sps:$4 sm:$0xff]   ;;  %v4125_v0 = vld [vmem:[%s4755_s2 + $0xa4] ss:$16 sps:$4 sm:$0xff]  }
 0x291   :  { %1323 = vmatprep.subr.bf16.mxu0 %v3586_v3  ;;  %1364 = vmatprep.subr.bf16.mxu1 %v3581_v2  ;;  %v4131_v2 = vld [vmem:[%s4755_s2 + $0xac] ss:$16 sps:$4 sm:$0xff]   ;;  %v4137_v3 = vld [vmem:[%s4755_s2 + $0xa0] ss:$16 sps:$4 sm:$0xff]  }
 0x293   :  { %v2987_v50 = vpop.eup %2986 }
 0x294   :  { %1324 = vmatpush1.bf16.msra.mxu0 %v3600_v5  ;;  %1365 = vmatpush1.bf16.msra.mxu1 %v3595_v4  ;;  %v1181_v51 = vmul.f32 %v2987_v50, %v2985_v49  ;;  %v4143_v4 = vld [vmem:[%s4755_s2 + $0xa8] ss:$16 sps:$4 sm:$0xff]   ;;  %v4149_v5 = vld [vmem:[%s4755_s2 + $0xc4] ss:$16 sps:$4 sm:$0xff]  }
 0x295   :  { %1431 = vmatprep.subr.bf16.mxu0 %v4058_v52  ;;  %1472 = vmatprep.subr.bf16.mxu1 %v4064_v54 }
 0x296   :  { %v1308_v55 = vpack.c.bf16 %v1181_v51, %v1181_v51 }
 0x298   :  { %1342 = vmatmul.mubr.bf16.vlgmr.msra.gmra.mrb[48].mxu0 %v1308_v55  ;;  %1383 = vmatmul.mubr.bf16.vlgmr.msra.gmra.mrb[48].mxu1 %v1308_v55 }
 0x299   :  { %1432 = vmatpush1.bf16.msra.mxu0 %v3967_v14  ;;  %1473 = vmatpush1.bf16.msra.mxu1 %v3973_v15 }
 0x29a   :  { %1433 = vmatprep.subr.bf16.mxu0 %v3979_v6  ;;  %1474 = vmatprep.subr.bf16.mxu1 %v3985_v53 }
 0x29b   :  { %1463 = vmatprep.mubr.bf16.mxu0 %v4812_v10  ;;  %1504 = vmatprep.mubr.bf16.mxu1 %v4812_v10 }
 0x29d   :  { %1434 = vmatpush1.bf16.msra.mxu0 %v3993_v20  ;;  %1475 = vmatpush1.bf16.msra.mxu1 %v3999_v27 }
 0x29e   :  { %1435 = vmatprep.subr.bf16.mxu0 %v4005_v21  ;;  %1476 = vmatprep.subr.bf16.mxu1 %v4011_v28 }
 0x2a1   :  { %1436 = vmatpush1.bf16.msra.mxu0 %v4080_v56  ;;  %1477 = vmatpush1.bf16.msra.mxu1 %v4018_v9 }
 0x2a2   :  { %1437 = vmatprep.subr.bf16.mxu0 %v4024_v7  ;;  %1478 = vmatprep.subr.bf16.mxu1 %v4030_v46 }
 0x2a5   :  { %1438 = vmatpush1.bf16.msra.mxu0 %v4089_v57  ;;  %1479 = vmatpush1.bf16.msra.mxu1 %v4095_v58 }
 0x2a6   :  { %1439 = vmatprep.subr.bf16.mxu0 %v4101_v59  ;;  %1480 = vmatprep.subr.bf16.mxu1 %v4107_v60 }
 0x2a9   :  { %1440 = vmatpush1.bf16.msra.mxu0 %v4113_v61  ;;  %1481 = vmatpush1.bf16.msra.mxu1 %v4119_v63 }
 0x2aa   :  { %1441 = vmatprep.subr.bf16.mxu0 %v4125_v0  ;;  %1482 = vmatprep.subr.bf16.mxu1 %v4131_v2 }
 0x2ad   :  { %1442 = vmatpush1.bf16.msra.mxu0 %v4137_v3  ;;  %1483 = vmatpush1.bf16.msra.mxu1 %v4143_v4 }
 0x2ae   :  { %1443 = vmatprep.subr.bf16.mxu0 %v4149_v5  ;;  %1484 = vmatprep.subr.bf16.mxu1 %v4155_v44 }
 0x2b1   :  { %1444 = vmatpush1.bf16.msra.mxu0 %v4161_v29  ;;  %1485 = vmatpush1.bf16.msra.mxu1 %v4167_v18 }
 0x2b2   :  { %1445 = vmatprep.subr.bf16.mxu0 %v4173_v12  ;;  %1486 = vmatprep.subr.bf16.mxu1 %v4179_v36 }
 0x2b5   :  { %1446 = vmatpush1.bf16.msra.mxu0 %v4185_v37  ;;  %1487 = vmatpush1.bf16.msra.mxu1 %v4191_v38 }
 0x2b6   :  { %1553 = vmatprep.subr.bf16.mxu0 %v4058_v52  ;;  %1594 = vmatprep.subr.bf16.mxu1 %v4064_v54 }
 0x34a   :  { %v1221_v39 = vpop.f32.mrb[44].mxu0  ;;  %v1262_v40 = vpop.f32.mrb[44].mxu1 }
 0x34b   :  { %v1269_v42 = vadd.f32 %v1221_v39, %v4817_v41  ;;  %v1271_v47 = vadd.f32 %v1262_v40, %v4818_v43  ;;  %v1223_v48 = vpop.f32.mrb[45].mxu0  ;;  %v1264_v13 = vpop.f32.mrb[45].mxu1 }
 0x34c   :  { %v1270_v34 = vadd.f32 %v1223_v48, %v4819_v16  ;;  %v1272_v33 = vadd.f32 %v1264_v13, %v4820_v17  ;;  %v1225_v35 = vpop.f32.mrb[46].mxu0  ;;  %v1266_v32 = vpop.f32.mrb[46].mxu1  ;;  %v4821_v48 = vld [vmem:[#allocation12_spill] sm:$0xff] }
 0x34d   :  { %v2751_v26 = vmul.f32 -1.442695, %v1269_v42  ;;  %v1226_v31 = vpop.f32.mrb[47].mxu0  ;;  %v1267_v24 = vpop.f32.mrb[47].mxu1  ;;  %v2753_v1 = vmul.f32 -1.442695, %v1271_v47 }
 0x34e   :  { %v2752_v22 = vmul.f32 -1.442695, %v1270_v34  ;;  %v2754_v30 = vmul.f32 -1.442695, %v1272_v33  ;;  %v4822_v47 = vld [vmem:[#allocation11_spill] sm:$0xff]  ;;  %v4823_v35 = vld [vmem:[#allocation14_spill] sm:$0xff] }
 0x34f   :  { %2988 = vpow2.f32 %v2751_v26  ;;  %v4824_v26 = vld [vmem:[#allocation13_spill] sm:$0xff] }
 0x350   :  { %2990 = vpow2.f32 %v2752_v22 }
 0x351   :  { %2992 = vpow2.f32 %v2754_v30 }
 0x352   :  { %2994 = vpow2.f32 %v2753_v1 }
 0x359   :  { %v2989_v19 = vpop.eup %2988 }
 0x35a   :  { %v2991_v62 = vpop.eup %2990  ;;  %v1285_v49 = vadd.f32 1.0, %v2989_v19 }
 0x35b   :  { %v2993_v23 = vpop.eup %2992  ;;  %v1286_v25 = vadd.f32 1.0, %v2991_v62 }
 0x35c   :  { %v1288_v11 = vadd.f32 1.0, %v2993_v23  ;;  %v2995_v50 = vpop.eup %2994 }
 0x35d   :  { %v1287_v42 = vadd.f32 1.0, %v2995_v50 }
 0x35e   :  { %2996 = vrcp.f32 %v1288_v11 }
 0x35f   :  { %2998 = vrcp.f32 %v1286_v25 }
 0x360   :  { %3000 = vrcp.f32 %v1285_v49 }
 0x361   :  { %3002 = vrcp.f32 %v1287_v42 }
 0x368   :  { %v2997_v51 = vpop.eup %2996 }
 0x369   :  { %v1297_v55 = vmul.f32 2.0, %v2997_v51  ;;  %v2999_v39 = vpop.eup %2998 }
 0x36a   :  { %v3001_v33 = vpop.eup %3000  ;;  %v1299_v30 = vmul.f32 %v2999_v39, %v3961_v45 }
 0x36b   :  { %v1343_v40 = vpop.f32.mrb[48].mxu0  ;;  %v1384_v41 = vpop.f32.mrb[48].mxu1  ;;  %v2755_v43 = vadd.f32 -1.0, %v1297_v55 }
 0x36c   :  { %v1391_v13 = vadd.f32 %v1343_v40, %v4821_v48  ;;  %v1393_v16 = vadd.f32 %v1384_v41, %v4822_v47  ;;  %v1345_v34 = vpop.f32.mrb[49].mxu0  ;;  %v1386_v17 = vpop.f32.mrb[49].mxu1 }
 0x36d   :  { %v1392_v32 = vadd.f32 %v1345_v34, %v4823_v35  ;;  %v1394_v31 = vadd.f32 %v1386_v17, %v4824_v26  ;;  %v1347_v24 = vpop.f32.mrb[50].mxu0  ;;  %v1388_v22 = vpop.f32.mrb[50].mxu1  ;;  %v1300_v19 = vmul.f32 %v3001_v33, %v2755_v43 }
 0x36e   :  { %v2756_v1 = vmul.f32 -1.442695, %v1391_v13  ;;  %v1348_v62 = vpop.f32.mrb[51].mxu0  ;;  %v1389_v23 = vpop.f32.mrb[51].mxu1  ;;  %v2758_v39 = vmul.f32 -1.442695, %v1393_v16 }
 0x36f   :  { %v2757_v25 = vmul.f32 -1.442695, %v1392_v32  ;;  %v4205_v11 = vadd.f32 %v1300_v19, %v1299_v30  ;;  %v2759_v49 = vmul.f32 -1.442695, %v1394_v31  ;;  %v3003_v50 = vpop.eup %3002  ;;  %v4825_v23 = vld [vmem:[#allocation16_spill] sm:$0xff] }
 0x370   :  { %3004 = vpow2.f32 %v2756_v1 }
 0x371   :  { %3006 = vtanh.f32 %v4205_v11 }
 0x372   :  { %3008 = vpow2.f32 %v2757_v25 }
 0x373   :  { %3010 = vpow2.f32 %v2759_v49  ;;  %v4826_v49 = vld [vmem:[#allocation15_spill] sm:$0xff] }
 0x37a   :  { %v3005_v51 = vpop.eup %3004 }
 0x37b   :  { %v3007_v55 = vpop.eup %3006  ;;  %v1407_v47 = vadd.f32 1.0, %v3005_v51 }
 0x37c   :  { %v3009_v40 = vpop.eup %3008  ;;  %v1303_v41 = vmul.f32 %v3007_v55, %v3003_v50 }
 0x37d   :  { %v3011_v45 = vpop.eup %3010  ;;  %v1408_v43 = vadd.f32 1.0, %v3009_v40  ;;  %v4827_v40 = vld [vmem:[#allocation18_spill] sm:$0xff] }
 0x37e   :  { %v1410_v48 = vadd.f32 1.0, %v3011_v45  ;;  %v1430_v13 = vpack.c.bf16 %v1303_v41, %v1303_v41  ;;  %v4828_v45 = vld [vmem:[#allocation17_spill] sm:$0xff] }
 0x380   :  { %3012 = vrcp.f32 %v1410_v48  ;;  %1464 = vmatmul.mubr.bf16.vlgmr.msra.gmra.mrb[52].mxu0 %v1430_v13  ;;  %1505 = vmatmul.mubr.bf16.vlgmr.msra.gmra.mrb[52].mxu1 %v1430_v13 }
 0x381   :  { %3014 = vpow2.f32 %v2758_v39  ;;  %1554 = vmatpush1.bf16.msra.mxu0 %v3967_v14  ;;  %1595 = vmatpush1.bf16.msra.mxu1 %v3973_v15 }
 0x382   :  { %3016 = vrcp.f32 %v1408_v43  ;;  %1555 = vmatprep.subr.bf16.mxu0 %v3979_v6  ;;  %1596 = vmatprep.subr.bf16.mxu1 %v3985_v53 }
 0x383   :  { %1585 = vmatprep.mubr.bf16.mxu0 %v4812_v10  ;;  %1626 = vmatprep.mubr.bf16.mxu1 %v4812_v10  ;;  %3018 = vrcp.f32 %v1407_v47 }
 0x385   :  { %1556 = vmatpush1.bf16.msra.mxu0 %v3993_v20  ;;  %1597 = vmatpush1.bf16.msra.mxu1 %v3999_v27 }
 0x386   :  { %1557 = vmatprep.subr.bf16.mxu0 %v4005_v21  ;;  %1598 = vmatprep.subr.bf16.mxu1 %v4011_v28 }
 0x389   :  { %1558 = vmatpush1.bf16.msra.mxu0 %v4080_v56  ;;  %1599 = vmatpush1.bf16.msra.mxu1 %v4018_v9 }
 0x38a   :  { %v3013_v42 = vpop.eup %3012  ;;  %1559 = vmatprep.subr.bf16.mxu0 %v4024_v7  ;;  %1600 = vmatprep.subr.bf16.mxu1 %v4030_v46 }
 0x38b   :  { %v3015_v16 = vpop.eup %3014  ;;  %v1419_v34 = vmul.f32 2.0, %v3013_v42 }
 0x38c   :  { %v3017_v17 = vpop.eup %3016  ;;  %v1409_v32 = vadd.f32 1.0, %v3015_v16 }
 0x38d   :  { %v2760_v33 = vadd.f32 -1.0, %v1419_v34  ;;  %1560 = vmatpush1.bf16.msra.mxu0 %v4089_v57  ;;  %1601 = vmatpush1.bf16.msra.mxu1 %v4095_v58  ;;  %v3019_v35 = vpop.eup %3018  ;;  %v1421_v26 = vmul.f32 %v3017_v17, %v4038_v8 }
 0x38e   :  { %1561 = vmatprep.subr.bf16.mxu0 %v4101_v59  ;;  %1602 = vmatprep.subr.bf16.mxu1 %v4107_v60  ;;  %3020 = vrcp.f32 %v1409_v32 }
 0x38f   :  { %v1422_v31 = vmul.f32 %v3019_v35, %v2760_v33 }
 0x391   :  { %v4227_v24 = vadd.f32 %v1422_v31, %v1421_v26  ;;  %1562 = vmatpush1.bf16.msra.mxu0 %v4113_v61  ;;  %1603 = vmatpush1.bf16.msra.mxu1 %v4119_v63 }
 0x392   :  { %1563 = vmatprep.subr.bf16.mxu0 %v4125_v0  ;;  %1604 = vmatprep.subr.bf16.mxu1 %v4131_v2 }
 0x393   :  { %3022 = vtanh.f32 %v4227_v24 }
 0x395   :  { %1564 = vmatpush1.bf16.msra.mxu0 %v4137_v3  ;;  %1605 = vmatpush1.bf16.msra.mxu1 %v4143_v4 }
 0x396   :  { %1565 = vmatprep.subr.bf16.mxu0 %v4149_v5  ;;  %1606 = vmatprep.subr.bf16.mxu1 %v4155_v44 }
 0x398   :  { %v3021_v8 = vpop.eup %3020 }
 0x399   :  { %1566 = vmatpush1.bf16.msra.mxu0 %v4161_v29  ;;  %1607 = vmatpush1.bf16.msra.mxu1 %v4167_v18 }
 0x39a   :  { %1567 = vmatprep.subr.bf16.mxu0 %v4173_v12  ;;  %1608 = vmatprep.subr.bf16.mxu1 %v4179_v36 }
 0x39d   :  { %v3023_v22 = vpop.eup %3022  ;;  %1568 = vmatpush1.bf16.msra.mxu0 %v4185_v37  ;;  %1609 = vmatpush1.bf16.msra.mxu1 %v4191_v38 }
 0x39e   :  { %v1425_v30 = vmul.f32 %v3023_v22, %v3021_v8  ;;  %1675 = vmatprep.subr.bf16.mxu0 %v4058_v52  ;;  %1716 = vmatprep.subr.bf16.mxu1 %v4064_v54 }
 0x3a0   :  { %v1552_v19 = vpack.c.bf16 %v1425_v30, %v1425_v30 }
 0x3a2   :  { %1586 = vmatmul.mubr.bf16.vlgmr.msra.gmra.mrb[56].mxu0 %v1552_v19  ;;  %1627 = vmatmul.mubr.bf16.vlgmr.msra.gmra.mrb[56].mxu1 %v1552_v19 }
 0x3a3   :  { %1676 = vmatpush1.bf16.msra.mxu0 %v3967_v14  ;;  %1717 = vmatpush1.bf16.msra.mxu1 %v3973_v15 }
 0x3a4   :  { %1677 = vmatprep.subr.bf16.mxu0 %v3979_v6  ;;  %1718 = vmatprep.subr.bf16.mxu1 %v3985_v53 }
 0x3a5   :  { %1707 = vmatprep.mubr.bf16.mxu0 %v4812_v10  ;;  %1748 = vmatprep.mubr.bf16.mxu1 %v4812_v10 }
 0x3a7   :  { %1678 = vmatpush1.bf16.msra.mxu0 %v3993_v20  ;;  %1719 = vmatpush1.bf16.msra.mxu1 %v3999_v27 }
 0x3a8   :  { %1679 = vmatprep.subr.bf16.mxu0 %v4005_v21  ;;  %1720 = vmatprep.subr.bf16.mxu1 %v4011_v28 }
 0x3ab   :  { %1680 = vmatpush1.bf16.msra.mxu0 %v4080_v56  ;;  %1721 = vmatpush1.bf16.msra.mxu1 %v4018_v9 }
 0x3ac   :  { %1681 = vmatprep.subr.bf16.mxu0 %v4024_v7  ;;  %1722 = vmatprep.subr.bf16.mxu1 %v4030_v46 }
 0x3af   :  { %1682 = vmatpush1.bf16.msra.mxu0 %v4089_v57  ;;  %1723 = vmatpush1.bf16.msra.mxu1 %v4095_v58 }
 0x3b0   :  { %1683 = vmatprep.subr.bf16.mxu0 %v4101_v59  ;;  %1724 = vmatprep.subr.bf16.mxu1 %v4107_v60 }
 0x3b3   :  { %1684 = vmatpush1.bf16.msra.mxu0 %v4113_v61  ;;  %1725 = vmatpush1.bf16.msra.mxu1 %v4119_v63 }
 0x3b4   :  { %1685 = vmatprep.subr.bf16.mxu0 %v4125_v0  ;;  %1726 = vmatprep.subr.bf16.mxu1 %v4131_v2 }
 0x3b7   :  { %1686 = vmatpush1.bf16.msra.mxu0 %v4137_v3  ;;  %1727 = vmatpush1.bf16.msra.mxu1 %v4143_v4 }
 0x3b8   :  { %1687 = vmatprep.subr.bf16.mxu0 %v4149_v5  ;;  %1728 = vmatprep.subr.bf16.mxu1 %v4155_v44 }
 0x3bb   :  { %1688 = vmatpush1.bf16.msra.mxu0 %v4161_v29  ;;  %1729 = vmatpush1.bf16.msra.mxu1 %v4167_v18 }
 0x3bc   :  { %1689 = vmatprep.subr.bf16.mxu0 %v4173_v12  ;;  %1730 = vmatprep.subr.bf16.mxu1 %v4179_v36 }
 0x3bf   :  { %1690 = vmatpush1.bf16.msra.mxu0 %v4185_v37  ;;  %1731 = vmatpush1.bf16.msra.mxu1 %v4191_v38 }
 0x3c0   :  { %1797 = vmatprep.subr.bf16.mxu0 %v4058_v52  ;;  %1838 = vmatprep.subr.bf16.mxu1 %v4064_v54 }
 0x453   :  { %v1465_v1 = vpop.f32.mrb[52].mxu0  ;;  %v1506_v62 = vpop.f32.mrb[52].mxu1 }
 0x454   :  { %v1513_v25 = vadd.f32 %v1465_v1, %v4825_v23  ;;  %v1515_v50 = vadd.f32 %v1506_v62, %v4826_v49  ;;  %v1467_v51 = vpop.f32.mrb[53].mxu0  ;;  %v1508_v55 = vpop.f32.mrb[53].mxu1 }
 0x455   :  { %v1514_v41 = vadd.f32 %v1467_v51, %v4827_v40  ;;  %v1516_v39 = vadd.f32 %v1508_v55, %v4828_v45  ;;  %v1469_v43 = vpop.f32.mrb[54].mxu0  ;;  %v1510_v48 = vpop.f32.mrb[54].mxu1  ;;  %v4829_v55 = vld [vmem:[#allocation20_spill] sm:$0xff] }
 0x456   :  { %v2761_v13 = vmul.f32 -1.442695, %v1513_v25  ;;  %v1470_v47 = vpop.f32.mrb[55].mxu0  ;;  %v1511_v42 = vpop.f32.mrb[55].mxu1  ;;  %v2763_v32 = vmul.f32 -1.442695, %v1515_v50 }
 0x457   :  { %v2762_v16 = vmul.f32 -1.442695, %v1514_v41  ;;  %v2764_v34 = vmul.f32 -1.442695, %v1516_v39  ;;  %v4830_v41 = vld [vmem:[#allocation19_spill] sm:$0xff]  ;;  %v4832_v42 = vld [vmem:[#allocation21_spill] sm:$0xff] }
 0x458   :  { %3024 = vpow2.f32 %v2761_v13  ;;  %v4831_v13 = vld [vmem:[#allocation22_spill] sm:$0xff] }
 0x459   :  { %3026 = vpow2.f32 %v2762_v16 }
 0x45a   :  { %3028 = vpow2.f32 %v2764_v34 }
 0x462   :  { %v3025_v17 = vpop.eup %3024 }
 0x463   :  { %v3027_v33 = vpop.eup %3026  ;;  %v1529_v8 = vadd.f32 1.0, %v3025_v17 }
 0x464   :  { %v3029_v35 = vpop.eup %3028  ;;  %v1530_v26 = vadd.f32 1.0, %v3027_v33 }
 0x465   :  { %v1532_v31 = vadd.f32 1.0, %v3029_v35 }
 0x467   :  { %3030 = vrcp.f32 %v1532_v31 }
 0x468   :  { %3032 = vpow2.f32 %v2763_v32 }
 0x469   :  { %3034 = vrcp.f32 %v1530_v26 }
 0x46a   :  { %3036 = vrcp.f32 %v1529_v8 }
 0x471   :  { %v3031_v22 = vpop.eup %3030 }
 0x472   :  { %v3033_v30 = vpop.eup %3032  ;;  %v1541_v19 = vmul.f32 2.0, %v3031_v22 }
 0x473   :  { %v3035_v1 = vpop.eup %3034  ;;  %v1531_v51 = vadd.f32 1.0, %v3033_v30 }
 0x474   :  { %v2765_v62 = vadd.f32 -1.0, %v1541_v19  ;;  %v3037_v49 = vpop.eup %3036  ;;  %v1543_v43 = vmul.f32 %v3035_v1, %v4205_v11 }
 0x475   :  { %v1587_v23 = vpop.f32.mrb[56].mxu0  ;;  %v1628_v25 = vpop.f32.mrb[56].mxu1  ;;  %3038 = vrcp.f32 %v1531_v51 }
 0x476   :  { %v1635_v40 = vadd.f32 %v1587_v23, %v4829_v55  ;;  %v1637_v50 = vadd.f32 %v1628_v25, %v4830_v41  ;;  %v1589_v45 = vpop.f32.mrb[57].mxu0  ;;  %v1630_v39 = vpop.f32.mrb[57].mxu1  ;;  %v1544_v48 = vmul.f32 %v3037_v49, %v2765_v62 }
 0x477   :  { %v1636_v47 = vadd.f32 %v1589_v45, %v4831_v13  ;;  %v1638_v16 = vadd.f32 %v1630_v39, %v4832_v42  ;;  %v1591_v34 = vpop.f32.mrb[58].mxu0  ;;  %v1632_v17 = vpop.f32.mrb[58].mxu1 }
 0x478   :  { %v2766_v33 = vmul.f32 -1.442695, %v1635_v40  ;;  %v1592_v35 = vpop.f32.mrb[59].mxu0  ;;  %v1633_v32 = vpop.f32.mrb[59].mxu1  ;;  %v4289_v26 = vadd.f32 %v1544_v48, %v1543_v43  ;;  %v2768_v23 = vmul.f32 -1.442695, %v1637_v50 }
 0x479   :  { %v2767_v31 = vmul.f32 -1.442695, %v1636_v47  ;;  %v2769_v8 = vmul.f32 -1.442695, %v1638_v16  ;;  %v4833_v32 = vld [vmem:[#allocation24_spill] sm:$0xff] }
 0x47a   :  { %3040 = vtanh.f32 %v4289_v26 }
 0x47b   :  { %3042 = vpow2.f32 %v2766_v33 }
 0x47c   :  { %3044 = vpow2.f32 %v2767_v31 }
 0x47d   :  { %3046 = vpow2.f32 %v2769_v8  ;;  %v4834_v8 = vld [vmem:[#allocation23_spill] sm:$0xff] }
 0x47f   :  { %v3039_v11 = vpop.eup %3038 }
 0x484   :  { %v3041_v22 = vpop.eup %3040 }
 0x485   :  { %v3043_v30 = vpop.eup %3042  ;;  %v1547_v19 = vmul.f32 %v3041_v22, %v3039_v11 }
 0x486   :  { %v3045_v1 = vpop.eup %3044  ;;  %v1651_v40 = vadd.f32 1.0, %v3043_v30 }
 0x487   :  { %v3047_v62 = vpop.eup %3046  ;;  %v1674_v25 = vpack.c.bf16 %v1547_v19, %v1547_v19  ;;  %v1652_v49 = vadd.f32 1.0, %v3045_v1  ;;  %v4835_v19 = vld [vmem:[#allocation26_spill] sm:$0xff] }
 0x488   :  { %v1654_v55 = vadd.f32 1.0, %v3047_v62  ;;  %v4836_v62 = vld [vmem:[#allocation25_spill] sm:$0xff] }
 0x489   :  { %1708 = vmatmul.mubr.bf16.vlgmr.msra.gmra.mrb[60].mxu0 %v1674_v25  ;;  %1749 = vmatmul.mubr.bf16.vlgmr.msra.gmra.mrb[60].mxu1 %v1674_v25 }
 0x48a   :  { %3048 = vrcp.f32 %v1654_v55  ;;  %1798 = vmatpush1.bf16.msra.mxu0 %v3967_v14  ;;  %1839 = vmatpush1.bf16.msra.mxu1 %v3973_v15 }
 0x48b   :  { %3050 = vpow2.f32 %v2768_v23  ;;  %1799 = vmatprep.subr.bf16.mxu0 %v3979_v6  ;;  %1840 = vmatprep.subr.bf16.mxu1 %v3985_v53 }
 0x48c   :  { %3052 = vrcp.f32 %v1652_v49  ;;  %1829 = vmatprep.mubr.bf16.mxu0 %v4812_v10  ;;  %1870 = vmatprep.mubr.bf16.mxu1 %v4812_v10 }
 0x48d   :  { %3054 = vrcp.f32 %v1651_v40 }
 0x48e   :  { %1800 = vmatpush1.bf16.msra.mxu0 %v3993_v20  ;;  %1841 = vmatpush1.bf16.msra.mxu1 %v3999_v27 }
 0x48f   :  { %1801 = vmatprep.subr.bf16.mxu0 %v4005_v21  ;;  %1842 = vmatprep.subr.bf16.mxu1 %v4011_v28 }
 0x492   :  { %1802 = vmatpush1.bf16.msra.mxu0 %v4080_v56  ;;  %1843 = vmatpush1.bf16.msra.mxu1 %v4018_v9 }
 0x493   :  { %1803 = vmatprep.subr.bf16.mxu0 %v4024_v7  ;;  %1844 = vmatprep.subr.bf16.mxu1 %v4030_v46 }
 0x494   :  { %v3049_v51 = vpop.eup %3048 }
 0x495   :  { %v3051_v41 = vpop.eup %3050  ;;  %v1663_v50 = vmul.f32 2.0, %v3049_v51 }
 0x496   :  { %v3053_v45 = vpop.eup %3052  ;;  %1804 = vmatpush1.bf16.msra.mxu0 %v4089_v57  ;;  %1845 = vmatpush1.bf16.msra.mxu1 %v4095_v58  ;;  %v1653_v48 = vadd.f32 1.0, %v3051_v41 }
 0x497   :  { %v2770_v39 = vadd.f32 -1.0, %v1663_v50  ;;  %1805 = vmatprep.subr.bf16.mxu0 %v4101_v59  ;;  %1846 = vmatprep.subr.bf16.mxu1 %v4107_v60  ;;  %v3055_v43 = vpop.eup %3054  ;;  %v1665_v13 = vmul.f32 %v3053_v45, %v4227_v24 }
 0x498   :  { %3056 = vrcp.f32 %v1653_v48 }
 0x499   :  { %v1666_v47 = vmul.f32 %v3055_v43, %v2770_v39 }
 0x49a   :  { %1806 = vmatpush1.bf16.msra.mxu0 %v4113_v61  ;;  %1847 = vmatpush1.bf16.msra.mxu1 %v4119_v63 }
 0x49b   :  { %v4313_v42 = vadd.f32 %v1666_v47, %v1665_v13  ;;  %1807 = vmatprep.subr.bf16.mxu0 %v4125_v0  ;;  %1848 = vmatprep.subr.bf16.mxu1 %v4131_v2 }
 0x49d   :  { %3058 = vtanh.f32 %v4313_v42 }
 0x49e   :  { %1808 = vmatpush1.bf16.msra.mxu0 %v4137_v3  ;;  %1849 = vmatpush1.bf16.msra.mxu1 %v4143_v4 }
 0x49f   :  { %1809 = vmatprep.subr.bf16.mxu0 %v4149_v5  ;;  %1850 = vmatprep.subr.bf16.mxu1 %v4155_v44 }
 0x4a2   :  { %1810 = vmatpush1.bf16.msra.mxu0 %v4161_v29  ;;  %1851 = vmatpush1.bf16.msra.mxu1 %v4167_v18  ;;  %v3057_v24 = vpop.eup %3056 }
 0x4a3   :  { %1811 = vmatprep.subr.bf16.mxu0 %v4173_v12  ;;  %1852 = vmatprep.subr.bf16.mxu1 %v4179_v36 }
 0x4a6   :  { %1812 = vmatpush1.bf16.msra.mxu0 %v4185_v37  ;;  %1853 = vmatpush1.bf16.msra.mxu1 %v4191_v38 }
 0x4a7   :  { %v3059_v16 = vpop.eup %3058  ;;  %1919 = vmatprep.subr.bf16.mxu0 %v4058_v52  ;;  %1960 = vmatprep.subr.bf16.mxu1 %v4064_v54 }
 0x4a8   :  { %v1669_v34 = vmul.f32 %v3059_v16, %v3057_v24 }
 0x4aa   :  { %v1796_v17 = vpack.c.bf16 %v1669_v34, %v1669_v34 }
 0x4ac   :  { %1830 = vmatmul.mubr.bf16.vlgmr.msra.gmra.mrb[64].mxu0 %v1796_v17  ;;  %1871 = vmatmul.mubr.bf16.vlgmr.msra.gmra.mrb[64].mxu1 %v1796_v17 }
 0x4ad   :  { %1920 = vmatpush1.bf16.msra.mxu0 %v3967_v14  ;;  %1961 = vmatpush1.bf16.msra.mxu1 %v3973_v15 }
 0x4ae   :  { %1921 = vmatprep.subr.bf16.mxu0 %v3979_v6  ;;  %1962 = vmatprep.subr.bf16.mxu1 %v3985_v53 }
 0x4af   :  { %1951 = vmatprep.mubr.bf16.mxu0 %v4812_v10  ;;  %1992 = vmatprep.mubr.bf16.mxu1 %v4812_v10 }
 0x4b1   :  { %1922 = vmatpush1.bf16.msra.mxu0 %v3993_v20  ;;  %1963 = vmatpush1.bf16.msra.mxu1 %v3999_v27 }
 0x4b2   :  { %1923 = vmatprep.subr.bf16.mxu0 %v4005_v21  ;;  %1964 = vmatprep.subr.bf16.mxu1 %v4011_v28 }
 0x4b5   :  { %1924 = vmatpush1.bf16.msra.mxu0 %v4080_v56  ;;  %1965 = vmatpush1.bf16.msra.mxu1 %v4018_v9 }
 0x4b6   :  { %1925 = vmatprep.subr.bf16.mxu0 %v4024_v7  ;;  %1966 = vmatprep.subr.bf16.mxu1 %v4030_v46 }
 0x4b9   :  { %1926 = vmatpush1.bf16.msra.mxu0 %v4089_v57  ;;  %1967 = vmatpush1.bf16.msra.mxu1 %v4095_v58 }
 0x4ba   :  { %1927 = vmatprep.subr.bf16.mxu0 %v4101_v59  ;;  %1968 = vmatprep.subr.bf16.mxu1 %v4107_v60 }
 0x4bd   :  { %1928 = vmatpush1.bf16.msra.mxu0 %v4113_v61  ;;  %1969 = vmatpush1.bf16.msra.mxu1 %v4119_v63 }
 0x4be   :  { %1929 = vmatprep.subr.bf16.mxu0 %v4125_v0  ;;  %1970 = vmatprep.subr.bf16.mxu1 %v4131_v2 }
 0x4c1   :  { %1930 = vmatpush1.bf16.msra.mxu0 %v4137_v3  ;;  %1971 = vmatpush1.bf16.msra.mxu1 %v4143_v4 }
 0x4c2   :  { %1931 = vmatprep.subr.bf16.mxu0 %v4149_v5  ;;  %1972 = vmatprep.subr.bf16.mxu1 %v4155_v44 }
 0x4c5   :  { %1932 = vmatpush1.bf16.msra.mxu0 %v4161_v29  ;;  %1973 = vmatpush1.bf16.msra.mxu1 %v4167_v18 }
 0x4c6   :  { %1933 = vmatprep.subr.bf16.mxu0 %v4173_v12  ;;  %1974 = vmatprep.subr.bf16.mxu1 %v4179_v36 }
 0x4c9   :  { %1934 = vmatpush1.bf16.msra.mxu0 %v4185_v37  ;;  %1975 = vmatpush1.bf16.msra.mxu1 %v4191_v38 }
 0x4ca   :  { %2041 = vmatprep.subr.bf16.mxu0 %v4058_v52  ;;  %2082 = vmatprep.subr.bf16.mxu1 %v4064_v54 }
 0x55c   :  { %v1709_v33 = vpop.f32.mrb[60].mxu0  ;;  %v1750_v35 = vpop.f32.mrb[60].mxu1 }
 0x55d   :  { %v1757_v31 = vadd.f32 %v1709_v33, %v4833_v32  ;;  %v1759_v11 = vadd.f32 %v1750_v35, %v4834_v8  ;;  %v1711_v22 = vpop.f32.mrb[61].mxu0  ;;  %v1752_v30 = vpop.f32.mrb[61].mxu1 }
 0x55e   :  { %v1758_v1 = vadd.f32 %v1711_v22, %v4835_v19  ;;  %v1760_v23 = vadd.f32 %v1752_v30, %v4836_v62  ;;  %v1713_v25 = vpop.f32.mrb[62].mxu0  ;;  %v1754_v49 = vpop.f32.mrb[62].mxu1  ;;  %v4838_v62 = vld [vmem:[#allocation27_spill] sm:$0xff] }
 0x55f   :  { %v2771_v55 = vmul.f32 -1.442695, %v1757_v31  ;;  %v1714_v40 = vpop.f32.mrb[63].mxu0  ;;  %v1755_v51 = vpop.f32.mrb[63].mxu1  ;;  %v2773_v48 = vmul.f32 -1.442695, %v1759_v11 }
 0x560   :  { %v2772_v41 = vmul.f32 -1.442695, %v1758_v1  ;;  %v2774_v50 = vmul.f32 -1.442695, %v1760_v23  ;;  %v4837_v11 = vld [vmem:[#allocation28_spill] sm:$0xff]  ;;  %v4840_v51 = vld [vmem:[#allocation29_spill] sm:$0xff] }
 0x561   :  { %3060 = vpow2.f32 %v2771_v55  ;;  %v4839_v55 = vld [vmem:[#allocation30_spill] sm:$0xff] }
 0x562   :  { %3062 = vpow2.f32 %v2772_v41 }
 0x563   :  { %3064 = vpow2.f32 %v2774_v50 }
 0x56b   :  { %v3061_v45 = vpop.eup %3060 }
 0x56c   :  { %v3063_v39 = vpop.eup %3062  ;;  %v1773_v24 = vadd.f32 1.0, %v3061_v45 }
 0x56d   :  { %v3065_v43 = vpop.eup %3064  ;;  %v1774_v13 = vadd.f32 1.0, %v3063_v39 }
 0x56e   :  { %v1776_v47 = vadd.f32 1.0, %v3065_v43 }
 0x570   :  { %3066 = vrcp.f32 %v1776_v47 }
 0x571   :  { %3068 = vpow2.f32 %v2773_v48 }
 0x572   :  { %3070 = vrcp.f32 %v1774_v13 }
 0x573   :  { %3072 = vrcp.f32 %v1773_v24 }
 0x57a   :  { %v3067_v16 = vpop.eup %3066 }
 0x57b   :  { %v3069_v34 = vpop.eup %3068  ;;  %v1785_v17 = vmul.f32 2.0, %v3067_v16 }
 0x57c   :  { %v3071_v33 = vpop.eup %3070  ;;  %v1775_v31 = vadd.f32 1.0, %v3069_v34 }
 0x57d   :  { %v2775_v35 = vadd.f32 -1.0, %v1785_v17  ;;  %v3073_v32 = vpop.eup %3072  ;;  %v1787_v30 = vmul.f32 %v3071_v33, %v4289_v26 }
 0x57e   :  { %3074 = vrcp.f32 %v1775_v31 }
 0x57f   :  { %v1831_v8 = vpop.f32.mrb[64].mxu0  ;;  %v1872_v22 = vpop.f32.mrb[64].mxu1  ;;  %v1788_v19 = vmul.f32 %v3073_v32, %v2775_v35 }
 0x580   :  { %v1879_v1 = vadd.f32 %v1831_v8, %v4837_v11  ;;  %v1881_v23 = vadd.f32 %v1872_v22, %v4838_v62  ;;  %v1833_v25 = vpop.f32.mrb[65].mxu0  ;;  %v1874_v49 = vpop.f32.mrb[65].mxu1  ;;  %v4423_v62 = vld [vmem:[%s4755_s2 + $0x8] ss:$16 sps:$4 sm:$0xff]  }
 0x581   :  { %v1880_v40 = vadd.f32 %v1833_v25, %v4839_v55  ;;  %v1882_v41 = vadd.f32 %v1874_v49, %v4840_v51  ;;  %v1835_v50 = vpop.f32.mrb[66].mxu0  ;;  %v1876_v45 = vpop.f32.mrb[66].mxu1  ;;  %v4373_v39 = vadd.f32 %v1788_v19, %v1787_v30  ;;  %v4449_v25 = vld [vmem:[%s4755_s2 + $0x28] ss:$16 sps:$4 sm:$0xff]   ;;  %v4455_v49 = vld [vmem:[%s4755_s2 + $0x44] ss:$16 sps:$4 sm:$0xff]  }
 0x582   :  { %v2776_v43 = vmul.f32 -1.442695, %v1879_v1  ;;  %v1836_v48 = vpop.f32.mrb[67].mxu0  ;;  %v1877_v13 = vpop.f32.mrb[67].mxu1  ;;  %v2778_v8 = vmul.f32 -1.442695, %v1881_v23 }
 0x583   :  { %v2777_v26 = vmul.f32 -1.442695, %v1880_v40  ;;  %3076 = vtanh.f32 %v4373_v39  ;;  %v2779_v47 = vmul.f32 -1.442695, %v1882_v41  ;;  %v4417_v1 = vld [vmem:[%s4755_s2] ss:$16 sps:$4 sm:$0xff]  }
 0x584   :  { %3078 = vpow2.f32 %v2776_v43  ;;  %v4443_v23 = vld [vmem:[%s4755_s2 + $0x20] ss:$16 sps:$4 sm:$0xff]   ;;  %v4461_v55 = vld [vmem:[%s4755_s2 + $0x4c] ss:$16 sps:$4 sm:$0xff]   ;;  %v4468_v40 = vld [vmem:[%s4755_s2 + $0x48] ss:$16 sps:$4 sm:$0xff]  }
 0x585   :  { %3080 = vpow2.f32 %v2777_v26  ;;  %v4474_v51 = vld [vmem:[%s4755_s2 + $0x64] ss:$16 sps:$4 sm:$0xff]   ;;  %v4480_v41 = vld [vmem:[%s4755_s2 + $0x6c] ss:$16 sps:$4 sm:$0xff]  }
 0x586   :  { %3082 = vpow2.f32 %v2779_v47 }
 0x588   :  { %v3075_v24 = vpop.eup %3074 }
 0x58d   :  { %v3077_v16 = vpop.eup %3076 }
 0x58e   :  { %v1791_v34 = vmul.f32 %v3077_v16, %v3075_v24  ;;  %v3079_v17 = vpop.eup %3078 }
 0x58f   :  { %v3081_v33 = vpop.eup %3080  ;;  %v1895_v31 = vadd.f32 1.0, %v3079_v17 }
 0x590   :  { %v1918_v35 = vpack.c.bf16 %v1791_v34, %v1791_v34  ;;  %v3083_v32 = vpop.eup %3082  ;;  %v1896_v22 = vadd.f32 1.0, %v3081_v33 }
 0x591   :  { %v1898_v30 = vadd.f32 1.0, %v3083_v32 }
 0x592   :  { %1952 = vmatmul.mubr.bf16.vlgmr.msra.gmra.mrb[68].mxu0 %v1918_v35  ;;  %1993 = vmatmul.mubr.bf16.vlgmr.msra.gmra.mrb[68].mxu1 %v1918_v35 }
 0x593   :  { %2042 = vmatpush1.bf16.msra.mxu0 %v3967_v14  ;;  %2083 = vmatpush1.bf16.msra.mxu1 %v3973_v15  ;;  %3084 = vrcp.f32 %v1898_v30 }
 0x594   :  { %2043 = vmatprep.subr.bf16.mxu0 %v3979_v6  ;;  %2084 = vmatprep.subr.bf16.mxu1 %v3985_v53  ;;  %3086 = vpow2.f32 %v2778_v8 }
 0x595   :  { %2073 = vmatprep.mubr.bf16.mxu0 %v4812_v10  ;;  %2114 = vmatprep.mubr.bf16.mxu1 %v4812_v10  ;;  %3088 = vrcp.f32 %v1896_v22 }
 0x596   :  { %3090 = vrcp.f32 %v1895_v31 }
 0x597   :  { %2044 = vmatpush1.bf16.msra.mxu0 %v3993_v20  ;;  %2085 = vmatpush1.bf16.msra.mxu1 %v3999_v27 }
 0x598   :  { %2045 = vmatprep.subr.bf16.mxu0 %v4005_v21  ;;  %2086 = vmatprep.subr.bf16.mxu1 %v4011_v28 }
 0x59b   :  { %2046 = vmatpush1.bf16.msra.mxu0 %v4080_v56  ;;  %2087 = vmatpush1.bf16.msra.mxu1 %v4018_v9 }
 0x59c   :  { %2047 = vmatprep.subr.bf16.mxu0 %v4024_v7  ;;  %2088 = vmatprep.subr.bf16.mxu1 %v4030_v46 }
 0x59d   :  { %v3085_v14 = vpop.eup %3084 }
 0x59e   :  { %v3087_v15 = vpop.eup %3086  ;;  %v1907_v6 = vmul.f32 2.0, %v3085_v14 }
 0x59f   :  { %2048 = vmatpush1.bf16.msra.mxu0 %v4089_v57  ;;  %2089 = vmatpush1.bf16.msra.mxu1 %v4095_v58  ;;  %v3089_v53 = vpop.eup %3088  ;;  %v1897_v21 = vadd.f32 1.0, %v3087_v15 }
 0x5a0   :  { %2049 = vmatprep.subr.bf16.mxu0 %v4101_v59  ;;  %2090 = vmatprep.subr.bf16.mxu1 %v4107_v60  ;;  %v2780_v20 = vadd.f32 -1.0, %v1907_v6  ;;  %v3091_v27 = vpop.eup %3090  ;;  %v1909_v28 = vmul.f32 %v3089_v53, %v4313_v42  ;;  %v4845_v6 = vld [vmem:[#allocation36_spill] sm:$0xff] }
 0x5a1   :  { %3092 = vrcp.f32 %v1897_v21 }
 0x5a2   :  { %v1910_v9 = vmul.f32 %v3091_v27, %v2780_v20  ;;  %v4846_v20 = vld [vmem:[#allocation35_spill] sm:$0xff] }
 0x5a3   :  { %2050 = vmatpush1.bf16.msra.mxu0 %v4113_v61  ;;  %2091 = vmatpush1.bf16.msra.mxu1 %v4119_v63 }
 0x5a4   :  { %2051 = vmatprep.subr.bf16.mxu0 %v4125_v0  ;;  %2092 = vmatprep.subr.bf16.mxu1 %v4131_v2  ;;  %v4399_v7 = vadd.f32 %v1910_v9, %v1909_v28 }
 0x5a6   :  { %3094 = vtanh.f32 %v4399_v7 }
 0x5a7   :  { %2052 = vmatpush1.bf16.msra.mxu0 %v4137_v3  ;;  %2093 = vmatpush1.bf16.msra.mxu1 %v4143_v4 }
 0x5a8   :  { %2053 = vmatprep.subr.bf16.mxu0 %v4149_v5  ;;  %2094 = vmatprep.subr.bf16.mxu1 %v4155_v44 }
 0x5ab   :  { %2054 = vmatpush1.bf16.msra.mxu0 %v4161_v29  ;;  %2095 = vmatpush1.bf16.msra.mxu1 %v4167_v18  ;;  %v3093_v46 = vpop.eup %3092 }
 0x5ac   :  { %2055 = vmatprep.subr.bf16.mxu0 %v4173_v12  ;;  %2096 = vmatprep.subr.bf16.mxu1 %v4179_v36 }
 0x5af   :  { %2056 = vmatpush1.bf16.msra.mxu0 %v4185_v37  ;;  %2097 = vmatpush1.bf16.msra.mxu1 %v4191_v38 }
 0x5b0   :  { %2163 = vmatprep.subr.bf16.mxu0 %v4058_v52  ;;  %2204 = vmatprep.subr.bf16.mxu1 %v4064_v54  ;;  %v3095_v42 = vpop.eup %3094  ;;  %v4429_v52 = vld [vmem:[%s4755_s2 + $0x24] ss:$16 sps:$4 sm:$0xff]   ;;  %v4435_v54 = vld [vmem:[%s4755_s2 + $0x2c] ss:$16 sps:$4 sm:$0xff]  }
 0x5b1   :  { %v1913_v19 = vmul.f32 %v3095_v42, %v3093_v46  ;;  %v4847_v46 = vld [vmem:[#allocation38_spill] sm:$0xff] }
 0x5b3   :  { %v2040_v11 = vpack.c.bf16 %v1913_v19, %v1913_v19  ;;  %v4848_v19 = vld [vmem:[#allocation37_spill] sm:$0xff] }
 0x5b5   :  { %2074 = vmatmul.mubr.bf16.vlgmr.msra.gmra.mrb[72].mxu0 %v2040_v11  ;;  %2115 = vmatmul.mubr.bf16.vlgmr.msra.gmra.mrb[72].mxu1 %v2040_v11 }
 0x5b6   :  { %2164 = vmatpush1.bf16.msra.mxu0 %v4417_v1  ;;  %2205 = vmatpush1.bf16.msra.mxu1 %v4423_v62 }
 0x5b7   :  { %2165 = vmatprep.subr.bf16.mxu0 %v4429_v52  ;;  %2206 = vmatprep.subr.bf16.mxu1 %v4435_v54 }
 0x5b8   :  { %2195 = vmatprep.mubr.bf16.mxu0 %v4812_v10  ;;  %2236 = vmatprep.mubr.bf16.mxu1 %v4812_v10 }
 0x5ba   :  { %2166 = vmatpush1.bf16.msra.mxu0 %v4443_v23  ;;  %2207 = vmatpush1.bf16.msra.mxu1 %v4449_v25 }
 0x5bb   :  { %2167 = vmatprep.subr.bf16.mxu0 %v4455_v49  ;;  %2208 = vmatprep.subr.bf16.mxu1 %v4461_v55 }
 0x5be   :  { %2168 = vmatpush1.bf16.msra.mxu0 %v4080_v56  ;;  %2209 = vmatpush1.bf16.msra.mxu1 %v4468_v40  ;;  %v4504_v56 = vld [vmem:[%s4755_s2 + $0x4] ss:$16 sps:$4 sm:$0xff]  }
 0x5bf   :  { %2169 = vmatprep.subr.bf16.mxu0 %v4474_v51  ;;  %2210 = vmatprep.subr.bf16.mxu1 %v4480_v41 }
 0x5c2   :  { %2170 = vmatpush1.bf16.msra.mxu0 %v4089_v57  ;;  %2211 = vmatpush1.bf16.msra.mxu1 %v4095_v58  ;;  %v4510_v57 = vld [vmem:[%s4755_s2 + $0xc] ss:$16 sps:$4 sm:$0xff]  }
 0x5c3   :  { %2171 = vmatprep.subr.bf16.mxu0 %v4101_v59  ;;  %2212 = vmatprep.subr.bf16.mxu1 %v4107_v60  ;;  %v4841_v60 = vld [vmem:[#allocation32_spill] sm:$0xff] }
 0x5c6   :  { %2172 = vmatpush1.bf16.msra.mxu0 %v4113_v61  ;;  %2213 = vmatpush1.bf16.msra.mxu1 %v4119_v63  ;;  %v4842_v63 = vld [vmem:[#allocation31_spill] sm:$0xff] }
 0x5c7   :  { %2173 = vmatprep.subr.bf16.mxu0 %v4125_v0  ;;  %2214 = vmatprep.subr.bf16.mxu1 %v4131_v2 }
 0x5ca   :  { %2174 = vmatpush1.bf16.msra.mxu0 %v4137_v3  ;;  %2215 = vmatpush1.bf16.msra.mxu1 %v4143_v4  ;;  %v4843_v4 = vld [vmem:[#allocation34_spill] sm:$0xff] }
 0x5cb   :  { %2175 = vmatprep.subr.bf16.mxu0 %v4149_v5  ;;  %2216 = vmatprep.subr.bf16.mxu1 %v4155_v44  ;;  %v4844_v44 = vld [vmem:[#allocation33_spill] sm:$0xff] }
 0x5ce   :  { %2176 = vmatpush1.bf16.msra.mxu0 %v4161_v29  ;;  %2217 = vmatpush1.bf16.msra.mxu1 %v4167_v18 }
 0x5cf   :  { %2177 = vmatprep.subr.bf16.mxu0 %v4173_v12  ;;  %2218 = vmatprep.subr.bf16.mxu1 %v4179_v36 }
 0x5d2   :  { %2178 = vmatpush1.bf16.msra.mxu0 %v4185_v37  ;;  %2219 = vmatpush1.bf16.msra.mxu1 %v4191_v38 }
 0x5d3   :  { %2285 = vmatprep.subr.bf16.mxu0 %v4504_v56  ;;  %2326 = vmatprep.subr.bf16.mxu1 %v4510_v57 }
 0x665   :  { %v1953_v58 = vpop.f32.mrb[68].mxu0  ;;  %v1994_v59 = vpop.f32.mrb[68].mxu1 }
 0x666   :  { %v2001_v61 = vadd.f32 %v1953_v58, %v4841_v60  ;;  %v2003_v0 = vadd.f32 %v1994_v59, %v4842_v63  ;;  %v1955_v2 = vpop.f32.mrb[69].mxu0  ;;  %v1996_v3 = vpop.f32.mrb[69].mxu1 }
 0x667   :  { %v2002_v5 = vadd.f32 %v1955_v2, %v4843_v4  ;;  %v2004_v29 = vadd.f32 %v1996_v3, %v4844_v44  ;;  %v1957_v18 = vpop.f32.mrb[70].mxu0  ;;  %v1998_v12 = vpop.f32.mrb[70].mxu1 }
 0x668   :  { %v2781_v36 = vmul.f32 -1.442695, %v2001_v61  ;;  %v1958_v37 = vpop.f32.mrb[71].mxu0  ;;  %v1999_v38 = vpop.f32.mrb[71].mxu1  ;;  %v2783_v26 = vmul.f32 -1.442695, %v2003_v0 }
 0x669   :  { %v2782_v50 = vmul.f32 -1.442695, %v2002_v5  ;;  %v2784_v45 = vmul.f32 -1.442695, %v2004_v29 }
 0x66a   :  { %3096 = vpow2.f32 %v2781_v36 }
 0x66b   :  { %3098 = vpow2.f32 %v2782_v50  ;;  %v4538_v50 = vld [vmem:[%s4755_s2 + $0x40] ss:$16 sps:$4 sm:$0xff]  }
 0x66c   :  { %3100 = vpow2.f32 %v2784_v45 }
 0x674   :  { %v3097_v43 = vpop.eup %3096 }
 0x675   :  { %v3099_v48 = vpop.eup %3098  ;;  %v2017_v16 = vadd.f32 1.0, %v3097_v43 }
 0x676   :  { %v3101_v13 = vpop.eup %3100  ;;  %v2018_v47 = vadd.f32 1.0, %v3099_v48 }
 0x677   :  { %v2020_v24 = vadd.f32 1.0, %v3101_v13  ;;  %v4547_v13 = vld [vmem:[%s4755_s2 + $0x60] ss:$16 sps:$4 sm:$0xff]  }
 0x679   :  { %3102 = vrcp.f32 %v2020_v24  ;;  %v4559_v24 = vld [vmem:[%s4755_s2 + $0x84] ss:$16 sps:$4 sm:$0xff]  }
 0x67a   :  { %3104 = vpow2.f32 %v2783_v26  ;;  %v4553_v26 = vld [vmem:[%s4755_s2 + $0x68] ss:$16 sps:$4 sm:$0xff]  }
 0x67b   :  { %3106 = vrcp.f32 %v2018_v47 }
 0x67c   :  { %3108 = vrcp.f32 %v2017_v16  ;;  %v4565_v16 = vld [vmem:[%s4755_s2 + $0x8c] ss:$16 sps:$4 sm:$0xff]  }
 0x683   :  { %v3103_v34 = vpop.eup %3102 }
 0x684   :  { %v3105_v17 = vpop.eup %3104  ;;  %v2029_v33 = vmul.f32 2.0, %v3103_v34 }
 0x685   :  { %v3107_v35 = vpop.eup %3106  ;;  %v2019_v22 = vadd.f32 1.0, %v3105_v17 }
 0x686   :  { %v2785_v32 = vadd.f32 -1.0, %v2029_v33  ;;  %v3109_v8 = vpop.eup %3108  ;;  %v2031_v30 = vmul.f32 %v3107_v35, %v4373_v39 }
 0x687   :  { %3110 = vrcp.f32 %v2019_v22  ;;  %v4578_v22 = vld [vmem:[%s4755_s2 + $0x88] ss:$16 sps:$4 sm:$0xff]  }
 0x688   :  { %v2032_v31 = vmul.f32 %v3109_v8, %v2785_v32  ;;  %v2075_v14 = vpop.f32.mrb[72].mxu0  ;;  %v2116_v15 = vpop.f32.mrb[72].mxu1  ;;  %v4572_v8 = vld [vmem:[%s4755_s2 + $0x80] ss:$16 sps:$4 sm:$0xff]  }
 0x689   :  { %v2123_v53 = vadd.f32 %v2075_v14, %v4845_v6  ;;  %v2125_v27 = vadd.f32 %v2116_v15, %v4846_v20  ;;  %v2077_v21 = vpop.f32.mrb[73].mxu0  ;;  %v2118_v28 = vpop.f32.mrb[73].mxu1  ;;  %v4599_v14 = vld [vmem:[%s4755_s2 + $0xa0] ss:$16 sps:$4 sm:$0xff]   ;;  %v4605_v15 = vld [vmem:[%s4755_s2 + $0xa8] ss:$16 sps:$4 sm:$0xff]  }
 0x68a   :  { %v4520_v9 = vadd.f32 %v2032_v31, %v2031_v30  ;;  %v2124_v42 = vadd.f32 %v2077_v21, %v4847_v46  ;;  %v2126_v11 = vadd.f32 %v2118_v28, %v4848_v19  ;;  %v2079_v58 = vpop.f32.mrb[74].mxu0  ;;  %v2120_v59 = vpop.f32.mrb[74].mxu1  ;;  %v4584_v30 = vld [vmem:[%s4755_s2 + $0xa4] ss:$16 sps:$4 sm:$0xff]   ;;  %v4623_v20 = vld [vmem:[%s4755_s2 + $0xc0] ss:$16 sps:$4 sm:$0xff]  }
 0x68b   :  { %v2786_v60 = vmul.f32 -1.442695, %v2123_v53  ;;  %v2080_v39 = vpop.f32.mrb[75].mxu0  ;;  %v2121_v61 = vpop.f32.mrb[75].mxu1  ;;  %v2788_v12 = vmul.f32 -1.442695, %v2125_v27 }
 0x68c   :  { %3112 = vtanh.f32 %v4520_v9  ;;  %v2787_v63 = vmul.f32 -1.442695, %v2124_v42  ;;  %v2789_v0 = vmul.f32 -1.442695, %v2126_v11  ;;  %v4611_v6 = vld [vmem:[%s4755_s2 + $0xc4] ss:$16 sps:$4 sm:$0xff]  }
 0x68d   :  { %3114 = vpow2.f32 %v2786_v60  ;;  %v4617_v53 = vld [vmem:[%s4755_s2 + $0xcc] ss:$16 sps:$4 sm:$0xff]   ;;  %v4629_v27 = vld [vmem:[%s4755_s2 + $0xc8] ss:$16 sps:$4 sm:$0xff]   ;;  %v4635_v21 = vld [vmem:[%s4755_s2 + $0xe4] ss:$16 sps:$4 sm:$0xff]  }
 0x68e   :  { %3116 = vpow2.f32 %v2787_v63  ;;  %v4641_v28 = vld [vmem:[%s4755_s2 + $0xec] ss:$16 sps:$4 sm:$0xff]   ;;  %v4647_v46 = vld [vmem:[%s4755_s2 + $0xe0] ss:$16 sps:$4 sm:$0xff]   ;;  %v4653_v42 = vld [vmem:[%s4755_s2 + $0xe8] ss:$16 sps:$4 sm:$0xff]  }
 0x68f   :  { %3118 = vpow2.f32 %v2789_v0  ;;  %v4849_v61 = vld [vmem:[#allocation40_spill] sm:$0xff]  ;;  %v4850_v0 = vld [vmem:[#allocation39_spill] sm:$0xff] }
 0x691   :  { %v3111_v2 = vpop.eup %3110 }
 0x696   :  { %v3113_v3 = vpop.eup %3112 }
 0x697   :  { %v2035_v4 = vmul.f32 %v3113_v3, %v3111_v2  ;;  %v3115_v5 = vpop.eup %3114 }
 0x698   :  { %v3117_v44 = vpop.eup %3116  ;;  %v2139_v38 = vadd.f32 1.0, %v3115_v5  ;;  %v4851_v5 = vld [vmem:[#allocation42_spill] sm:$0xff] }
 0x699   :  { %v2162_v29 = vpack.c.bf16 %v2035_v4, %v2035_v4  ;;  %v3119_v18 = vpop.eup %3118  ;;  %v2140_v36 = vadd.f32 1.0, %v3117_v44 }
 0x69a   :  { %v2142_v37 = vadd.f32 1.0, %v3119_v18 }
 0x69b   :  { %2196 = vmatmul.mubr.bf16.vlgmr.msra.gmra.mrb[76].mxu0 %v2162_v29  ;;  %2237 = vmatmul.mubr.bf16.vlgmr.msra.gmra.mrb[76].mxu1 %v2162_v29  ;;  %v4852_v29 = vld [vmem:[#allocation41_spill] sm:$0xff] }
 0x69c   :  { %2286 = vmatpush1.bf16.msra.mxu0 %v4417_v1  ;;  %2327 = vmatpush1.bf16.msra.mxu1 %v4423_v62  ;;  %3120 = vrcp.f32 %v2142_v37 }
 0x69d   :  { %2287 = vmatprep.subr.bf16.mxu0 %v4429_v52  ;;  %2328 = vmatprep.subr.bf16.mxu1 %v4435_v54  ;;  %3122 = vpow2.f32 %v2788_v12 }
 0x69e   :  { %2317 = vmatprep.mubr.bf16.mxu0 %v4812_v10  ;;  %2358 = vmatprep.mubr.bf16.mxu1 %v4812_v10  ;;  %3124 = vrcp.f32 %v2140_v36 }
 0x69f   :  { %3126 = vrcp.f32 %v2139_v38 }
 0x6a0   :  { %2288 = vmatpush1.bf16.msra.mxu0 %v4443_v23  ;;  %2329 = vmatpush1.bf16.msra.mxu1 %v4449_v25 }
 0x6a1   :  { %2289 = vmatprep.subr.bf16.mxu0 %v4455_v49  ;;  %2330 = vmatprep.subr.bf16.mxu1 %v4461_v55 }
 0x6a4   :  { %2290 = vmatpush1.bf16.msra.mxu0 %v4538_v50  ;;  %2331 = vmatpush1.bf16.msra.mxu1 %v4468_v40 }
 0x6a5   :  { %2291 = vmatprep.subr.bf16.mxu0 %v4474_v51  ;;  %2332 = vmatprep.subr.bf16.mxu1 %v4480_v41 }
 0x6a6   :  { %v3121_v45 = vpop.eup %3120 }
 0x6a7   :  { %v3123_v43 = vpop.eup %3122  ;;  %v2151_v48 = vmul.f32 2.0, %v3121_v45 }
 0x6a8   :  { %2292 = vmatpush1.bf16.msra.mxu0 %v4547_v13  ;;  %2333 = vmatpush1.bf16.msra.mxu1 %v4553_v26  ;;  %v3125_v47 = vpop.eup %3124  ;;  %v2141_v33 = vadd.f32 1.0, %v3123_v43 }
 0x6a9   :  { %2293 = vmatprep.subr.bf16.mxu0 %v4559_v24  ;;  %2334 = vmatprep.subr.bf16.mxu1 %v4565_v16  ;;  %v2790_v34 = vadd.f32 -1.0, %v2151_v48  ;;  %v3127_v17 = vpop.eup %3126  ;;  %v2153_v35 = vmul.f32 %v3125_v47, %v4399_v7  ;;  %v4590_v7 = vld [vmem:[%s4755_s2 + $0xac] ss:$16 sps:$4 sm:$0xff]  }
 0x6aa   :  { %3128 = vrcp.f32 %v2141_v33 }
 0x6ab   :  { %v2154_v32 = vmul.f32 %v3127_v17, %v2790_v34 }
 0x6ac   :  { %2294 = vmatpush1.bf16.msra.mxu0 %v4572_v8  ;;  %2335 = vmatpush1.bf16.msra.mxu1 %v4578_v22 }
 0x6ad   :  { %2295 = vmatprep.subr.bf16.mxu0 %v4584_v30  ;;  %2336 = vmatprep.subr.bf16.mxu1 %v4590_v7  ;;  %v4593_v31 = vadd.f32 %v2154_v32, %v2153_v35 }
 0x6af   :  { %3130 = vtanh.f32 %v4593_v31 }
 0x6b0   :  { %2296 = vmatpush1.bf16.msra.mxu0 %v4599_v14  ;;  %2337 = vmatpush1.bf16.msra.mxu1 %v4605_v15 }
 0x6b1   :  { %2297 = vmatprep.subr.bf16.mxu0 %v4611_v6  ;;  %2338 = vmatprep.subr.bf16.mxu1 %v4617_v53 }
 0x6b4   :  { %2298 = vmatpush1.bf16.msra.mxu0 %v4623_v20  ;;  %2339 = vmatpush1.bf16.msra.mxu1 %v4629_v27  ;;  %v3129_v19 = vpop.eup %3128 }
 0x6b5   :  { %2299 = vmatprep.subr.bf16.mxu0 %v4635_v21  ;;  %2340 = vmatprep.subr.bf16.mxu1 %v4641_v28 }
 0x6b8   :  { %2300 = vmatpush1.bf16.msra.mxu0 %v4647_v46  ;;  %2341 = vmatpush1.bf16.msra.mxu1 %v4653_v42 }
 0x6b9   :  { %2407 = vmatprep.subr.bf16.mxu0 %v4504_v56  ;;  %2448 = vmatprep.subr.bf16.mxu1 %v4510_v57  ;;  %v3131_v11 = vpop.eup %3130 }
 0x6ba   :  { %v2157_v58 = vmul.f32 %v3131_v11, %v3129_v19 }
 0x6bc   :  { %v2284_v59 = vpack.c.bf16 %v2157_v58, %v2157_v58 }
 0x6be   :  { %2318 = vmatmul.mubr.bf16.vlgmr.msra.gmra.mrb[80].mxu0 %v2284_v59  ;;  %2359 = vmatmul.mubr.bf16.vlgmr.msra.gmra.mrb[80].mxu1 %v2284_v59 }
 0x6bf   :  { %2408 = vmatpush1.bf16.msra.mxu0 %v4417_v1  ;;  %2449 = vmatpush1.bf16.msra.mxu1 %v4423_v62 }
 0x6c0   :  { %2409 = vmatprep.subr.bf16.mxu0 %v4429_v52  ;;  %2450 = vmatprep.subr.bf16.mxu1 %v4435_v54 }
 0x6c1   :  { %2439 = vmatprep.mubr.bf16.mxu0 %v4812_v10  ;;  %2480 = vmatprep.mubr.bf16.mxu1 %v4812_v10 }
 0x6c3   :  { %2410 = vmatpush1.bf16.msra.mxu0 %v4443_v23  ;;  %2451 = vmatpush1.bf16.msra.mxu1 %v4449_v25 }
 0x6c4   :  { %2411 = vmatprep.subr.bf16.mxu0 %v4455_v49  ;;  %2452 = vmatprep.subr.bf16.mxu1 %v4461_v55 }
 0x6c7   :  { %2412 = vmatpush1.bf16.msra.mxu0 %v4538_v50  ;;  %2453 = vmatpush1.bf16.msra.mxu1 %v4468_v40 }
 0x6c8   :  { %2413 = vmatprep.subr.bf16.mxu0 %v4474_v51  ;;  %2454 = vmatprep.subr.bf16.mxu1 %v4480_v41 }
 0x6cb   :  { %2414 = vmatpush1.bf16.msra.mxu0 %v4547_v13  ;;  %2455 = vmatpush1.bf16.msra.mxu1 %v4553_v26 }
 0x6cc   :  { %2415 = vmatprep.subr.bf16.mxu0 %v4559_v24  ;;  %2456 = vmatprep.subr.bf16.mxu1 %v4565_v16 }
 0x6cf   :  { %2416 = vmatpush1.bf16.msra.mxu0 %v4572_v8  ;;  %2457 = vmatpush1.bf16.msra.mxu1 %v4578_v22 }
 0x6d0   :  { %2417 = vmatprep.subr.bf16.mxu0 %v4584_v30  ;;  %2458 = vmatprep.subr.bf16.mxu1 %v4590_v7 }
 0x6d3   :  { %2418 = vmatpush1.bf16.msra.mxu0 %v4599_v14  ;;  %2459 = vmatpush1.bf16.msra.mxu1 %v4605_v15 }
 0x6d4   :  { %2419 = vmatprep.subr.bf16.mxu0 %v4611_v6  ;;  %2460 = vmatprep.subr.bf16.mxu1 %v4617_v53 }
 0x6d7   :  { %2420 = vmatpush1.bf16.msra.mxu0 %v4623_v20  ;;  %2461 = vmatpush1.bf16.msra.mxu1 %v4629_v27 }
 0x6d8   :  { %2421 = vmatprep.subr.bf16.mxu0 %v4635_v21  ;;  %2462 = vmatprep.subr.bf16.mxu1 %v4641_v28 }
 0x6db   :  { %2422 = vmatpush1.bf16.msra.mxu0 %v4647_v46  ;;  %2463 = vmatpush1.bf16.msra.mxu1 %v4653_v42 }
 0x6dc   :  { %2529 = vmatprep.subr.bf16.mxu0 %v4504_v56  ;;  %2570 = vmatprep.subr.bf16.mxu1 %v4510_v57 }
 0x76e   :  { %v2197_v60 = vpop.f32.mrb[76].mxu0  ;;  %v2238_v39 = vpop.f32.mrb[76].mxu1 }
 0x76f   :  { %v2245_v63 = vadd.f32 %v2197_v60, %v4849_v61  ;;  %v2247_v2 = vadd.f32 %v2238_v39, %v4850_v0  ;;  %v2199_v3 = vpop.f32.mrb[77].mxu0  ;;  %v2240_v4 = vpop.f32.mrb[77].mxu1 }
 0x770   :  { %v2246_v44 = vadd.f32 %v2199_v3, %v4851_v5  ;;  %v2248_v18 = vadd.f32 %v2240_v4, %v4852_v29  ;;  %v2201_v12 = vpop.f32.mrb[78].mxu0  ;;  %v2242_v36 = vpop.f32.mrb[78].mxu1  ;;  %v4854_v5 = vld [vmem:[#allocation43_spill] sm:$0xff] }
 0x771   :  { %v2791_v37 = vmul.f32 -1.442695, %v2245_v63  ;;  %v2202_v38 = vpop.f32.mrb[79].mxu0  ;;  %v2243_v45 = vpop.f32.mrb[79].mxu1  ;;  %v2793_v34 = vmul.f32 -1.442695, %v2247_v2 }
 0x772   :  { %v2792_v56 = vmul.f32 -1.442695, %v2246_v44  ;;  %v2794_v43 = vmul.f32 -1.442695, %v2248_v18  ;;  %v4853_v2 = vld [vmem:[#allocation44_spill] sm:$0xff]  ;;  %v4855_v36 = vld [vmem:[#allocation46_spill] sm:$0xff] }
 0x773   :  { %3132 = vpow2.f32 %v2791_v37  ;;  %v4856_v38 = vld [vmem:[#allocation45_spill] sm:$0xff] }
 0x774   :  { %3134 = vpow2.f32 %v2792_v56 }
 0x775   :  { %3136 = vpow2.f32 %v2794_v43 }
 0x77d   :  { %v3133_v57 = vpop.eup %3132 }
 0x77e   :  { %v3135_v48 = vpop.eup %3134  ;;  %v2261_v35 = vadd.f32 1.0, %v3133_v57 }
 0x77f   :  { %v3137_v47 = vpop.eup %3136  ;;  %v2262_v17 = vadd.f32 1.0, %v3135_v48 }
 0x780   :  { %v2264_v33 = vadd.f32 1.0, %v3137_v47 }
 0x782   :  { %3138 = vrcp.f32 %v2264_v33 }
 0x783   :  { %3140 = vpow2.f32 %v2793_v34 }
 0x784   :  { %3142 = vrcp.f32 %v2262_v17 }
 0x785   :  { %3144 = vrcp.f32 %v2261_v35 }
 0x78c   :  { %v3139_v32 = vpop.eup %3138 }
 0x78d   :  { %v3141_v19 = vpop.eup %3140  ;;  %v2273_v11 = vmul.f32 2.0, %v3139_v32 }
 0x78e   :  { %v3143_v58 = vpop.eup %3142  ;;  %v2263_v39 = vadd.f32 1.0, %v3141_v19 }
 0x78f   :  { %v2795_v59 = vadd.f32 -1.0, %v2273_v11  ;;  %v3145_v60 = vpop.eup %3144  ;;  %v2275_v61 = vmul.f32 %v3143_v58, %v4520_v9 }
 0x790   :  { %3146 = vrcp.f32 %v2263_v39 }
 0x791   :  { %v2276_v63 = vmul.f32 %v3145_v60, %v2795_v59  ;;  %v2319_v0 = vpop.f32.mrb[80].mxu0  ;;  %v2360_v3 = vpop.f32.mrb[80].mxu1 }
 0x792   :  { %v2367_v4 = vadd.f32 %v2319_v0, %v4853_v2  ;;  %v2369_v44 = vadd.f32 %v2360_v3, %v4854_v5  ;;  %v2321_v29 = vpop.f32.mrb[81].mxu0  ;;  %v2362_v18 = vpop.f32.mrb[81].mxu1 }
 0x793   :  { %v4699_v12 = vadd.f32 %v2276_v63, %v2275_v61  ;;  %v2368_v37 = vadd.f32 %v2321_v29, %v4855_v36  ;;  %v2370_v45 = vadd.f32 %v2362_v18, %v4856_v38  ;;  %v2323_v56 = vpop.f32.mrb[82].mxu0  ;;  %v2364_v43 = vpop.f32.mrb[82].mxu1 }
 0x794   :  { %v2796_v57 = vmul.f32 -1.442695, %v2367_v4  ;;  %v2324_v9 = vpop.f32.mrb[83].mxu0  ;;  %v2365_v48 = vpop.f32.mrb[83].mxu1  ;;  %v2798_v59 = vmul.f32 -1.442695, %v2369_v44 }
 0x795   :  { %3148 = vtanh.f32 %v4699_v12  ;;  %v2797_v47 = vmul.f32 -1.442695, %v2368_v37  ;;  %v2799_v34 = vmul.f32 -1.442695, %v2370_v45 }
 0x796   :  { %3150 = vpow2.f32 %v2796_v57 }
 0x797   :  { %3152 = vpow2.f32 %v2797_v47 }
 0x798   :  { %3154 = vpow2.f32 %v2799_v34  ;;  %v4861_v34 = vld [vmem:[#allocation52_spill] sm:$0xff] }
 0x79a   :  { %v3147_v17 = vpop.eup %3146 }
 0x79f   :  { %v3149_v33 = vpop.eup %3148 }
 0x7a0   :  { %v2279_v35 = vmul.f32 %v3149_v33, %v3147_v17  ;;  %v3151_v32 = vpop.eup %3150  ;;  %v4862_v33 = vld [vmem:[#allocation51_spill] sm:$0xff] }
 0x7a1   :  { %v3153_v19 = vpop.eup %3152  ;;  %v2383_v61 = vadd.f32 1.0, %v3151_v32 }
 0x7a2   :  { %v2406_v11 = vpack.c.bf16 %v2279_v35, %v2279_v35  ;;  %v3155_v58 = vpop.eup %3154  ;;  %v2384_v60 = vadd.f32 1.0, %v3153_v19 }
 0x7a3   :  { %v2386_v39 = vadd.f32 1.0, %v3155_v58  ;;  %v4863_v58 = vld [vmem:[#allocation54_spill] sm:$0xff] }
 0x7a4   :  { %2440 = vmatmul.mubr.bf16.vlgmr.msra.gmra.mrb[84].mxu0 %v2406_v11  ;;  %2481 = vmatmul.mubr.bf16.vlgmr.msra.gmra.mrb[84].mxu1 %v2406_v11 }
 0x7a5   :  { %2530 = vmatpush1.bf16.msra.mxu0 %v4417_v1  ;;  %2571 = vmatpush1.bf16.msra.mxu1 %v4423_v62  ;;  %3156 = vrcp.f32 %v2386_v39 }
 0x7a6   :  { %2531 = vmatprep.subr.bf16.mxu0 %v4429_v52  ;;  %2572 = vmatprep.subr.bf16.mxu1 %v4435_v54  ;;  %3158 = vpow2.f32 %v2798_v59 }
 0x7a7   :  { %2561 = vmatprep.mubr.bf16.mxu0 %v4812_v10  ;;  %2602 = vmatprep.mubr.bf16.mxu1 %v4812_v10  ;;  %3160 = vrcp.f32 %v2384_v60  ;;  %v4864_v60 = vld [vmem:[#allocation53_spill] sm:$0xff] }
 0x7a8   :  { %3162 = vrcp.f32 %v2383_v61 }
 0x7a9   :  { %2532 = vmatpush1.bf16.msra.mxu0 %v4443_v23  ;;  %2573 = vmatpush1.bf16.msra.mxu1 %v4449_v25 }
 0x7aa   :  { %2533 = vmatprep.subr.bf16.mxu0 %v4455_v49  ;;  %2574 = vmatprep.subr.bf16.mxu1 %v4461_v55 }
 0x7ad   :  { %2534 = vmatpush1.bf16.msra.mxu0 %v4538_v50  ;;  %2575 = vmatpush1.bf16.msra.mxu1 %v4468_v40 }
 0x7ae   :  { %2535 = vmatprep.subr.bf16.mxu0 %v4474_v51  ;;  %2576 = vmatprep.subr.bf16.mxu1 %v4480_v41 }
 0x7af   :  { %v3157_v1 = vpop.eup %3156 }
 0x7b0   :  { %v3159_v10 = vpop.eup %3158  ;;  %v2395_v62 = vmul.f32 2.0, %v3157_v1 }
 0x7b1   :  { %2536 = vmatpush1.bf16.msra.mxu0 %v4547_v13  ;;  %2577 = vmatpush1.bf16.msra.mxu1 %v4553_v26  ;;  %v3161_v52 = vpop.eup %3160  ;;  %v2385_v25 = vadd.f32 1.0, %v3159_v10 }
 0x7b2   :  { %2537 = vmatprep.subr.bf16.mxu0 %v4559_v24  ;;  %2578 = vmatprep.subr.bf16.mxu1 %v4565_v16  ;;  %v2800_v54 = vadd.f32 -1.0, %v2395_v62  ;;  %v3163_v23 = vpop.eup %3162  ;;  %v2397_v49 = vmul.f32 %v3161_v52, %v4593_v31  ;;  %v4857_v16 = vld [vmem:[#allocation48_spill] sm:$0xff] }
 0x7b3   :  { %3164 = vrcp.f32 %v2385_v25 }
 0x7b4   :  { %v2398_v55 = vmul.f32 %v3163_v23, %v2800_v54 }
 0x7b5   :  { %2538 = vmatpush1.bf16.msra.mxu0 %v4572_v8  ;;  %2579 = vmatpush1.bf16.msra.mxu1 %v4578_v22  ;;  %v4858_v22 = vld [vmem:[#allocation47_spill] sm:$0xff] }
 0x7b6   :  { %2539 = vmatprep.subr.bf16.mxu0 %v4584_v30  ;;  %2580 = vmatprep.subr.bf16.mxu1 %v4590_v7  ;;  %v4727_v40 = vadd.f32 %v2398_v55, %v2397_v49 }
 0x7b8   :  { %3166 = vtanh.f32 %v4727_v40 }
 0x7b9   :  { %2540 = vmatpush1.bf16.msra.mxu0 %v4599_v14  ;;  %2581 = vmatpush1.bf16.msra.mxu1 %v4605_v15  ;;  %v4859_v14 = vld [vmem:[#allocation50_spill] sm:$0xff] }
 0x7ba   :  { %2541 = vmatprep.subr.bf16.mxu0 %v4611_v6  ;;  %2582 = vmatprep.subr.bf16.mxu1 %v4617_v53  ;;  %v4860_v6 = vld [vmem:[#allocation49_spill] sm:$0xff] }
 0x7bd   :  { %2542 = vmatpush1.bf16.msra.mxu0 %v4623_v20  ;;  %2583 = vmatpush1.bf16.msra.mxu1 %v4629_v27  ;;  %v3165_v51 = vpop.eup %3164 }
 0x7be   :  { %2543 = vmatprep.subr.bf16.mxu0 %v4635_v21  ;;  %2584 = vmatprep.subr.bf16.mxu1 %v4641_v28 }
 0x7c1   :  { %2544 = vmatpush1.bf16.msra.mxu0 %v4647_v46  ;;  %2585 = vmatpush1.bf16.msra.mxu1 %v4653_v42 }
 0x7c2   :  { %v3167_v41 = vpop.eup %3166 }
 0x7c3   :  { %v2401_v50 = vmul.f32 %v3167_v41, %v3165_v51 }
 0x7c5   :  { %v2528_v13 = vpack.c.bf16 %v2401_v50, %v2401_v50 }
 0x7c7   :  { %2562 = vmatmul.mubr.bf16.vlgmr.msra.gmra.mrb[88].mxu0 %v2528_v13  ;;  %2603 = vmatmul.mubr.bf16.vlgmr.msra.gmra.mrb[88].mxu1 %v2528_v13 }
 0x877   :  { %v2441_v26 = vpop.f32.mrb[84].mxu0  ;;  %v2482_v24 = vpop.f32.mrb[84].mxu1 }
 0x878   :  { %v2489_v8 = vadd.f32 %v2441_v26, %v4857_v16  ;;  %v2491_v30 = vadd.f32 %v2482_v24, %v4858_v22  ;;  %v2443_v7 = vpop.f32.mrb[85].mxu0  ;;  %v2484_v31 = vpop.f32.mrb[85].mxu1 }
 0x879   :  { %v2490_v15 = vadd.f32 %v2443_v7, %v4859_v14  ;;  %v2492_v53 = vadd.f32 %v2484_v31, %v4860_v6  ;;  %v2445_v20 = vpop.f32.mrb[86].mxu0  ;;  %v2486_v27 = vpop.f32.mrb[86].mxu1 }
 0x87a   :  { %v2801_v21 = vmul.f32 -1.442695, %v2489_v8  ;;  %v2446_v28 = vpop.f32.mrb[87].mxu0  ;;  %v2487_v46 = vpop.f32.mrb[87].mxu1  ;;  %v2803_v4 = vmul.f32 -1.442695, %v2491_v30 }
 0x87b   :  { %v2802_v42 = vmul.f32 -1.442695, %v2490_v15  ;;  %v2804_v63 = vmul.f32 -1.442695, %v2492_v53 }
 0x87c   :  { %3168 = vpow2.f32 %v2801_v21 }
 0x87d   :  { %3170 = vpow2.f32 %v2802_v42 }
 0x87e   :  { %3172 = vpow2.f32 %v2804_v63 }
 0x886   :  { %v3169_v0 = vpop.eup %3168 }
 0x887   :  { %v3171_v3 = vpop.eup %3170  ;;  %v2505_v29 = vadd.f32 1.0, %v3169_v0 }
 0x888   :  { %v3173_v2 = vpop.eup %3172  ;;  %v2506_v5 = vadd.f32 1.0, %v3171_v3 }
 0x889   :  { %v2508_v44 = vadd.f32 1.0, %v3173_v2 }
 0x88b   :  { %3174 = vrcp.f32 %v2508_v44 }
 0x88c   :  { %3176 = vpow2.f32 %v2803_v4 }
 0x88d   :  { %3178 = vrcp.f32 %v2506_v5 }
 0x88e   :  { %3180 = vrcp.f32 %v2505_v29 }
 0x895   :  { %v3175_v18 = vpop.eup %3174 }
 0x896   :  { %v3177_v36 = vpop.eup %3176  ;;  %v2517_v37 = vmul.f32 2.0, %v3175_v18 }
 0x897   :  { %v3179_v38 = vpop.eup %3178  ;;  %v2507_v43 = vadd.f32 1.0, %v3177_v36 }
 0x898   :  { %v2805_v45 = vadd.f32 -1.0, %v2517_v37  ;;  %v3181_v56 = vpop.eup %3180  ;;  %v2519_v57 = vmul.f32 %v3179_v38, %v4699_v12 }
 0x899   :  { %3182 = vrcp.f32 %v2507_v43 }
 0x89a   :  { %v2520_v9 = vmul.f32 %v3181_v56, %v2805_v45  ;;  %v2563_v48 = vpop.f32.mrb[88].mxu0  ;;  %v2604_v47 = vpop.f32.mrb[88].mxu1 }
 0x89b   :  { %v2611_v17 = vadd.f32 %v2563_v48, %v4861_v34  ;;  %v2613_v35 = vadd.f32 %v2604_v47, %v4862_v33  ;;  %v2565_v32 = vpop.f32.mrb[89].mxu0  ;;  %v2606_v19 = vpop.f32.mrb[89].mxu1 }
 0x89c   :  { %v2521_v11 = vadd.f32 %v2520_v9, %v2519_v57  ;;  %v2612_v59 = vadd.f32 %v2565_v32, %v4863_v58  ;;  %v2614_v39 = vadd.f32 %v2606_v19, %v4864_v60  ;;  %v2567_v61 = vpop.f32.mrb[90].mxu0  ;;  %v2608_v1 = vpop.f32.mrb[90].mxu1 }
 0x89d   :  { %v2806_v10 = vmul.f32 -1.442695, %v2611_v17  ;;  %v2568_v62 = vpop.f32.mrb[91].mxu0  ;;  %v2609_v12 = vpop.f32.mrb[91].mxu1  ;;  %v2808_v50 = vmul.f32 -1.442695, %v2613_v35 }
 0x89e   :  { %3184 = vtanh.f32 %v2521_v11  ;;  %v2807_v52 = vmul.f32 -1.442695, %v2612_v59  ;;  %v2809_v54 = vmul.f32 -1.442695, %v2614_v39 }
 0x89f   :  { %3186 = vpow2.f32 %v2806_v10 }
 0x8a0   :  { %3188 = vpow2.f32 %v2807_v52 }
 0x8a1   :  { %3190 = vpow2.f32 %v2809_v54 }
 0x8a3   :  { %v3183_v23 = vpop.eup %3182 }
 0x8a8   :  { %v3185_v25 = vpop.eup %3184 }
 0x8a9   :  { %v2523_v49 = vmul.f32 %v3185_v25, %v3183_v23  ;;  %v3187_v55 = vpop.eup %3186 }
 0x8aa   :  { %v3189_v51 = vpop.eup %3188  ;;  %v2627_v24 = vadd.f32 1.0, %v3187_v55 }
 0x8ab   :  { %v3191_v41 = vpop.eup %3190  ;;  %v2628_v13 = vadd.f32 1.0, %v3189_v51 }
 0x8ac   :  { %v2630_v26 = vadd.f32 1.0, %v3191_v41 }
 0x8ae   :  { %3192 = vrcp.f32 %v2630_v26 }
 0x8af   :  { %3194 = vpow2.f32 %v2808_v50 }
 0x8b0   :  { %3196 = vrcp.f32 %v2628_v13 }
 0x8b1   :  { %3198 = vrcp.f32 %v2627_v24 }
 0x8b8   :  { %v3193_v16 = vpop.eup %3192 }
 0x8b9   :  { %v3195_v8 = vpop.eup %3194  ;;  %v2639_v22 = vmul.f32 2.0, %v3193_v16 }
 0x8ba   :  { %v3197_v30 = vpop.eup %3196  ;;  %v2629_v14 = vadd.f32 1.0, %v3195_v8 }
 0x8bb   :  { %v2810_v7 = vadd.f32 -1.0, %v2639_v22  ;;  %v3199_v31 = vpop.eup %3198  ;;  %v2641_v15 = vmul.f32 %v3197_v30, %v4727_v40 }
 0x8bc   :  { %3200 = vrcp.f32 %v2629_v14 }
 0x8bd   :  { %v2642_v6 = vmul.f32 %v3199_v31, %v2810_v7 }
 0x8bf   :  { %v2643_v53 = vadd.f32 %v2642_v6, %v2641_v15 }
 0x8c1   :  { %3202 = vtanh.f32 %v2643_v53 }
 0x8c6   :  { %v3201_v20 = vpop.eup %3200 }
 0x8cb   :  { %v3203_v27 = vpop.eup %3202 }
 0x8cc   :  { %v2645_v21 = vmul.f32 %v3203_v27, %v3201_v20 }
 0x8ce   :  { %v2646_v28 = vsub.f32 %v2523_v49, %v2645_v21 }
 0x8d0   :  { %v2647_v46 = vand.u32 2147483647, %v2646_v28 }
 0x8d2   :  { %2648 = vadd.xlane.f32.xlu0 %v2647_v46 }
 0x95f   :  { %v2649_v42 = vpop.xlane.xlu0 %2648 }
 0x960   :  { %v2650_v63 = vsub.f32 0.0, %v2649_v42 }
 0x962   :  { %v2651_v0 = vmul.f32 1.442695, %v2650_v63 }
 0x964   :  { %3204 = vpow2.f32 %v2651_v0 }
 0x96e   :  { %v3205_v3 = vpop.eup %3204 }
 0x96f   :  { %2654 = vst.msk [vmem:[%s4757_s4] sm:$0xff] %vm2653_vm0, %v3205_v3 }

</bundles_post_ra>
